<compile_context>
chip_gen: v7x
topology: tpu7x:2x2x1
jax: 0.10.0
libtpu: 0.0.40
codegen_flags: <defaults>
</compile_context>

<pallas_src>
import math
import functools

import jax
import jax.numpy as jnp
from jax import lax
from jax.experimental import pallas as pl
from jax.experimental.pallas import tpu as pltpu


# ------------------------------ MXU helpers -------------------------------- #

def _mm(a, b):
    """(M, K) @ (K, N) with f32 accumulation on the MXU."""
    return lax.dot_general(a, b, (((1,), (0,)), ((), ())),
                           preferred_element_type=jnp.float32)


def _mm_t(a, b):
    """(M, K) @ (N, K).T with f32 accumulation — no materialised transpose."""
    return lax.dot_general(a, b, (((1,), (1,)), ((), ())),
                           preferred_element_type=jnp.float32)


# ------------------------------ fused kernel ------------------------------- #

def _fused_phase_mha_kernel(
        xr_q_ref, xp_q_ref,            # (1, tq, D) f32  query-tile activations
        xr_kv_ref, xp_kv_ref,          # (1, tk, D) f32  kv-tile activations
        wq_r_ref, bq_r_ref,            # (D, D) bf16, (1, D) f32
        wq_p_ref, bq_p_ref,
        wkv_r_ref, bkv_r_ref,          # (D, 2D) bf16, (1, 2D) f32  fused [K|V]
        wkv_p_ref, bkv_p_ref,
        wo_r_ref, bo_r_ref,            # (D, D) bf16, (1, D) f32
        wo_p_ref, bo_p_ref,
        out_r_ref, out_p_ref,          # (1, tq, D) f32
        q_cat_sc,                      # (tq, 2D) f32  per-head [qr_i | qp_i]
        kv_r_sc, kv_p_sc,              # (tk, 2D) bf16 per-stream [K | V]
        m_sc, l_sc,                    # (tq, h) f32   online-softmax state per head
        acc_r_sc, acc_p_sc,            # (tq, D) f32   head-merged PV accumulators
        *, h, d_k):
    D = h * d_k
    ki = pl.program_id(2)
    inv_sqrt_dk = 1.0 / math.sqrt(d_k)

    # ---- per-(batch, q-tile) init: Q projection + softmax state (ki == 0) -----
    @pl.when(ki == 0)
    def _():
        xr_q = xr_q_ref[0].astype(jnp.bfloat16)
        xp_q = xp_q_ref[0].astype(jnp.bfloat16)
        q_r = _mm(xr_q, wq_r_ref[...]) + bq_r_ref[...]          # (tq, D) f32
        q_p = _mm(xp_q, wq_p_ref[...]) + bq_p_ref[...]          # (tq, D) f32
        # Per-head "complex-cat" layout [qr_i | qp_i] written into VMEM scratch at
        # static lane offsets -> each score matmul is one 2*d_k-deep contraction.
        for i in range(h):
            q_cat_sc[:, 2 * i * d_k:2 * i * d_k + d_k] = q_r[:, i * d_k:(i + 1) * d_k]
            q_cat_sc[:, 2 * i * d_k + d_k:2 * (i + 1) * d_k] = q_p[:, i * d_k:(i + 1) * d_k]
        m_sc[...] = jnp.full_like(m_sc, -jnp.inf)
        l_sc[...] = jnp.zeros_like(l_sc)
        acc_r_sc[...] = jnp.zeros_like(acc_r_sc)
        acc_p_sc[...] = jnp.zeros_like(acc_p_sc)

    # ---- K/V projection for this kv tile (fused [K|V] weights, lane-dense) ----
    xr_kv = xr_kv_ref[0].astype(jnp.bfloat16)
    xp_kv = xp_kv_ref[0].astype(jnp.bfloat16)
    kv_r_sc[...] = (_mm(xr_kv, wkv_r_ref[...]) + bkv_r_ref[...]).astype(jnp.bfloat16)
    kv_p_sc[...] = (_mm(xp_kv, wkv_p_ref[...]) + bkv_p_ref[...]).astype(jnp.bfloat16)

    # ---- per-head fused complex scores + online softmax + PV accumulation -----
    for i in range(h):
        ksl = slice(i * d_k, (i + 1) * d_k)
        vsl = slice(D + i * d_k, D + (i + 1) * d_k)
        q_cat = q_cat_sc[:, 2 * i * d_k:2 * (i + 1) * d_k].astype(jnp.bfloat16)
        k_r = kv_r_sc[:, ksl]
        k_p = kv_p_sc[:, ksl]
        v_r = kv_r_sc[:, vsl]
        v_p = kv_p_sc[:, vsl]

        # One K=2*d_k matmul per score component instead of two K=d_k matmuls.
        s_real = _mm_t(q_cat, jnp.concatenate([k_r, -k_p], axis=-1))    # (tq, tk)
        s_phase = _mm_t(q_cat, jnp.concatenate([k_p, k_r], axis=-1))    # (tq, tk)
        scores = jnp.sqrt(s_real * s_real + s_phase * s_phase) * inv_sqrt_dk

        m_prev = m_sc[:, i:i + 1]                                       # (tq, 1)
        m_new = jnp.maximum(m_prev, jnp.max(scores, axis=-1, keepdims=True))
        alpha = jnp.exp(m_prev - m_new)
        p = jnp.exp(scores - m_new)                                     # (tq, tk)
        l_sc[:, i:i + 1] = alpha * l_sc[:, i:i + 1] + jnp.sum(p, axis=-1, keepdims=True)
        m_sc[:, i:i + 1] = m_new
        # dropout(p_attn): eval-mode identity; p_attn is never written to HBM.
        p_bf = p.astype(jnp.bfloat16)
        acc_r_sc[:, ksl] = alpha * acc_r_sc[:, ksl] + _mm(p_bf, v_r)
        acc_p_sc[:, ksl] = alpha * acc_p_sc[:, ksl] + _mm(p_bf, v_p)

    # ---- finalize: normalise, output projection + bias + residual (last kv) ---
    @pl.when(ki == pl.num_programs(2) - 1)
    def _():
        inv_l = pl.reciprocal(l_sc[...], approx=True)                   # (tq, h) EUP
        for i in range(h):
            ksl = slice(i * d_k, (i + 1) * d_k)
            acc_r_sc[:, ksl] = acc_r_sc[:, ksl] * inv_l[:, i:i + 1]
            acc_p_sc[:, ksl] = acc_p_sc[:, ksl] * inv_l[:, i:i + 1]
        # Heads are already merged along lanes (head i at columns i*d_k:(i+1)*d_k),
        # so the output projection is one lane-dense (tq, D) x (D, D) matmul.
        xr = acc_r_sc[...].astype(jnp.bfloat16)
        xp = acc_p_sc[...].astype(jnp.bfloat16)
        out_r_ref[0] = _mm(xr, wo_r_ref[...]) + bo_r_ref[...] + xr_q_ref[0]
        out_p_ref[0] = _mm(xp, wo_p_ref[...]) + bo_p_ref[...] + xp_q_ref[0]


# ----------------------------- module wrapper ------------------------------ #

def prepare_params(params):
    """One-time host-side weight fusion / transpose / bf16 cast.

    torch nn.Linear computes y = x @ W.T + b, so weights are pre-transposed to
    (in, out); K and V weights per stream are fused into one (D, 2D) matrix so the
    per-kv-tile projection is a single lane-dense matmul.  Done once at parameter
    load time, hoisted out of the jitted per-call path.
    """
    def t(w):
        return jnp.asarray(w, jnp.float32).T

    D = params["wr"][0].shape[0]
    return dict(
        wq_r=t(params["wr"][0]).astype(jnp.bfloat16),
        bq_r=params["br"][0].reshape(1, D).astype(jnp.float32),
        wq_p=t(params["wp"][0]).astype(jnp.bfloat16),
        bq_p=params["bp"][0].reshape(1, D).astype(jnp.float32),
        wkv_r=jnp.concatenate([t(params["wr"][1]), t(params["wr"][2])],
                              axis=1).astype(jnp.bfloat16),
        bkv_r=jnp.concatenate([params["br"][1], params["br"][2]]
                              ).reshape(1, 2 * D).astype(jnp.float32),
        wkv_p=jnp.concatenate([t(params["wp"][1]), t(params["wp"][2])],
                              axis=1).astype(jnp.bfloat16),
        bkv_p=jnp.concatenate([params["bp"][1], params["bp"][2]]
                              ).reshape(1, 2 * D).astype(jnp.float32),
        wo_r=t(params["wr"][3]).astype(jnp.bfloat16),
        bo_r=params["br"][3].reshape(1, D).astype(jnp.float32),
        wo_p=t(params["wp"][3]).astype(jnp.bfloat16),
        bo_p=params["bp"][3].reshape(1, D).astype(jnp.float32),
    )


@functools.partial(jax.jit, static_argnames=("h", "tq", "tk"))
def multi_headed_attention(real, phase, pp, *, h, tq, tk):
    """real, phase: (B, S, d_model) f32.  Returns (out_real, out_phase) f32."""
    B, S, D = real.shape
    d_k = D // h
    assert D % h == 0 and S % tq == 0 and S % tk == 0
    assert tq % 8 == 0 and tk % 8 == 0

    kernel = functools.partial(_fused_phase_mha_kernel, h=h, d_k=d_k)

    q_spec = pl.BlockSpec((1, tq, D), lambda b, qi, ki: (b, qi, 0))
    kv_spec = pl.BlockSpec((1, tk, D), lambda b, qi, ki: (b, ki, 0))
    # Constant-index weight/bias blocks (fetched once, kept VMEM-resident).
    w_dd = pl.BlockSpec((D, D), lambda b, qi, ki: (0, 0))
    b_d = pl.BlockSpec((1, D), lambda b, qi, ki: (0, 0))
    w_d2d = pl.BlockSpec((D, 2 * D), lambda b, qi, ki: (0, 0))
    b_2d = pl.BlockSpec((1, 2 * D), lambda b, qi, ki: (0, 0))

    out_r, out_p = pl.pallas_call(
        kernel,
        grid=(B, S // tq, S // tk),
        out_shape=(jax.ShapeDtypeStruct((B, S, D), jnp.float32),
                   jax.ShapeDtypeStruct((B, S, D), jnp.float32)),
        in_specs=[q_spec, q_spec, kv_spec, kv_spec,
                  w_dd, b_d, w_dd, b_d,
                  w_d2d, b_2d, w_d2d, b_2d,
                  w_dd, b_d, w_dd, b_d],
        out_specs=(pl.BlockSpec((1, tq, D), lambda b, qi, ki: (b, qi, 0)),
                   pl.BlockSpec((1, tq, D), lambda b, qi, ki: (b, qi, 0))),
        scratch_shapes=[
            pltpu.VMEM((tq, 2 * D), jnp.float32),    # q_cat  [qr_i | qp_i] per head
            pltpu.VMEM((tk, 2 * D), jnp.bfloat16),   # kv_r   [K | V] real stream
            pltpu.VMEM((tk, 2 * D), jnp.bfloat16),   # kv_p   [K | V] phase stream
            pltpu.VMEM((tq, h), jnp.float32),        # m      running max per head
            pltpu.VMEM((tq, h), jnp.float32),        # l      running denom per head
            pltpu.VMEM((tq, D), jnp.float32),        # acc_r  head-merged PV (real)
            pltpu.VMEM((tq, D), jnp.float32),        # acc_p  head-merged PV (phase)
        ],
        compiler_params=pltpu.CompilerParams(
            # batch + q-tile axes are independent -> megacore has work even at B=1;
            # kv axis carries the online-softmax accumulation.
            dimension_semantics=("parallel", "parallel", "arbitrary"),
            # Above the 32 MiB scoped default, below v7x's 64 MiB physical VMEM.
            vmem_limit_bytes=48 * 1024 * 1024),
    )(real, phase, real, phase,
      pp["wq_r"], pp["bq_r"], pp["wq_p"], pp["bq_p"],
      pp["wkv_r"], pp["bkv_r"], pp["wkv_p"], pp["bkv_p"],
      pp["wo_r"], pp["bo_r"], pp["wo_p"], pp["bo_p"])
    return out_r, out_p


# ----------------------------- pure-JAX reference -------------------------- #

def reference(real, phase, params, h):
    B, S, D = real.shape
    d_k = D // h

    def lin(x, w, b):
        return x @ w.T + b

    def split(x):
        return x.reshape(B, S, h, d_k).transpose(0, 2, 1, 3)

    qr = split(lin(real, params["wr"][0], params["br"][0]))
    kr = split(lin(real, params["wr"][1], params["br"][1]))
    vr = split(lin(real, params["wr"][2], params["br"][2]))
    qp = split(lin(phase, params["wp"][0], params["bp"][0]))
    kp = split(lin(phase, params["wp"][1], params["bp"][1]))
    vp = split(lin(phase, params["wp"][2], params["bp"][2]))

    sr = qr @ kr.swapaxes(-2, -1) - qp @ kp.swapaxes(-2, -1)
    sp = qr @ kp.swapaxes(-2, -1) + qp @ kr.swapaxes(-2, -1)
    scores = jnp.sqrt(sr * sr + sp * sp) / math.sqrt(d_k)
    p = jax.nn.softmax(scores, axis=-1)
    xr = p @ vr
    xp = p @ vp

    def merge(x):
        return x.transpose(0, 2, 1, 3).reshape(B, S, D)

    out_real = lin(merge(xr), params["wr"][3], params["br"][3]) + real
    out_phase = lin(merge(xp), params["wp"][3], params["bp"][3]) + phase
    return out_real, out_phase


# ----------------------------------- main ----------------------------------- #

if __name__ == "__main__":
    B, S, d_model, h = 2, 16, 32, 4
    tq = tk = 8   # 2 q-tiles x 2 kv-tiles -> exercises the online-softmax carry

    key = jax.random.PRNGKey(0)
    keys = jax.random.split(key, 18)
    bound = 1.0 / math.sqrt(d_model)   # matches nn.Linear default init range

    def mk_w(k):
        return jax.random.uniform(k, (d_model, d_model), jnp.float32, -bound, bound)

    def mk_b(k):
        return jax.random.uniform(k, (d_model,), jnp.float32, -bound, bound)

    params = {
        "wr": [mk_w(keys[i]) for i in range(0, 4)],
        "br": [mk_b(keys[i]) for i in range(4, 8)],
        "wp": [mk_w(keys[i]) for i in range(8, 12)],
        "bp": [mk_b(keys[i]) for i in range(12, 16)],
    }

    real = jax.random.normal(keys[16], (B, S, d_model), jnp.float32)
    phase = jax.random.normal(keys[17], (B, S, d_model), jnp.float32)

    prepped = prepare_params(params)          # once, outside the jitted call path
    out_r, out_p = multi_headed_attention(real, phase, prepped, h=h, tq=tq, tk=tk)
    jax.block_until_ready((out_r, out_p))

    ref_r, ref_p = reference(real, phase, params, h)
    # bf16 MXU operands + approx reciprocal -> loosened tolerances (per review note).
    assert jnp.allclose(out_r, ref_r, atol=3e-2, rtol=3e-2)
    assert jnp.allclose(out_p, ref_p, atol=3e-2, rtol=3e-2)

    print("KERNEL_OK")
</pallas_src>

<mosaic_0001>
module attributes {stable_mosaic.version = 11 : i64} {
  func.func @_fused_phase_mha_kernel(%arg0: i32, %arg1: i32, %arg2: i32, %arg3: memref<1x8x32xf32, #tpu.memory_space<vmem>>, %arg4: memref<1x8x32xf32, #tpu.memory_space<vmem>>, %arg5: memref<1x8x32xf32, #tpu.memory_space<vmem>>, %arg6: memref<1x8x32xf32, #tpu.memory_space<vmem>>, %arg7: memref<32x32xbf16, #tpu.memory_space<vmem>>, %arg8: memref<1x32xf32, #tpu.memory_space<vmem>>, %arg9: memref<32x32xbf16, #tpu.memory_space<vmem>>, %arg10: memref<1x32xf32, #tpu.memory_space<vmem>>, %arg11: memref<32x64xbf16, #tpu.memory_space<vmem>>, %arg12: memref<1x64xf32, #tpu.memory_space<vmem>>, %arg13: memref<32x64xbf16, #tpu.memory_space<vmem>>, %arg14: memref<1x64xf32, #tpu.memory_space<vmem>>, %arg15: memref<32x32xbf16, #tpu.memory_space<vmem>>, %arg16: memref<1x32xf32, #tpu.memory_space<vmem>>, %arg17: memref<32x32xbf16, #tpu.memory_space<vmem>>, %arg18: memref<1x32xf32, #tpu.memory_space<vmem>>, %arg19: memref<1x8x32xf32, #tpu.memory_space<vmem>>, %arg20: memref<1x8x32xf32, #tpu.memory_space<vmem>>, %arg21: memref<8x64xf32, #tpu.memory_space<vmem>>, %arg22: memref<8x64xbf16, #tpu.memory_space<vmem>>, %arg23: memref<8x64xbf16, #tpu.memory_space<vmem>>, %arg24: memref<8x4xf32, #tpu.memory_space<vmem>>, %arg25: memref<8x4xf32, #tpu.memory_space<vmem>>, %arg26: memref<8x32xf32, #tpu.memory_space<vmem>>, %arg27: memref<8x32xf32, #tpu.memory_space<vmem>>) attributes {dimension_semantics = [#tpu.dimension_semantics<parallel>, #tpu.dimension_semantics<parallel>, #tpu.dimension_semantics<arbitrary>], iteration_bounds = array<i64: 2, 2, 2>, scalar_prefetch = 0 : i64, scratch_operands = 7 : i64, tpu.core_type = #tpu.core_type<tc>, window_params = [{transform_indices = @transform_0, window_bounds = array<i64: 1, 8, 32>}, {transform_indices = @transform_1, window_bounds = array<i64: 1, 8, 32>}, {transform_indices = @transform_2, window_bounds = array<i64: 1, 8, 32>}, {transform_indices = @transform_3, window_bounds = array<i64: 1, 8, 32>}, {pipeline_mode = #tpu.pipeline_mode<synchronous>, transform_indices = @transform_4, window_bounds = array<i64: 32, 32>}, {pipeline_mode = #tpu.pipeline_mode<synchronous>, transform_indices = @transform_5, window_bounds = array<i64: 1, 32>}, {pipeline_mode = #tpu.pipeline_mode<synchronous>, transform_indices = @transform_6, window_bounds = array<i64: 32, 32>}, {pipeline_mode = #tpu.pipeline_mode<synchronous>, transform_indices = @transform_7, window_bounds = array<i64: 1, 32>}, {pipeline_mode = #tpu.pipeline_mode<synchronous>, transform_indices = @transform_8, window_bounds = array<i64: 32, 64>}, {pipeline_mode = #tpu.pipeline_mode<synchronous>, transform_indices = @transform_9, window_bounds = array<i64: 1, 64>}, {pipeline_mode = #tpu.pipeline_mode<synchronous>, transform_indices = @transform_10, window_bounds = array<i64: 32, 64>}, {pipeline_mode = #tpu.pipeline_mode<synchronous>, transform_indices = @transform_11, window_bounds = array<i64: 1, 64>}, {pipeline_mode = #tpu.pipeline_mode<synchronous>, transform_indices = @transform_12, window_bounds = array<i64: 32, 32>}, {pipeline_mode = #tpu.pipeline_mode<synchronous>, transform_indices = @transform_13, window_bounds = array<i64: 1, 32>}, {pipeline_mode = #tpu.pipeline_mode<synchronous>, transform_indices = @transform_14, window_bounds = array<i64: 32, 32>}, {pipeline_mode = #tpu.pipeline_mode<synchronous>, transform_indices = @transform_15, window_bounds = array<i64: 1, 32>}, {transform_indices = @transform_16, window_bounds = array<i64: 1, 8, 32>}, {transform_indices = @transform_17, window_bounds = array<i64: 1, 8, 32>}]} {
    %c0_i32 = arith.constant 0 : i32
    %0 = arith.cmpi eq, %arg2, %c0_i32 : i32
    %1 = arith.extui %0 : i1 to i32
    %c0_i32_0 = arith.constant 0 : i32
    %2 = arith.cmpi ne, %1, %c0_i32_0 : i32
    scf.if %2 {
      %c0_146 = arith.constant 0 : index
      %c0_147 = arith.constant 0 : index
      %c0_148 = arith.constant 0 : index
      %214 = vector.load %arg3[%c0_146, %c0_147, %c0_148] : memref<1x8x32xf32, #tpu.memory_space<vmem>>, vector<1x8x32xf32>
      %215 = vector.shape_cast %214 : vector<1x8x32xf32> to vector<8x32xf32>
      %216 = arith.truncf %215 : vector<8x32xf32> to vector<8x32xbf16>
      %c0_149 = arith.constant 0 : index
      %c0_150 = arith.constant 0 : index
      %c0_151 = arith.constant 0 : index
      %217 = vector.load %arg4[%c0_149, %c0_150, %c0_151] : memref<1x8x32xf32, #tpu.memory_space<vmem>>, vector<1x8x32xf32>
      %218 = vector.shape_cast %217 : vector<1x8x32xf32> to vector<8x32xf32>
      %219 = arith.truncf %218 : vector<8x32xf32> to vector<8x32xbf16>
      %c0_152 = arith.constant 0 : index
      %c0_153 = arith.constant 0 : index
      %220 = vector.load %arg7[%c0_152, %c0_153] : memref<32x32xbf16, #tpu.memory_space<vmem>>, vector<32x32xbf16>
      %cst_154 = arith.constant dense<0.000000e+00> : vector<8x32xf32>
      %221 = tpu.matmul %216, %220, %cst_154 {dimension_numbers = #tpu.dot_dimension_numbers<[1], [0], [0], [1], [0, 0, 1, 1], [], []>} : vector<8x32xbf16>, vector<32x32xbf16>, vector<8x32xf32> -> vector<8x32xf32>
      %c0_155 = arith.constant 0 : index
      %c0_156 = arith.constant 0 : index
      %222 = vector.load %arg8[%c0_155, %c0_156] : memref<1x32xf32, #tpu.memory_space<vmem>>, vector<1x32xf32>
      %223 = vector.broadcast %222 : vector<1x32xf32> to vector<8x32xf32>
      %224 = arith.addf %221, %223 : vector<8x32xf32>
      %c0_157 = arith.constant 0 : index
      %c0_158 = arith.constant 0 : index
      %225 = vector.load %arg9[%c0_157, %c0_158] : memref<32x32xbf16, #tpu.memory_space<vmem>>, vector<32x32xbf16>
      %cst_159 = arith.constant dense<0.000000e+00> : vector<8x32xf32>
      %226 = tpu.matmul %219, %225, %cst_159 {dimension_numbers = #tpu.dot_dimension_numbers<[1], [0], [0], [1], [0, 0, 1, 1], [], []>} : vector<8x32xbf16>, vector<32x32xbf16>, vector<8x32xf32> -> vector<8x32xf32>
      %c0_160 = arith.constant 0 : index
      %c0_161 = arith.constant 0 : index
      %227 = vector.load %arg10[%c0_160, %c0_161] : memref<1x32xf32, #tpu.memory_space<vmem>>, vector<1x32xf32>
      %228 = vector.broadcast %227 : vector<1x32xf32> to vector<8x32xf32>
      %229 = arith.addf %226, %228 : vector<8x32xf32>
      %230 = vector.extract_strided_slice %224 {offsets = [0, 0], sizes = [8, 8], strides = [1, 1]} : vector<8x32xf32> to vector<8x8xf32>
      %c0_162 = arith.constant 0 : index
      %c0_163 = arith.constant 0 : index
      %231 = vector.load %arg21[%c0_162, %c0_163] : memref<8x64xf32, #tpu.memory_space<vmem>>, vector<8x8xf32>
      tpu.vector_store %arg21[%c0_162, %c0_163], %230 {strides = array<i32>} : memref<8x64xf32, #tpu.memory_space<vmem>>, vector<8x8xf32>,
      %232 = vector.extract_strided_slice %229 {offsets = [0, 0], sizes = [8, 8], strides = [1, 1]} : vector<8x32xf32> to vector<8x8xf32>
      %c0_164 = arith.constant 0 : index
      %c8_165 = arith.constant 8 : index
      %233 = vector.load %arg21[%c0_164, %c8_165] : memref<8x64xf32, #tpu.memory_space<vmem>>, vector<8x8xf32>
      tpu.vector_store %arg21[%c0_164, %c8_165], %232 {strides = array<i32>} : memref<8x64xf32, #tpu.memory_space<vmem>>, vector<8x8xf32>,
      %234 = vector.extract_strided_slice %224 {offsets = [0, 8], sizes = [8, 8], strides = [1, 1]} : vector<8x32xf32> to vector<8x8xf32>
      %c0_166 = arith.constant 0 : index
      %c16_167 = arith.constant 16 : index
      %235 = vector.load %arg21[%c0_166, %c16_167] : memref<8x64xf32, #tpu.memory_space<vmem>>, vector<8x8xf32>
      tpu.vector_store %arg21[%c0_166, %c16_167], %234 {strides = array<i32>} : memref<8x64xf32, #tpu.memory_space<vmem>>, vector<8x8xf32>,
      %236 = vector.extract_strided_slice %229 {offsets = [0, 8], sizes = [8, 8], strides = [1, 1]} : vector<8x32xf32> to vector<8x8xf32>
      %c0_168 = arith.constant 0 : index
      %c24_169 = arith.constant 24 : index
      %237 = vector.load %arg21[%c0_168, %c24_169] : memref<8x64xf32, #tpu.memory_space<vmem>>, vector<8x8xf32>
      tpu.vector_store %arg21[%c0_168, %c24_169], %236 {strides = array<i32>} : memref<8x64xf32, #tpu.memory_space<vmem>>, vector<8x8xf32>,
      %238 = vector.extract_strided_slice %224 {offsets = [0, 16], sizes = [8, 8], strides = [1, 1]} : vector<8x32xf32> to vector<8x8xf32>
      %c0_170 = arith.constant 0 : index
      %c32_171 = arith.constant 32 : index
      %239 = vector.load %arg21[%c0_170, %c32_171] : memref<8x64xf32, #tpu.memory_space<vmem>>, vector<8x8xf32>
      tpu.vector_store %arg21[%c0_170, %c32_171], %238 {strides = array<i32>} : memref<8x64xf32, #tpu.memory_space<vmem>>, vector<8x8xf32>,
      %240 = vector.extract_strided_slice %229 {offsets = [0, 16], sizes = [8, 8], strides = [1, 1]} : vector<8x32xf32> to vector<8x8xf32>
      %c0_172 = arith.constant 0 : index
      %c40_173 = arith.constant 40 : index
      %241 = vector.load %arg21[%c0_172, %c40_173] : memref<8x64xf32, #tpu.memory_space<vmem>>, vector<8x8xf32>
      tpu.vector_store %arg21[%c0_172, %c40_173], %240 {strides = array<i32>} : memref<8x64xf32, #tpu.memory_space<vmem>>, vector<8x8xf32>,
      %242 = vector.extract_strided_slice %224 {offsets = [0, 24], sizes = [8, 8], strides = [1, 1]} : vector<8x32xf32> to vector<8x8xf32>
      %c0_174 = arith.constant 0 : index
      %c48_175 = arith.constant 48 : index
      %243 = vector.load %arg21[%c0_174, %c48_175] : memref<8x64xf32, #tpu.memory_space<vmem>>, vector<8x8xf32>
      tpu.vector_store %arg21[%c0_174, %c48_175], %242 {strides = array<i32>} : memref<8x64xf32, #tpu.memory_space<vmem>>, vector<8x8xf32>,
      %244 = vector.extract_strided_slice %229 {offsets = [0, 24], sizes = [8, 8], strides = [1, 1]} : vector<8x32xf32> to vector<8x8xf32>
      %c0_176 = arith.constant 0 : index
      %c56_177 = arith.constant 56 : index
      %245 = vector.load %arg21[%c0_176, %c56_177] : memref<8x64xf32, #tpu.memory_space<vmem>>, vector<8x8xf32>
      tpu.vector_store %arg21[%c0_176, %c56_177], %244 {strides = array<i32>} : memref<8x64xf32, #tpu.memory_space<vmem>>, vector<8x8xf32>,
      %cst_178 = arith.constant 0xFF800000 : f32
      %246 = vector.broadcast %cst_178 : f32 to vector<8x4xf32>
      %c0_179 = arith.constant 0 : index
      %c0_180 = arith.constant 0 : index
      %247 = vector.load %arg24[%c0_179, %c0_180] : memref<8x4xf32, #tpu.memory_space<vmem>>, vector<8x4xf32>
      tpu.vector_store %arg24[%c0_179, %c0_180], %246 {strides = array<i32>} : memref<8x4xf32, #tpu.memory_space<vmem>>, vector<8x4xf32>,
      %cst_181 = arith.constant 0.000000e+00 : f32
      %248 = vector.broadcast %cst_181 : f32 to vector<8x4xf32>
      %c0_182 = arith.constant 0 : index
      %c0_183 = arith.constant 0 : index
      %249 = vector.load %arg25[%c0_182, %c0_183] : memref<8x4xf32, #tpu.memory_space<vmem>>, vector<8x4xf32>
      tpu.vector_store %arg25[%c0_182, %c0_183], %248 {strides = array<i32>} : memref<8x4xf32, #tpu.memory_space<vmem>>, vector<8x4xf32>,
      %cst_184 = arith.constant 0.000000e+00 : f32
      %250 = vector.broadcast %cst_184 : f32 to vector<8x32xf32>
      %c0_185 = arith.constant 0 : index
      %c0_186 = arith.constant 0 : index
      %251 = vector.load %arg26[%c0_185, %c0_186] : memref<8x32xf32, #tpu.memory_space<vmem>>, vector<8x32xf32>
      tpu.vector_store %arg26[%c0_185, %c0_186], %250 {strides = array<i32>} : memref<8x32xf32, #tpu.memory_space<vmem>>, vector<8x32xf32>,
      %cst_187 = arith.constant 0.000000e+00 : f32
      %252 = vector.broadcast %cst_187 : f32 to vector<8x32xf32>
      %c0_188 = arith.constant 0 : index
      %c0_189 = arith.constant 0 : index
      %253 = vector.load %arg27[%c0_188, %c0_189] : memref<8x32xf32, #tpu.memory_space<vmem>>, vector<8x32xf32>
      tpu.vector_store %arg27[%c0_188, %c0_189], %252 {strides = array<i32>} : memref<8x32xf32, #tpu.memory_space<vmem>>, vector<8x32xf32>,
    } else {
    }
    %c0 = arith.constant 0 : index
    %c0_1 = arith.constant 0 : index
    %c0_2 = arith.constant 0 : index
    %3 = vector.load %arg5[%c0, %c0_1, %c0_2] : memref<1x8x32xf32, #tpu.memory_space<vmem>>, vector<1x8x32xf32>
    %4 = vector.shape_cast %3 : vector<1x8x32xf32> to vector<8x32xf32>
    %5 = arith.truncf %4 : vector<8x32xf32> to vector<8x32xbf16>
    %c0_3 = arith.constant 0 : index
    %c0_4 = arith.constant 0 : index
    %c0_5 = arith.constant 0 : index
    %6 = vector.load %arg6[%c0_3, %c0_4, %c0_5] : memref<1x8x32xf32, #tpu.memory_space<vmem>>, vector<1x8x32xf32>
    %7 = vector.shape_cast %6 : vector<1x8x32xf32> to vector<8x32xf32>
    %8 = arith.truncf %7 : vector<8x32xf32> to vector<8x32xbf16>
    %c0_6 = arith.constant 0 : index
    %c0_7 = arith.constant 0 : index
    %9 = vector.load %arg11[%c0_6, %c0_7] : memref<32x64xbf16, #tpu.memory_space<vmem>>, vector<32x64xbf16>
    %cst = arith.constant dense<0.000000e+00> : vector<8x64xf32>
    %10 = tpu.matmul %5, %9, %cst {dimension_numbers = #tpu.dot_dimension_numbers<[1], [0], [0], [1], [0, 0, 1, 1], [], []>} : vector<8x32xbf16>, vector<32x64xbf16>, vector<8x64xf32> -> vector<8x64xf32>
    %c0_8 = arith.constant 0 : index
    %c0_9 = arith.constant 0 : index
    %11 = vector.load %arg12[%c0_8, %c0_9] : memref<1x64xf32, #tpu.memory_space<vmem>>, vector<1x64xf32>
    %12 = vector.broadcast %11 : vector<1x64xf32> to vector<8x64xf32>
    %13 = arith.addf %10, %12 : vector<8x64xf32>
    %14 = arith.truncf %13 : vector<8x64xf32> to vector<8x64xbf16>
    %c0_10 = arith.constant 0 : index
    %c0_11 = arith.constant 0 : index
    %15 = vector.load %arg22[%c0_10, %c0_11] : memref<8x64xbf16, #tpu.memory_space<vmem>>, vector<8x64xbf16>
    tpu.vector_store %arg22[%c0_10, %c0_11], %14 {strides = array<i32>} : memref<8x64xbf16, #tpu.memory_space<vmem>>, vector<8x64xbf16>,
    %c0_12 = arith.constant 0 : index
    %c0_13 = arith.constant 0 : index
    %16 = vector.load %arg13[%c0_12, %c0_13] : memref<32x64xbf16, #tpu.memory_space<vmem>>, vector<32x64xbf16>
    %cst_14 = arith.constant dense<0.000000e+00> : vector<8x64xf32>
    %17 = tpu.matmul %8, %16, %cst_14 {dimension_numbers = #tpu.dot_dimension_numbers<[1], [0], [0], [1], [0, 0, 1, 1], [], []>} : vector<8x32xbf16>, vector<32x64xbf16>, vector<8x64xf32> -> vector<8x64xf32>
    %c0_15 = arith.constant 0 : index
    %c0_16 = arith.constant 0 : index
    %18 = vector.load %arg14[%c0_15, %c0_16] : memref<1x64xf32, #tpu.memory_space<vmem>>, vector<1x64xf32>
    %19 = vector.broadcast %18 : vector<1x64xf32> to vector<8x64xf32>
    %20 = arith.addf %17, %19 : vector<8x64xf32>
    %21 = arith.truncf %20 : vector<8x64xf32> to vector<8x64xbf16>
    %c0_17 = arith.constant 0 : index
    %c0_18 = arith.constant 0 : index
    %22 = vector.load %arg23[%c0_17, %c0_18] : memref<8x64xbf16, #tpu.memory_space<vmem>>, vector<8x64xbf16>
    tpu.vector_store %arg23[%c0_17, %c0_18], %21 {strides = array<i32>} : memref<8x64xbf16, #tpu.memory_space<vmem>>, vector<8x64xbf16>,
    %c0_19 = arith.constant 0 : index
    %c0_20 = arith.constant 0 : index
    %23 = vector.load %arg21[%c0_19, %c0_20] : memref<8x64xf32, #tpu.memory_space<vmem>>, vector<8x16xf32>
    %24 = arith.truncf %23 : vector<8x16xf32> to vector<8x16xbf16>
    %c0_21 = arith.constant 0 : index
    %c0_22 = arith.constant 0 : index
    %25 = vector.load %arg22[%c0_21, %c0_22] : memref<8x64xbf16, #tpu.memory_space<vmem>>, vector<8x8xbf16>
    %c0_23 = arith.constant 0 : index
    %c0_24 = arith.constant 0 : index
    %26 = vector.load %arg23[%c0_23, %c0_24] : memref<8x64xbf16, #tpu.memory_space<vmem>>, vector<8x8xbf16>
    %c0_25 = arith.constant 0 : index
    %c32 = arith.constant 32 : index
    %27 = vector.load %arg22[%c0_25, %c32] : memref<8x64xbf16, #tpu.memory_space<vmem>>, vector<8x8xbf16>
    %c0_26 = arith.constant 0 : index
    %c32_27 = arith.constant 32 : index
    %28 = vector.load %arg23[%c0_26, %c32_27] : memref<8x64xbf16, #tpu.memory_space<vmem>>, vector<8x8xbf16>
    %cst_28 = arith.constant 0.000000e+00 : bf16
    %29 = vector.broadcast %cst_28 : bf16 to vector<8x8xbf16>
    %30 = arith.subf %29, %26 : vector<8x8xbf16>
    %31 = tpu.concatenate %25, %30 in 1 : vector<8x8xbf16>, vector<8x8xbf16> -> vector<8x16xbf16>
    %cst_29 = arith.constant dense<0.000000e+00> : vector<8x8xf32>
    %32 = tpu.matmul %24, %31, %cst_29 {dimension_numbers = #tpu.dot_dimension_numbers<[1], [1], [0], [0], [0, 0, 1, 0], [], []>} : vector<8x16xbf16>, vector<8x16xbf16>, vector<8x8xf32> -> vector<8x8xf32>
    %33 = tpu.concatenate %26, %25 in 1 : vector<8x8xbf16>, vector<8x8xbf16> -> vector<8x16xbf16>
    %cst_30 = arith.constant dense<0.000000e+00> : vector<8x8xf32>
    %34 = tpu.matmul %24, %33, %cst_30 {dimension_numbers = #tpu.dot_dimension_numbers<[1], [1], [0], [0], [0, 0, 1, 0], [], []>} : vector<8x16xbf16>, vector<8x16xbf16>, vector<8x8xf32> -> vector<8x8xf32>
    %35 = arith.mulf %32, %32 : vector<8x8xf32>
    %36 = arith.mulf %34, %34 : vector<8x8xf32>
    %37 = arith.addf %35, %36 : vector<8x8xf32>
    %38 = math.sqrt %37 : vector<8x8xf32>
    %cst_31 = arith.constant 0.353553385 : f32
    %39 = vector.broadcast %cst_31 : f32 to vector<8x8xf32>
    %40 = arith.mulf %38, %39 : vector<8x8xf32>
    %c0_32 = arith.constant 0 : index
    %c0_33 = arith.constant 0 : index
    %41 = vector.load %arg24[%c0_32, %c0_33] : memref<8x4xf32, #tpu.memory_space<vmem>>, vector<8x1xf32>
    %cst_34 = arith.constant dense<0xFF800000> : vector<8xf32>
    %42 = vector.multi_reduction <maximumf>, %40, %cst_34 [1] : vector<8x8xf32> to vector<8xf32>
    %43 = vector.shape_cast %42 : vector<8xf32> to vector<8x1xf32>
    %44 = arith.maximumf %41, %43 : vector<8x1xf32>
    %45 = arith.subf %41, %44 : vector<8x1xf32>
    %46 = math.exp %45 : vector<8x1xf32>
    %47 = vector.broadcast %44 : vector<8x1xf32> to vector<8x8xf32>
    %48 = arith.subf %40, %47 : vector<8x8xf32>
    %49 = math.exp %48 : vector<8x8xf32>
    %c0_35 = arith.constant 0 : index
    %c0_36 = arith.constant 0 : index
    %50 = vector.load %arg25[%c0_35, %c0_36] : memref<8x4xf32, #tpu.memory_space<vmem>>, vector<8x1xf32>
    %51 = arith.mulf %46, %50 : vector<8x1xf32>
    %cst_37 = arith.constant dense<0.000000e+00> : vector<8xf32>
    %52 = vector.multi_reduction <add>, %49, %cst_37 [1] : vector<8x8xf32> to vector<8xf32>
    %53 = vector.shape_cast %52 : vector<8xf32> to vector<8x1xf32>
    %54 = arith.addf %51, %53 : vector<8x1xf32>
    %c0_38 = arith.constant 0 : index
    %c0_39 = arith.constant 0 : index
    %55 = vector.load %arg25[%c0_38, %c0_39] : memref<8x4xf32, #tpu.memory_space<vmem>>, vector<8x1xf32>
    tpu.vector_store %arg25[%c0_38, %c0_39], %54 {strides = array<i32>} : memref<8x4xf32, #tpu.memory_space<vmem>>, vector<8x1xf32>,
    %c0_40 = arith.constant 0 : index
    %c0_41 = arith.constant 0 : index
    %56 = vector.load %arg24[%c0_40, %c0_41] : memref<8x4xf32, #tpu.memory_space<vmem>>, vector<8x1xf32>
    tpu.vector_store %arg24[%c0_40, %c0_41], %44 {strides = array<i32>} : memref<8x4xf32, #tpu.memory_space<vmem>>, vector<8x1xf32>,
    %57 = arith.truncf %49 : vector<8x8xf32> to vector<8x8xbf16>
    %c0_42 = arith.constant 0 : index
    %c0_43 = arith.constant 0 : index
    %58 = vector.load %arg26[%c0_42, %c0_43] : memref<8x32xf32, #tpu.memory_space<vmem>>, vector<8x8xf32>
    %59 = vector.broadcast %46 : vector<8x1xf32> to vector<8x8xf32>
    %60 = arith.mulf %59, %58 : vector<8x8xf32>
    %cst_44 = arith.constant dense<0.000000e+00> : vector<8x8xf32>
    %61 = tpu.matmul %57, %27, %cst_44 {dimension_numbers = #tpu.dot_dimension_numbers<[1], [0], [0], [1], [0, 0, 1, 1], [], []>} : vector<8x8xbf16>, vector<8x8xbf16>, vector<8x8xf32> -> vector<8x8xf32>
    %62 = arith.addf %60, %61 : vector<8x8xf32>
    %c0_45 = arith.constant 0 : index
    %c0_46 = arith.constant 0 : index
    %63 = vector.load %arg26[%c0_45, %c0_46] : memref<8x32xf32, #tpu.memory_space<vmem>>, vector<8x8xf32>
    tpu.vector_store %arg26[%c0_45, %c0_46], %62 {strides = array<i32>} : memref<8x32xf32, #tpu.memory_space<vmem>>, vector<8x8xf32>,
    %c0_47 = arith.constant 0 : index
    %c0_48 = arith.constant 0 : index
    %64 = vector.load %arg27[%c0_47, %c0_48] : memref<8x32xf32, #tpu.memory_space<vmem>>, vector<8x8xf32>
    %65 = vector.broadcast %46 : vector<8x1xf32> to vector<8x8xf32>
    %66 = arith.mulf %65, %64 : vector<8x8xf32>
    %cst_49 = arith.constant dense<0.000000e+00> : vector<8x8xf32>
    %67 = tpu.matmul %57, %28, %cst_49 {dimension_numbers = #tpu.dot_dimension_numbers<[1], [0], [0], [1], [0, 0, 1, 1], [], []>} : vector<8x8xbf16>, vector<8x8xbf16>, vector<8x8xf32> -> vector<8x8xf32>
    %68 = arith.addf %66, %67 : vector<8x8xf32>
    %c0_50 = arith.constant 0 : index
    %c0_51 = arith.constant 0 : index
    %69 = vector.load %arg27[%c0_50, %c0_51] : memref<8x32xf32, #tpu.memory_space<vmem>>, vector<8x8xf32>
    tpu.vector_store %arg27[%c0_50, %c0_51], %68 {strides = array<i32>} : memref<8x32xf32, #tpu.memory_space<vmem>>, vector<8x8xf32>,
    %c0_52 = arith.constant 0 : index
    %c16 = arith.constant 16 : index
    %70 = vector.load %arg21[%c0_52, %c16] : memref<8x64xf32, #tpu.memory_space<vmem>>, vector<8x16xf32>
    %71 = arith.truncf %70 : vector<8x16xf32> to vector<8x16xbf16>
    %c0_53 = arith.constant 0 : index
    %c8 = arith.constant 8 : index
    %72 = vector.load %arg22[%c0_53, %c8] : memref<8x64xbf16, #tpu.memory_space<vmem>>, vector<8x8xbf16>
    %c0_54 = arith.constant 0 : index
    %c8_55 = arith.constant 8 : index
    %73 = vector.load %arg23[%c0_54, %c8_55] : memref<8x64xbf16, #tpu.memory_space<vmem>>, vector<8x8xbf16>
    %c0_56 = arith.constant 0 : index
    %c40 = arith.constant 40 : index
    %74 = vector.load %arg22[%c0_56, %c40] : memref<8x64xbf16, #tpu.memory_space<vmem>>, vector<8x8xbf16>
    %c0_57 = arith.constant 0 : index
    %c40_58 = arith.constant 40 : index
    %75 = vector.load %arg23[%c0_57, %c40_58] : memref<8x64xbf16, #tpu.memory_space<vmem>>, vector<8x8xbf16>
    %cst_59 = arith.constant 0.000000e+00 : bf16
    %76 = vector.broadcast %cst_59 : bf16 to vector<8x8xbf16>
    %77 = arith.subf %76, %73 : vector<8x8xbf16>
    %78 = tpu.concatenate %72, %77 in 1 : vector<8x8xbf16>, vector<8x8xbf16> -> vector<8x16xbf16>
    %cst_60 = arith.constant dense<0.000000e+00> : vector<8x8xf32>
    %79 = tpu.matmul %71, %78, %cst_60 {dimension_numbers = #tpu.dot_dimension_numbers<[1], [1], [0], [0], [0, 0, 1, 0], [], []>} : vector<8x16xbf16>, vector<8x16xbf16>, vector<8x8xf32> -> vector<8x8xf32>
    %80 = tpu.concatenate %73, %72 in 1 : vector<8x8xbf16>, vector<8x8xbf16> -> vector<8x16xbf16>
    %cst_61 = arith.constant dense<0.000000e+00> : vector<8x8xf32>
    %81 = tpu.matmul %71, %80, %cst_61 {dimension_numbers = #tpu.dot_dimension_numbers<[1], [1], [0], [0], [0, 0, 1, 0], [], []>} : vector<8x16xbf16>, vector<8x16xbf16>, vector<8x8xf32> -> vector<8x8xf32>
    %82 = arith.mulf %79, %79 : vector<8x8xf32>
    %83 = arith.mulf %81, %81 : vector<8x8xf32>
    %84 = arith.addf %82, %83 : vector<8x8xf32>
    %85 = math.sqrt %84 : vector<8x8xf32>
    %cst_62 = arith.constant 0.353553385 : f32
    %86 = vector.broadcast %cst_62 : f32 to vector<8x8xf32>
    %87 = arith.mulf %85, %86 : vector<8x8xf32>
    %c0_63 = arith.constant 0 : index
    %c1 = arith.constant 1 : index
    %88 = vector.load %arg24[%c0_63, %c1] : memref<8x4xf32, #tpu.memory_space<vmem>>, vector<8x1xf32>
    %cst_64 = arith.constant dense<0xFF800000> : vector<8xf32>
    %89 = vector.multi_reduction <maximumf>, %87, %cst_64 [1] : vector<8x8xf32> to vector<8xf32>
    %90 = vector.shape_cast %89 : vector<8xf32> to vector<8x1xf32>
    %91 = arith.maximumf %88, %90 : vector<8x1xf32>
    %92 = arith.subf %88, %91 : vector<8x1xf32>
    %93 = math.exp %92 : vector<8x1xf32>
    %94 = vector.broadcast %91 : vector<8x1xf32> to vector<8x8xf32>
    %95 = arith.subf %87, %94 : vector<8x8xf32>
    %96 = math.exp %95 : vector<8x8xf32>
    %c0_65 = arith.constant 0 : index
    %c1_66 = arith.constant 1 : index
    %97 = vector.load %arg25[%c0_65, %c1_66] : memref<8x4xf32, #tpu.memory_space<vmem>>, vector<8x1xf32>
    %98 = arith.mulf %93, %97 : vector<8x1xf32>
    %cst_67 = arith.constant dense<0.000000e+00> : vector<8xf32>
    %99 = vector.multi_reduction <add>, %96, %cst_67 [1] : vector<8x8xf32> to vector<8xf32>
    %100 = vector.shape_cast %99 : vector<8xf32> to vector<8x1xf32>
    %101 = arith.addf %98, %100 : vector<8x1xf32>
    %c0_68 = arith.constant 0 : index
    %c1_69 = arith.constant 1 : index
    %102 = vector.load %arg25[%c0_68, %c1_69] : memref<8x4xf32, #tpu.memory_space<vmem>>, vector<8x1xf32>
    tpu.vector_store %arg25[%c0_68, %c1_69], %101 {strides = array<i32>} : memref<8x4xf32, #tpu.memory_space<vmem>>, vector<8x1xf32>,
    %c0_70 = arith.constant 0 : index
    %c1_71 = arith.constant 1 : index
    %103 = vector.load %arg24[%c0_70, %c1_71] : memref<8x4xf32, #tpu.memory_space<vmem>>, vector<8x1xf32>
    tpu.vector_store %arg24[%c0_70, %c1_71], %91 {strides = array<i32>} : memref<8x4xf32, #tpu.memory_space<vmem>>, vector<8x1xf32>,
    %104 = arith.truncf %96 : vector<8x8xf32> to vector<8x8xbf16>
    %c0_72 = arith.constant 0 : index
    %c8_73 = arith.constant 8 : index
    %105 = vector.load %arg26[%c0_72, %c8_73] : memref<8x32xf32, #tpu.memory_space<vmem>>, vector<8x8xf32>
    %106 = vector.broadcast %93 : vector<8x1xf32> to vector<8x8xf32>
    %107 = arith.mulf %106, %105 : vector<8x8xf32>
    %cst_74 = arith.constant dense<0.000000e+00> : vector<8x8xf32>
    %108 = tpu.matmul %104, %74, %cst_74 {dimension_numbers = #tpu.dot_dimension_numbers<[1], [0], [0], [1], [0, 0, 1, 1], [], []>} : vector<8x8xbf16>, vector<8x8xbf16>, vector<8x8xf32> -> vector<8x8xf32>
    %109 = arith.addf %107, %108 : vector<8x8xf32>
    %c0_75 = arith.constant 0 : index
    %c8_76 = arith.constant 8 : index
    %110 = vector.load %arg26[%c0_75, %c8_76] : memref<8x32xf32, #tpu.memory_space<vmem>>, vector<8x8xf32>
    tpu.vector_store %arg26[%c0_75, %c8_76], %109 {strides = array<i32>} : memref<8x32xf32, #tpu.memory_space<vmem>>, vector<8x8xf32>,
    %c0_77 = arith.constant 0 : index
    %c8_78 = arith.constant 8 : index
    %111 = vector.load %arg27[%c0_77, %c8_78] : memref<8x32xf32, #tpu.memory_space<vmem>>, vector<8x8xf32>
    %112 = vector.broadcast %93 : vector<8x1xf32> to vector<8x8xf32>
    %113 = arith.mulf %112, %111 : vector<8x8xf32>
    %cst_79 = arith.constant dense<0.000000e+00> : vector<8x8xf32>
    %114 = tpu.matmul %104, %75, %cst_79 {dimension_numbers = #tpu.dot_dimension_numbers<[1], [0], [0], [1], [0, 0, 1, 1], [], []>} : vector<8x8xbf16>, vector<8x8xbf16>, vector<8x8xf32> -> vector<8x8xf32>
    %115 = arith.addf %113, %114 : vector<8x8xf32>
    %c0_80 = arith.constant 0 : index
    %c8_81 = arith.constant 8 : index
    %116 = vector.load %arg27[%c0_80, %c8_81] : memref<8x32xf32, #tpu.memory_space<vmem>>, vector<8x8xf32>
    tpu.vector_store %arg27[%c0_80, %c8_81], %115 {strides = array<i32>} : memref<8x32xf32, #tpu.memory_space<vmem>>, vector<8x8xf32>,
    %c0_82 = arith.constant 0 : index
    %c32_83 = arith.constant 32 : index
    %117 = vector.load %arg21[%c0_82, %c32_83] : memref<8x64xf32, #tpu.memory_space<vmem>>, vector<8x16xf32>
    %118 = arith.truncf %117 : vector<8x16xf32> to vector<8x16xbf16>
    %c0_84 = arith.constant 0 : index
    %c16_85 = arith.constant 16 : index
    %119 = vector.load %arg22[%c0_84, %c16_85] : memref<8x64xbf16, #tpu.memory_space<vmem>>, vector<8x8xbf16>
    %c0_86 = arith.constant 0 : index
    %c16_87 = arith.constant 16 : index
    %120 = vector.load %arg23[%c0_86, %c16_87] : memref<8x64xbf16, #tpu.memory_space<vmem>>, vector<8x8xbf16>
    %c0_88 = arith.constant 0 : index
    %c48 = arith.constant 48 : index
    %121 = vector.load %arg22[%c0_88, %c48] : memref<8x64xbf16, #tpu.memory_space<vmem>>, vector<8x8xbf16>
    %c0_89 = arith.constant 0 : index
    %c48_90 = arith.constant 48 : index
    %122 = vector.load %arg23[%c0_89, %c48_90] : memref<8x64xbf16, #tpu.memory_space<vmem>>, vector<8x8xbf16>
    %cst_91 = arith.constant 0.000000e+00 : bf16
    %123 = vector.broadcast %cst_91 : bf16 to vector<8x8xbf16>
    %124 = arith.subf %123, %120 : vector<8x8xbf16>
    %125 = tpu.concatenate %119, %124 in 1 : vector<8x8xbf16>, vector<8x8xbf16> -> vector<8x16xbf16>
    %cst_92 = arith.constant dense<0.000000e+00> : vector<8x8xf32>
    %126 = tpu.matmul %118, %125, %cst_92 {dimension_numbers = #tpu.dot_dimension_numbers<[1], [1], [0], [0], [0, 0, 1, 0], [], []>} : vector<8x16xbf16>, vector<8x16xbf16>, vector<8x8xf32> -> vector<8x8xf32>
    %127 = tpu.concatenate %120, %119 in 1 : vector<8x8xbf16>, vector<8x8xbf16> -> vector<8x16xbf16>
    %cst_93 = arith.constant dense<0.000000e+00> : vector<8x8xf32>
    %128 = tpu.matmul %118, %127, %cst_93 {dimension_numbers = #tpu.dot_dimension_numbers<[1], [1], [0], [0], [0, 0, 1, 0], [], []>} : vector<8x16xbf16>, vector<8x16xbf16>, vector<8x8xf32> -> vector<8x8xf32>
    %129 = arith.mulf %126, %126 : vector<8x8xf32>
    %130 = arith.mulf %128, %128 : vector<8x8xf32>
    %131 = arith.addf %129, %130 : vector<8x8xf32>
    %132 = math.sqrt %131 : vector<8x8xf32>
    %cst_94 = arith.constant 0.353553385 : f32
    %133 = vector.broadcast %cst_94 : f32 to vector<8x8xf32>
    %134 = arith.mulf %132, %133 : vector<8x8xf32>
    %c0_95 = arith.constant 0 : index
    %c2 = arith.constant 2 : index
    %135 = vector.load %arg24[%c0_95, %c2] : memref<8x4xf32, #tpu.memory_space<vmem>>, vector<8x1xf32>
    %cst_96 = arith.constant dense<0xFF800000> : vector<8xf32>
    %136 = vector.multi_reduction <maximumf>, %134, %cst_96 [1] : vector<8x8xf32> to vector<8xf32>
    %137 = vector.shape_cast %136 : vector<8xf32> to vector<8x1xf32>
    %138 = arith.maximumf %135, %137 : vector<8x1xf32>
    %139 = arith.subf %135, %138 : vector<8x1xf32>
    %140 = math.exp %139 : vector<8x1xf32>
    %141 = vector.broadcast %138 : vector<8x1xf32> to vector<8x8xf32>
    %142 = arith.subf %134, %141 : vector<8x8xf32>
    %143 = math.exp %142 : vector<8x8xf32>
    %c0_97 = arith.constant 0 : index
    %c2_98 = arith.constant 2 : index
    %144 = vector.load %arg25[%c0_97, %c2_98] : memref<8x4xf32, #tpu.memory_space<vmem>>, vector<8x1xf32>
    %145 = arith.mulf %140, %144 : vector<8x1xf32>
    %cst_99 = arith.constant dense<0.000000e+00> : vector<8xf32>
    %146 = vector.multi_reduction <add>, %143, %cst_99 [1] : vector<8x8xf32> to vector<8xf32>
    %147 = vector.shape_cast %146 : vector<8xf32> to vector<8x1xf32>
    %148 = arith.addf %145, %147 : vector<8x1xf32>
    %c0_100 = arith.constant 0 : index
    %c2_101 = arith.constant 2 : index
    %149 = vector.load %arg25[%c0_100, %c2_101] : memref<8x4xf32, #tpu.memory_space<vmem>>, vector<8x1xf32>
    tpu.vector_store %arg25[%c0_100, %c2_101], %148 {strides = array<i32>} : memref<8x4xf32, #tpu.memory_space<vmem>>, vector<8x1xf32>,
    %c0_102 = arith.constant 0 : index
    %c2_103 = arith.constant 2 : index
    %150 = vector.load %arg24[%c0_102, %c2_103] : memref<8x4xf32, #tpu.memory_space<vmem>>, vector<8x1xf32>
    tpu.vector_store %arg24[%c0_102, %c2_103], %138 {strides = array<i32>} : memref<8x4xf32, #tpu.memory_space<vmem>>, vector<8x1xf32>,
    %151 = arith.truncf %143 : vector<8x8xf32> to vector<8x8xbf16>
    %c0_104 = arith.constant 0 : index
    %c16_105 = arith.constant 16 : index
    %152 = vector.load %arg26[%c0_104, %c16_105] : memref<8x32xf32, #tpu.memory_space<vmem>>, vector<8x8xf32>
    %153 = vector.broadcast %140 : vector<8x1xf32> to vector<8x8xf32>
    %154 = arith.mulf %153, %152 : vector<8x8xf32>
    %cst_106 = arith.constant dense<0.000000e+00> : vector<8x8xf32>
    %155 = tpu.matmul %151, %121, %cst_106 {dimension_numbers = #tpu.dot_dimension_numbers<[1], [0], [0], [1], [0, 0, 1, 1], [], []>} : vector<8x8xbf16>, vector<8x8xbf16>, vector<8x8xf32> -> vector<8x8xf32>
    %156 = arith.addf %154, %155 : vector<8x8xf32>
    %c0_107 = arith.constant 0 : index
    %c16_108 = arith.constant 16 : index
    %157 = vector.load %arg26[%c0_107, %c16_108] : memref<8x32xf32, #tpu.memory_space<vmem>>, vector<8x8xf32>
    tpu.vector_store %arg26[%c0_107, %c16_108], %156 {strides = array<i32>} : memref<8x32xf32, #tpu.memory_space<vmem>>, vector<8x8xf32>,
    %c0_109 = arith.constant 0 : index
    %c16_110 = arith.constant 16 : index
    %158 = vector.load %arg27[%c0_109, %c16_110] : memref<8x32xf32, #tpu.memory_space<vmem>>, vector<8x8xf32>
    %159 = vector.broadcast %140 : vector<8x1xf32> to vector<8x8xf32>
    %160 = arith.mulf %159, %158 : vector<8x8xf32>
    %cst_111 = arith.constant dense<0.000000e+00> : vector<8x8xf32>
    %161 = tpu.matmul %151, %122, %cst_111 {dimension_numbers = #tpu.dot_dimension_numbers<[1], [0], [0], [1], [0, 0, 1, 1], [], []>} : vector<8x8xbf16>, vector<8x8xbf16>, vector<8x8xf32> -> vector<8x8xf32>
    %162 = arith.addf %160, %161 : vector<8x8xf32>
    %c0_112 = arith.constant 0 : index
    %c16_113 = arith.constant 16 : index
    %163 = vector.load %arg27[%c0_112, %c16_113] : memref<8x32xf32, #tpu.memory_space<vmem>>, vector<8x8xf32>
    tpu.vector_store %arg27[%c0_112, %c16_113], %162 {strides = array<i32>} : memref<8x32xf32, #tpu.memory_space<vmem>>, vector<8x8xf32>,
    %c0_114 = arith.constant 0 : index
    %c48_115 = arith.constant 48 : index
    %164 = vector.load %arg21[%c0_114, %c48_115] : memref<8x64xf32, #tpu.memory_space<vmem>>, vector<8x16xf32>
    %165 = arith.truncf %164 : vector<8x16xf32> to vector<8x16xbf16>
    %c0_116 = arith.constant 0 : index
    %c24 = arith.constant 24 : index
    %166 = vector.load %arg22[%c0_116, %c24] : memref<8x64xbf16, #tpu.memory_space<vmem>>, vector<8x8xbf16>
    %c0_117 = arith.constant 0 : index
    %c24_118 = arith.constant 24 : index
    %167 = vector.load %arg23[%c0_117, %c24_118] : memref<8x64xbf16, #tpu.memory_space<vmem>>, vector<8x8xbf16>
    %c0_119 = arith.constant 0 : index
    %c56 = arith.constant 56 : index
    %168 = vector.load %arg22[%c0_119, %c56] : memref<8x64xbf16, #tpu.memory_space<vmem>>, vector<8x8xbf16>
    %c0_120 = arith.constant 0 : index
    %c56_121 = arith.constant 56 : index
    %169 = vector.load %arg23[%c0_120, %c56_121] : memref<8x64xbf16, #tpu.memory_space<vmem>>, vector<8x8xbf16>
    %cst_122 = arith.constant 0.000000e+00 : bf16
    %170 = vector.broadcast %cst_122 : bf16 to vector<8x8xbf16>
    %171 = arith.subf %170, %167 : vector<8x8xbf16>
    %172 = tpu.concatenate %166, %171 in 1 : vector<8x8xbf16>, vector<8x8xbf16> -> vector<8x16xbf16>
    %cst_123 = arith.constant dense<0.000000e+00> : vector<8x8xf32>
    %173 = tpu.matmul %165, %172, %cst_123 {dimension_numbers = #tpu.dot_dimension_numbers<[1], [1], [0], [0], [0, 0, 1, 0], [], []>} : vector<8x16xbf16>, vector<8x16xbf16>, vector<8x8xf32> -> vector<8x8xf32>
    %174 = tpu.concatenate %167, %166 in 1 : vector<8x8xbf16>, vector<8x8xbf16> -> vector<8x16xbf16>
    %cst_124 = arith.constant dense<0.000000e+00> : vector<8x8xf32>
    %175 = tpu.matmul %165, %174, %cst_124 {dimension_numbers = #tpu.dot_dimension_numbers<[1], [1], [0], [0], [0, 0, 1, 0], [], []>} : vector<8x16xbf16>, vector<8x16xbf16>, vector<8x8xf32> -> vector<8x8xf32>
    %176 = arith.mulf %173, %173 : vector<8x8xf32>
    %177 = arith.mulf %175, %175 : vector<8x8xf32>
    %178 = arith.addf %176, %177 : vector<8x8xf32>
    %179 = math.sqrt %178 : vector<8x8xf32>
    %cst_125 = arith.constant 0.353553385 : f32
    %180 = vector.broadcast %cst_125 : f32 to vector<8x8xf32>
    %181 = arith.mulf %179, %180 : vector<8x8xf32>
    %c0_126 = arith.constant 0 : index
    %c3 = arith.constant 3 : index
    %182 = vector.load %arg24[%c0_126, %c3] : memref<8x4xf32, #tpu.memory_space<vmem>>, vector<8x1xf32>
    %cst_127 = arith.constant dense<0xFF800000> : vector<8xf32>
    %183 = vector.multi_reduction <maximumf>, %181, %cst_127 [1] : vector<8x8xf32> to vector<8xf32>
    %184 = vector.shape_cast %183 : vector<8xf32> to vector<8x1xf32>
    %185 = arith.maximumf %182, %184 : vector<8x1xf32>
    %186 = arith.subf %182, %185 : vector<8x1xf32>
    %187 = math.exp %186 : vector<8x1xf32>
    %188 = vector.broadcast %185 : vector<8x1xf32> to vector<8x8xf32>
    %189 = arith.subf %181, %188 : vector<8x8xf32>
    %190 = math.exp %189 : vector<8x8xf32>
    %c0_128 = arith.constant 0 : index
    %c3_129 = arith.constant 3 : index
    %191 = vector.load %arg25[%c0_128, %c3_129] : memref<8x4xf32, #tpu.memory_space<vmem>>, vector<8x1xf32>
    %192 = arith.mulf %187, %191 : vector<8x1xf32>
    %cst_130 = arith.constant dense<0.000000e+00> : vector<8xf32>
    %193 = vector.multi_reduction <add>, %190, %cst_130 [1] : vector<8x8xf32> to vector<8xf32>
    %194 = vector.shape_cast %193 : vector<8xf32> to vector<8x1xf32>
    %195 = arith.addf %192, %194 : vector<8x1xf32>
    %c0_131 = arith.constant 0 : index
    %c3_132 = arith.constant 3 : index
    %196 = vector.load %arg25[%c0_131, %c3_132] : memref<8x4xf32, #tpu.memory_space<vmem>>, vector<8x1xf32>
    tpu.vector_store %arg25[%c0_131, %c3_132], %195 {strides = array<i32>} : memref<8x4xf32, #tpu.memory_space<vmem>>, vector<8x1xf32>,
    %c0_133 = arith.constant 0 : index
    %c3_134 = arith.constant 3 : index
    %197 = vector.load %arg24[%c0_133, %c3_134] : memref<8x4xf32, #tpu.memory_space<vmem>>, vector<8x1xf32>
    tpu.vector_store %arg24[%c0_133, %c3_134], %185 {strides = array<i32>} : memref<8x4xf32, #tpu.memory_space<vmem>>, vector<8x1xf32>,
    %198 = arith.truncf %190 : vector<8x8xf32> to vector<8x8xbf16>
    %c0_135 = arith.constant 0 : index
    %c24_136 = arith.constant 24 : index
    %199 = vector.load %arg26[%c0_135, %c24_136] : memref<8x32xf32, #tpu.memory_space<vmem>>, vector<8x8xf32>
    %200 = vector.broadcast %187 : vector<8x1xf32> to vector<8x8xf32>
    %201 = arith.mulf %200, %199 : vector<8x8xf32>
    %cst_137 = arith.constant dense<0.000000e+00> : vector<8x8xf32>
    %202 = tpu.matmul %198, %168, %cst_137 {dimension_numbers = #tpu.dot_dimension_numbers<[1], [0], [0], [1], [0, 0, 1, 1], [], []>} : vector<8x8xbf16>, vector<8x8xbf16>, vector<8x8xf32> -> vector<8x8xf32>
    %203 = arith.addf %201, %202 : vector<8x8xf32>
    %c0_138 = arith.constant 0 : index
    %c24_139 = arith.constant 24 : index
    %204 = vector.load %arg26[%c0_138, %c24_139] : memref<8x32xf32, #tpu.memory_space<vmem>>, vector<8x8xf32>
    tpu.vector_store %arg26[%c0_138, %c24_139], %203 {strides = array<i32>} : memref<8x32xf32, #tpu.memory_space<vmem>>, vector<8x8xf32>,
    %c0_140 = arith.constant 0 : index
    %c24_141 = arith.constant 24 : index
    %205 = vector.load %arg27[%c0_140, %c24_141] : memref<8x32xf32, #tpu.memory_space<vmem>>, vector<8x8xf32>
    %206 = vector.broadcast %187 : vector<8x1xf32> to vector<8x8xf32>
    %207 = arith.mulf %206, %205 : vector<8x8xf32>
    %cst_142 = arith.constant dense<0.000000e+00> : vector<8x8xf32>
    %208 = tpu.matmul %198, %169, %cst_142 {dimension_numbers = #tpu.dot_dimension_numbers<[1], [0], [0], [1], [0, 0, 1, 1], [], []>} : vector<8x8xbf16>, vector<8x8xbf16>, vector<8x8xf32> -> vector<8x8xf32>
    %209 = arith.addf %207, %208 : vector<8x8xf32>
    %c0_143 = arith.constant 0 : index
    %c24_144 = arith.constant 24 : index
    %210 = vector.load %arg27[%c0_143, %c24_144] : memref<8x32xf32, #tpu.memory_space<vmem>>, vector<8x8xf32>
    tpu.vector_store %arg27[%c0_143, %c24_144], %209 {strides = array<i32>} : memref<8x32xf32, #tpu.memory_space<vmem>>, vector<8x8xf32>,
    %c1_i32 = arith.constant 1 : i32
    %211 = arith.cmpi eq, %arg2, %c1_i32 : i32
    %212 = arith.extui %211 : i1 to i32
    %c0_i32_145 = arith.constant 0 : i32
    %213 = arith.cmpi ne, %212, %c0_i32_145 : i32
    scf.if %213 {
      %c0_146 = arith.constant 0 : index
      %c0_147 = arith.constant 0 : index
      %214 = vector.load %arg25[%c0_146, %c0_147] : memref<8x4xf32, #tpu.memory_space<vmem>>, vector<8x4xf32>
      %215 = tpu.reciprocal %214 {approx = true} : vector<8x4xf32> -> vector<8x4xf32>
      %c0_148 = arith.constant 0 : index
      %c0_149 = arith.constant 0 : index
      %216 = vector.load %arg26[%c0_148, %c0_149] : memref<8x32xf32, #tpu.memory_space<vmem>>, vector<8x8xf32>
      %217 = vector.extract_strided_slice %215 {offsets = [0, 0], sizes = [8, 1], strides = [1, 1]} : vector<8x4xf32> to vector<8x1xf32>
      %218 = vector.broadcast %217 : vector<8x1xf32> to vector<8x8xf32>
      %219 = arith.mulf %216, %218 : vector<8x8xf32>
      %c0_150 = arith.constant 0 : index
      %c0_151 = arith.constant 0 : index
      %220 = vector.load %arg26[%c0_150, %c0_151] : memref<8x32xf32, #tpu.memory_space<vmem>>, vector<8x8xf32>
      tpu.vector_store %arg26[%c0_150, %c0_151], %219 {strides = array<i32>} : memref<8x32xf32, #tpu.memory_space<vmem>>, vector<8x8xf32>,
      %c0_152 = arith.constant 0 : index
      %c0_153 = arith.constant 0 : index
      %221 = vector.load %arg27[%c0_152, %c0_153] : memref<8x32xf32, #tpu.memory_space<vmem>>, vector<8x8xf32>
      %222 = vector.extract_strided_slice %215 {offsets = [0, 0], sizes = [8, 1], strides = [1, 1]} : vector<8x4xf32> to vector<8x1xf32>
      %223 = vector.broadcast %222 : vector<8x1xf32> to vector<8x8xf32>
      %224 = arith.mulf %221, %223 : vector<8x8xf32>
      %c0_154 = arith.constant 0 : index
      %c0_155 = arith.constant 0 : index
      %225 = vector.load %arg27[%c0_154, %c0_155] : memref<8x32xf32, #tpu.memory_space<vmem>>, vector<8x8xf32>
      tpu.vector_store %arg27[%c0_154, %c0_155], %224 {strides = array<i32>} : memref<8x32xf32, #tpu.memory_space<vmem>>, vector<8x8xf32>,
      %c0_156 = arith.constant 0 : index
      %c8_157 = arith.constant 8 : index
      %226 = vector.load %arg26[%c0_156, %c8_157] : memref<8x32xf32, #tpu.memory_space<vmem>>, vector<8x8xf32>
      %227 = vector.extract_strided_slice %215 {offsets = [0, 1], sizes = [8, 1], strides = [1, 1]} : vector<8x4xf32> to vector<8x1xf32>
      %228 = vector.broadcast %227 : vector<8x1xf32> to vector<8x8xf32>
      %229 = arith.mulf %226, %228 : vector<8x8xf32>
      %c0_158 = arith.constant 0 : index
      %c8_159 = arith.constant 8 : index
      %230 = vector.load %arg26[%c0_158, %c8_159] : memref<8x32xf32, #tpu.memory_space<vmem>>, vector<8x8xf32>
      tpu.vector_store %arg26[%c0_158, %c8_159], %229 {strides = array<i32>} : memref<8x32xf32, #tpu.memory_space<vmem>>, vector<8x8xf32>,
      %c0_160 = arith.constant 0 : index
      %c8_161 = arith.constant 8 : index
      %231 = vector.load %arg27[%c0_160, %c8_161] : memref<8x32xf32, #tpu.memory_space<vmem>>, vector<8x8xf32>
      %232 = vector.extract_strided_slice %215 {offsets = [0, 1], sizes = [8, 1], strides = [1, 1]} : vector<8x4xf32> to vector<8x1xf32>
      %233 = vector.broadcast %232 : vector<8x1xf32> to vector<8x8xf32>
      %234 = arith.mulf %231, %233 : vector<8x8xf32>
      %c0_162 = arith.constant 0 : index
      %c8_163 = arith.constant 8 : index
      %235 = vector.load %arg27[%c0_162, %c8_163] : memref<8x32xf32, #tpu.memory_space<vmem>>, vector<8x8xf32>
      tpu.vector_store %arg27[%c0_162, %c8_163], %234 {strides = array<i32>} : memref<8x32xf32, #tpu.memory_space<vmem>>, vector<8x8xf32>,
      %c0_164 = arith.constant 0 : index
      %c16_165 = arith.constant 16 : index
      %236 = vector.load %arg26[%c0_164, %c16_165] : memref<8x32xf32, #tpu.memory_space<vmem>>, vector<8x8xf32>
      %237 = vector.extract_strided_slice %215 {offsets = [0, 2], sizes = [8, 1], strides = [1, 1]} : vector<8x4xf32> to vector<8x1xf32>
      %238 = vector.broadcast %237 : vector<8x1xf32> to vector<8x8xf32>
      %239 = arith.mulf %236, %238 : vector<8x8xf32>
      %c0_166 = arith.constant 0 : index
      %c16_167 = arith.constant 16 : index
      %240 = vector.load %arg26[%c0_166, %c16_167] : memref<8x32xf32, #tpu.memory_space<vmem>>, vector<8x8xf32>
      tpu.vector_store %arg26[%c0_166, %c16_167], %239 {strides = array<i32>} : memref<8x32xf32, #tpu.memory_space<vmem>>, vector<8x8xf32>,
      %c0_168 = arith.constant 0 : index
      %c16_169 = arith.constant 16 : index
      %241 = vector.load %arg27[%c0_168, %c16_169] : memref<8x32xf32, #tpu.memory_space<vmem>>, vector<8x8xf32>
      %242 = vector.extract_strided_slice %215 {offsets = [0, 2], sizes = [8, 1], strides = [1, 1]} : vector<8x4xf32> to vector<8x1xf32>
      %243 = vector.broadcast %242 : vector<8x1xf32> to vector<8x8xf32>
      %244 = arith.mulf %241, %243 : vector<8x8xf32>
      %c0_170 = arith.constant 0 : index
      %c16_171 = arith.constant 16 : index
      %245 = vector.load %arg27[%c0_170, %c16_171] : memref<8x32xf32, #tpu.memory_space<vmem>>, vector<8x8xf32>
      tpu.vector_store %arg27[%c0_170, %c16_171], %244 {strides = array<i32>} : memref<8x32xf32, #tpu.memory_space<vmem>>, vector<8x8xf32>,
      %c0_172 = arith.constant 0 : index
      %c24_173 = arith.constant 24 : index
      %246 = vector.load %arg26[%c0_172, %c24_173] : memref<8x32xf32, #tpu.memory_space<vmem>>, vector<8x8xf32>
      %247 = vector.extract_strided_slice %215 {offsets = [0, 3], sizes = [8, 1], strides = [1, 1]} : vector<8x4xf32> to vector<8x1xf32>
      %248 = vector.broadcast %247 : vector<8x1xf32> to vector<8x8xf32>
      %249 = arith.mulf %246, %248 : vector<8x8xf32>
      %c0_174 = arith.constant 0 : index
      %c24_175 = arith.constant 24 : index
      %250 = vector.load %arg26[%c0_174, %c24_175] : memref<8x32xf32, #tpu.memory_space<vmem>>, vector<8x8xf32>
      tpu.vector_store %arg26[%c0_174, %c24_175], %249 {strides = array<i32>} : memref<8x32xf32, #tpu.memory_space<vmem>>, vector<8x8xf32>,
      %c0_176 = arith.constant 0 : index
      %c24_177 = arith.constant 24 : index
      %251 = vector.load %arg27[%c0_176, %c24_177] : memref<8x32xf32, #tpu.memory_space<vmem>>, vector<8x8xf32>
      %252 = vector.extract_strided_slice %215 {offsets = [0, 3], sizes = [8, 1], strides = [1, 1]} : vector<8x4xf32> to vector<8x1xf32>
      %253 = vector.broadcast %252 : vector<8x1xf32> to vector<8x8xf32>
      %254 = arith.mulf %251, %253 : vector<8x8xf32>
      %c0_178 = arith.constant 0 : index
      %c24_179 = arith.constant 24 : index
      %255 = vector.load %arg27[%c0_178, %c24_179] : memref<8x32xf32, #tpu.memory_space<vmem>>, vector<8x8xf32>
      tpu.vector_store %arg27[%c0_178, %c24_179], %254 {strides = array<i32>} : memref<8x32xf32, #tpu.memory_space<vmem>>, vector<8x8xf32>,
      %c0_180 = arith.constant 0 : index
      %c0_181 = arith.constant 0 : index
      %256 = vector.load %arg26[%c0_180, %c0_181] : memref<8x32xf32, #tpu.memory_space<vmem>>, vector<8x32xf32>
      %257 = arith.truncf %256 : vector<8x32xf32> to vector<8x32xbf16>
      %c0_182 = arith.constant 0 : index
      %c0_183 = arith.constant 0 : index
      %258 = vector.load %arg27[%c0_182, %c0_183] : memref<8x32xf32, #tpu.memory_space<vmem>>, vector<8x32xf32>
      %259 = arith.truncf %258 : vector<8x32xf32> to vector<8x32xbf16>
      %c0_184 = arith.constant 0 : index
      %c0_185 = arith.constant 0 : index
      %260 = vector.load %arg15[%c0_184, %c0_185] : memref<32x32xbf16, #tpu.memory_space<vmem>>, vector<32x32xbf16>
      %cst_186 = arith.constant dense<0.000000e+00> : vector<8x32xf32>
      %261 = tpu.matmul %257, %260, %cst_186 {dimension_numbers = #tpu.dot_dimension_numbers<[1], [0], [0], [1], [0, 0, 1, 1], [], []>} : vector<8x32xbf16>, vector<32x32xbf16>, vector<8x32xf32> -> vector<8x32xf32>
      %c0_187 = arith.constant 0 : index
      %c0_188 = arith.constant 0 : index
      %262 = vector.load %arg16[%c0_187, %c0_188] : memref<1x32xf32, #tpu.memory_space<vmem>>, vector<1x32xf32>
      %263 = vector.broadcast %262 : vector<1x32xf32> to vector<8x32xf32>
      %264 = arith.addf %261, %263 : vector<8x32xf32>
      %c0_189 = arith.constant 0 : index
      %c0_190 = arith.constant 0 : index
      %c0_191 = arith.constant 0 : index
      %265 = vector.load %arg3[%c0_189, %c0_190, %c0_191] : memref<1x8x32xf32, #tpu.memory_space<vmem>>, vector<1x8x32xf32>
      %266 = vector.shape_cast %265 : vector<1x8x32xf32> to vector<8x32xf32>
      %267 = arith.addf %264, %266 : vector<8x32xf32>
      %c0_192 = arith.constant 0 : index
      %c0_193 = arith.constant 0 : index
      %c0_194 = arith.constant 0 : index
      %268 = vector.load %arg19[%c0_192, %c0_193, %c0_194] : memref<1x8x32xf32, #tpu.memory_space<vmem>>, vector<1x8x32xf32>
      %269 = vector.shape_cast %268 : vector<1x8x32xf32> to vector<8x32xf32>
      %270 = vector.shape_cast %267 : vector<8x32xf32> to vector<1x8x32xf32>
      tpu.vector_store %arg19[%c0_192, %c0_193, %c0_194], %270 {strides = array<i32>} : memref<1x8x32xf32, #tpu.memory_space<vmem>>, vector<1x8x32xf32>,
      %c0_195 = arith.constant 0 : index
      %c0_196 = arith.constant 0 : index
      %271 = vector.load %arg17[%c0_195, %c0_196] : memref<32x32xbf16, #tpu.memory_space<vmem>>, vector<32x32xbf16>
      %cst_197 = arith.constant dense<0.000000e+00> : vector<8x32xf32>
      %272 = tpu.matmul %259, %271, %cst_197 {dimension_numbers = #tpu.dot_dimension_numbers<[1], [0], [0], [1], [0, 0, 1, 1], [], []>} : vector<8x32xbf16>, vector<32x32xbf16>, vector<8x32xf32> -> vector<8x32xf32>
      %c0_198 = arith.constant 0 : index
      %c0_199 = arith.constant 0 : index
      %273 = vector.load %arg18[%c0_198, %c0_199] : memref<1x32xf32, #tpu.memory_space<vmem>>, vector<1x32xf32>
      %274 = vector.broadcast %273 : vector<1x32xf32> to vector<8x32xf32>
      %275 = arith.addf %272, %274 : vector<8x32xf32>
      %c0_200 = arith.constant 0 : index
      %c0_201 = arith.constant 0 : index
      %c0_202 = arith.constant 0 : index
      %276 = vector.load %arg4[%c0_200, %c0_201, %c0_202] : memref<1x8x32xf32, #tpu.memory_space<vmem>>, vector<1x8x32xf32>
      %277 = vector.shape_cast %276 : vector<1x8x32xf32> to vector<8x32xf32>
      %278 = arith.addf %275, %277 : vector<8x32xf32>
      %c0_203 = arith.constant 0 : index
      %c0_204 = arith.constant 0 : index
      %c0_205 = arith.constant 0 : index
      %279 = vector.load %arg20[%c0_203, %c0_204, %c0_205] : memref<1x8x32xf32, #tpu.memory_space<vmem>>, vector<1x8x32xf32>
      %280 = vector.shape_cast %279 : vector<1x8x32xf32> to vector<8x32xf32>
      %281 = vector.shape_cast %278 : vector<8x32xf32> to vector<1x8x32xf32>
      tpu.vector_store %arg20[%c0_203, %c0_204, %c0_205], %281 {strides = array<i32>} : memref<1x8x32xf32, #tpu.memory_space<vmem>>, vector<1x8x32xf32>,
    } else {
    }
    return
  }
  func.func @transform_0(%arg0: i32, %arg1: i32, %arg2: i32) -> (i32, i32, i32) {
    %c0_i32 = arith.constant 0 : i32
    %c0_i32_0 = arith.constant 0 : i32
    return %arg0, %arg1, %c0_i32 : i32, i32, i32
  }
  func.func @transform_1(%arg0: i32, %arg1: i32, %arg2: i32) -> (i32, i32, i32) {
    %c0_i32 = arith.constant 0 : i32
    %c0_i32_0 = arith.constant 0 : i32
    return %arg0, %arg1, %c0_i32 : i32, i32, i32
  }
  func.func @transform_2(%arg0: i32, %arg1: i32, %arg2: i32) -> (i32, i32, i32) {
    %c0_i32 = arith.constant 0 : i32
    %c0_i32_0 = arith.constant 0 : i32
    return %arg0, %arg2, %c0_i32 : i32, i32, i32
  }
  func.func @transform_3(%arg0: i32, %arg1: i32, %arg2: i32) -> (i32, i32, i32) {
    %c0_i32 = arith.constant 0 : i32
    %c0_i32_0 = arith.constant 0 : i32
    return %arg0, %arg2, %c0_i32 : i32, i32, i32
  }
  func.func @transform_4(%arg0: i32, %arg1: i32, %arg2: i32) -> (i32, i32) {
    %c0_i32 = arith.constant 0 : i32
    %c0_i32_0 = arith.constant 0 : i32
    %c0_i32_1 = arith.constant 0 : i32
    return %c0_i32, %c0_i32_0 : i32, i32
  }
  func.func @transform_5(%arg0: i32, %arg1: i32, %arg2: i32) -> (i32, i32) {
    %c0_i32 = arith.constant 0 : i32
    %c0_i32_0 = arith.constant 0 : i32
    %c0_i32_1 = arith.constant 0 : i32
    return %c0_i32, %c0_i32_0 : i32, i32
  }
  func.func @transform_6(%arg0: i32, %arg1: i32, %arg2: i32) -> (i32, i32) {
    %c0_i32 = arith.constant 0 : i32
    %c0_i32_0 = arith.constant 0 : i32
    %c0_i32_1 = arith.constant 0 : i32
    return %c0_i32, %c0_i32_0 : i32, i32
  }
  func.func @transform_7(%arg0: i32, %arg1: i32, %arg2: i32) -> (i32, i32) {
    %c0_i32 = arith.constant 0 : i32
    %c0_i32_0 = arith.constant 0 : i32
    %c0_i32_1 = arith.constant 0 : i32
    return %c0_i32, %c0_i32_0 : i32, i32
  }
  func.func @transform_8(%arg0: i32, %arg1: i32, %arg2: i32) -> (i32, i32) {
    %c0_i32 = arith.constant 0 : i32
    %c0_i32_0 = arith.constant 0 : i32
    %c0_i32_1 = arith.constant 0 : i32
    return %c0_i32, %c0_i32_0 : i32, i32
  }
  func.func @transform_9(%arg0: i32, %arg1: i32, %arg2: i32) -> (i32, i32) {
    %c0_i32 = arith.constant 0 : i32
    %c0_i32_0 = arith.constant 0 : i32
    %c0_i32_1 = arith.constant 0 : i32
    return %c0_i32, %c0_i32_0 : i32, i32
  }
  func.func @transform_10(%arg0: i32, %arg1: i32, %arg2: i32) -> (i32, i32) {
    %c0_i32 = arith.constant 0 : i32
    %c0_i32_0 = arith.constant 0 : i32
    %c0_i32_1 = arith.constant 0 : i32
    return %c0_i32, %c0_i32_0 : i32, i32
  }
  func.func @transform_11(%arg0: i32, %arg1: i32, %arg2: i32) -> (i32, i32) {
    %c0_i32 = arith.constant 0 : i32
    %c0_i32_0 = arith.constant 0 : i32
    %c0_i32_1 = arith.constant 0 : i32
    return %c0_i32, %c0_i32_0 : i32, i32
  }
  func.func @transform_12(%arg0: i32, %arg1: i32, %arg2: i32) -> (i32, i32) {
    %c0_i32 = arith.constant 0 : i32
    %c0_i32_0 = arith.constant 0 : i32
    %c0_i32_1 = arith.constant 0 : i32
    return %c0_i32, %c0_i32_0 : i32, i32
  }
  func.func @transform_13(%arg0: i32, %arg1: i32, %arg2: i32) -> (i32, i32) {
    %c0_i32 = arith.constant 0 : i32
    %c0_i32_0 = arith.constant 0 : i32
    %c0_i32_1 = arith.constant 0 : i32
    return %c0_i32, %c0_i32_0 : i32, i32
  }
  func.func @transform_14(%arg0: i32, %arg1: i32, %arg2: i32) -> (i32, i32) {
    %c0_i32 = arith.constant 0 : i32
    %c0_i32_0 = arith.constant 0 : i32
    %c0_i32_1 = arith.constant 0 : i32
    return %c0_i32, %c0_i32_0 : i32, i32
  }
  func.func @transform_15(%arg0: i32, %arg1: i32, %arg2: i32) -> (i32, i32) {
    %c0_i32 = arith.constant 0 : i32
    %c0_i32_0 = arith.constant 0 : i32
    %c0_i32_1 = arith.constant 0 : i32
    return %c0_i32, %c0_i32_0 : i32, i32
  }
  func.func @transform_16(%arg0: i32, %arg1: i32, %arg2: i32) -> (i32, i32, i32) {
    %c0_i32 = arith.constant 0 : i32
    %c0_i32_0 = arith.constant 0 : i32
    return %arg0, %arg1, %c0_i32 : i32, i32, i32
  }
  func.func @transform_17(%arg0: i32, %arg1: i32, %arg2: i32) -> (i32, i32, i32) {
    %c0_i32 = arith.constant 0 : i32
    %c0_i32_0 = arith.constant 0 : i32
    return %arg0, %arg1, %c0_i32 : i32, i32, i32
  }
}

</mosaic_0001>

<bundles_post_ra>
// kernel: multi_headed_attention.1
= control target key start
LH: loop header
LB: loop body
LE: loop exit
PB: predicated region body
PF: predicated region fallthrough
CT: control target
= control target key end

     0   :  { %s4989_s0 = inlined_call_operand.hbm [shape: f32[2,16,32], index: 0, kind: input, shape index: {}, may-alias: {0,2}]   ;;  %s4990_s1 = inlined_call_operand.hbm [shape: f32[2,16,32], index: 1, kind: input, shape index: {}, may-alias: {1,3}]   ;;  %s4991_s2 = inlined_call_operand.hbm [shape: f32[2,16,32], index: 2, kind: input, shape index: {}, may-alias: {0,2}]   ;;  %s4992_s3 = inlined_call_operand.hbm [shape: f32[2,16,32], index: 3, kind: input, shape index: {}, may-alias: {1,3}]   ;;  %s4993_s4 = inlined_call_operand.vmem [shape: bf16[32,32], index: 4, kind: input, shape index: {}]   ;;  %s4994_s5 = inlined_call_operand.vmem [shape: f32[1,32], index: 5, kind: input, shape index: {}]   ;;  %s4995_s6 = inlined_call_operand.vmem [shape: bf16[32,32], index: 6, kind: input, shape index: {}]   ;;  %s4996_s7 = inlined_call_operand.vmem [shape: f32[1,32], index: 7, kind: input, shape index: {}]   ;;  %s4997_s8 = inlined_call_operand.hbm [shape: bf16[32,64], index: 8, kind: input, shape index: {}]   ;;  %s4998_s9 = inlined_call_operand.hbm [shape: f32[1,64], index: 9, kind: input, shape index: {}]   ;;  %s4999_s10 = inlined_call_operand.hbm [shape: bf16[32,64], index: 10, kind: input, shape index: {}]   ;;  %s5000_s11 = inlined_call_operand.hbm [shape: f32[1,64], index: 11, kind: input, shape index: {}]   ;;  %s5001_s12 = inlined_call_operand.hbm [shape: bf16[32,32], index: 12, kind: input, shape index: {}]   ;;  %s5002_s13 = inlined_call_operand.hbm [shape: f32[1,32], index: 13, kind: input, shape index: {}]   ;;  %s5003_s14 = inlined_call_operand.hbm [shape: bf16[32,32], index: 14, kind: input, shape index: {}]   ;;  %s5004_s15 = inlined_call_operand.hbm [shape: f32[1,32], index: 15, kind: input, shape index: {}]   ;;  %s5005_s16 = inlined_call_operand.hbm [shape: f32[2,16,32], index: 16, kind: output, shape index: {0}]   ;;  %s5006_s17 = inlined_call_operand.hbm [shape: f32[2,16,32], index: 17, kind: output, shape index: {1}]  }
   0x1   :  { %5059 = sst [smem:[#allocation60_spill]] %s4989_s0 }
   0x2   :  { %5060 = sst [smem:[#allocation61_spill]] %s4990_s1 }
   0x3   :  { %5061 = sst [smem:[#allocation62_spill]] %s4991_s2 }
   0x4   :  { %5062 = sst [smem:[#allocation63_spill]] %s4992_s3 }
   0x5   :  { %5063 = sst [smem:[#allocation64_spill]] %s4993_s4 }
   0x6   :  { %5064 = sst [smem:[#allocation65_spill]] %s4994_s5 }
   0x7   :  { %5065 = sst [smem:[#allocation66_spill]] %s4995_s6 }
   0x8   :  { %5066 = sst [smem:[#allocation67_spill]] %s4996_s7 }
   0x9   :  { %5067 = sst [smem:[#allocation68_spill]] %s4997_s8 }
   0xa   :  { %5068 = sst [smem:[#allocation69_spill]] %s4998_s9 }
   0xb   :  { %5069 = sst [smem:[#allocation70_spill]] %s4999_s10 }
   0xc   :  { %5070 = sst [smem:[#allocation71_spill]] %s5000_s11 }
   0xd   :  { %5071 = sst [smem:[#allocation72_spill]] %s5001_s12 }
   0xe   :  { %5072 = sst [smem:[#allocation73_spill]] %s5002_s13 }
   0xf   :  { %5073 = sst [smem:[#allocation74_spill]] %s5003_s14 }
  0x10   :  { %5074 = sst [smem:[#allocation75_spill]] %s5004_s15 }
  0x11   :  { %5075 = sst [smem:[#allocation76_spill]] %s5005_s16 }
  0x12   :  { %5076 = sst [smem:[#allocation77_spill]] %s5006_s17 }
  0x13   :  { %23 = vsyncpa [#allocation10], 0 }
  0x14   :  { %25 = vsyncpa [#allocation10 + $0x1], 0 }
  0x15   :  { %26 = vsyncpa [#allocation13], 0 }
  0x16   :  { %28 = vsyncpa [#allocation13 + $0x1], 0 }
  0x17   :  { %29 = vsyncpa [#allocation16], 0 }
  0x18   :  { %31 = vsyncpa [#allocation16 + $0x1], 0 }
  0x19   :  { %32 = vsyncpa [#allocation19], 0 }
  0x1a   :  { %33 = vsyncpa [#allocation22], 0 }
  0x1b   :  { %34 = vsyncpa [#allocation25], 0 }
  0x1c   :  { %35 = vsyncpa [#allocation28], 0 }
  0x1d   :  { %36 = vsyncpa [#allocation11], 0 }
  0x1e   :  { %38 = vsyncpa [#allocation11 + $0x1], 0 }
  0x1f   :  { %39 = vsyncpa [#allocation31], 0 }
  0x20   :  { %41 = vsyncpa [#allocation31 + $0x1], 0  ;;  %s4003_s24 = smov 0   ;;  %s4005_s25 = smov 0  }
  0x21   :  { %s4007_s26 = smov 0   ;;  %s4009_s27 = smov 0  }
  0x22   :  { %s4011_s28 = smov 0   ;;  %s4013_s29 = smov 0  }
  0x23   :  { %s4015_s0 = smov 0   ;;  %s4017_s30 = smov 0  }
  0x24   :  { %s4019_s18 = smov 0   ;;  %s4021_s19 = smov 0  }
  0x25   :  { %s4023_s1 = smov 0   ;;  %s4025_s20 = smov 0  }
  0x26   :  { %s4027_s21 = smov 0  }
  0x27 LB: > { %5077 = sst [smem:[#allocation43_spill]] %s3822_s25  ;;  %s4069_s22 = sadd.s32 4294967295, %s3866_s21   ;;  %s3866_s21 = sphi %s4027_s21, %s47_s21   ;;  %s3862_s20 = sphi %s4025_s20, %s5175_s20   ;;  %s3858_s1 = sphi %s4023_s1, %s5174_s1   ;;  %s3854_s19 = sphi %s4021_s19, %s5173_s19   ;;  %s3850_s18 = sphi %s4019_s18, %s5172_s18   ;;  %s3846_s30 = sphi %s4017_s30, %s5171_s30   ;;  %s3842_s0 = sphi %s4015_s0, %s5182_s0   ;;  %s3838_s29 = sphi %s4013_s29, %s5181_s29   ;;  %s3834_s28 = sphi %s4011_s28, %s5180_s28   ;;  %s3830_s27 = sphi %s4009_s27, %s5179_s27   ;;  %s3826_s26 = sphi %s4007_s26, %s5178_s26   ;;  %s3822_s25 = sphi %s4005_s25, %s5177_s25   ;;  %s3818_s24 = sphi %s4003_s24, %s5167_s24  }
  0x28   : > { %5078 = sst [smem:[#allocation44_spill]] %s3830_s27  ;;  %p2718_p0 = scmp.ge.s32.totalorder %s3866_s21, 1 }
  0x29   : > { %5079 = sst [smem:[#allocation45_spill]] %s3842_s0  ;;  %p5020_p1 = scmp.eq.s32.totalorder %s4069_s22, 0 }
  0x2a   : > { %5080 = sst [smem:[#allocation46_spill]] %s3846_s30  ;;  %p491_p2 = scmp.lt.s32.totalorder %s3866_s21, 9 }
  0x2b   : > { %5081 = sst [smem:[#allocation47_spill]] %s3850_s18  ;;  %s3868_s17 = smov [#allocation17]  }
  0x2c   : > { %5082 = sst [smem:[#allocation48_spill]] %s3854_s19  ;;  %p4074_p3 = pnand %p2718_p0, %p491_p2 }
  0x2d   : > { %5083 = sst [smem:[#allocation49_spill]] %s3858_s1  ;;  %s515_s16 = sshll.u32 %s3868_s17, 4  ;;  %s4078_s16 = int_to_ptr.vmem [resolvable:$true] %s515_s16 }
  0x2e   : > { %5084 = sst [smem:[#allocation50_spill]] %s3862_s20  ;;  %p3054_p4 = pneg %p4074_p3 }
  0x2f   : > { %s5085_s23 = scalar_select %p4074_p3, 1, 0 }
  0x30   : > { %p4084_p5 = pnand %p3054_p4, %p5020_p1  ;;  %s3869_s18 = smov [#allocation18]  }
  0x31   : > { %5086 = sst [smem:[#allocation51_spill]] %s5085_s23  ;;  %s529_s5 = sshll.u32 %s3869_s18, 4  ;;  %s4088_s5 = int_to_ptr.vmem [resolvable:$true] %s529_s5 }
  0x32   : > { %s5087_s30 = scalar_select %p4084_p5, 1, 0 }
  0x33   : > { %s3870_s7 = smov [#allocation21]   ;;  %s5088_s8 = sld [smem:[#allocation68_spill]] }
  0x34   : > { %s4090_s4 = sshll.u32 %s3870_s7, 4  ;;  %p4100_p7 = pneg %p4084_p5  ;;  %s554_s4 = int_to_ptr.vmem [resolvable:$true] %s4090_s4 }
  0x36   : > { %s5089_s2 = scalar_select %p4100_p7, 1, 0 }
  0x39   : > { %s3320_s17 = scalar_lea.hbm %s5088_s8, 256 }
  0x3a   : > { %p3321_p6 = scmp.ne.s32.totalorder %s5088_s8, %s3320_s17  ;;  %p3327_p10 = scmp.lt.u32.totalorder %s3320_s17, %s5088_s8 }
  0x3c   : > { %p3323_p8 = pnand %p4100_p7, %p3321_p6 }
  0x3e   : > { %p3324_p9 = pneg %p3323_p8 }
  0x40   : > { %p3329_p11 = pnand %p3327_p10, %p3324_p9 }
  0x42   : > { %3332 = shalt.err (!%p3329_p11)
}
  0x43   : > { %s3333_s3 = scalar_lea.vmem %s4078_s16, 256  ;;  %p3341_p2 = scmp.lt.s32.totalorder %s4078_s16, %s4078_s16 }
  0x44   : > { %p3334_p12 = scmp.ne.s32.totalorder %s4078_s16, %s3333_s3  ;;  %p3342_p4 = scmp.lt.s32.totalorder %s3333_s3, %s3333_s3 }
  0x46   : > { %p3336_p13 = pnand %p3334_p12, %p4100_p7  ;;  %p3343_p6 = por %p3342_p4, %p3341_p2 }
  0x48   : > { %p3337_p0 = pneg %p3336_p13 }
  0x4a   : > { %p3344_p8 = pnand %p3343_p6, %p3337_p0 }
  0x4c   : > { %3347 = shalt.err (!%p3344_p8)
}
  0x4d   : > { %s5022_s6 = smov 64   ;;  %s5024_s0 = smov 4  }
  0x4e   : > { %3057 = dma.hbm_to_vmem [thread:$0]  (!%p4084_p5), %s5088_s8, 256, %s4078_s16, [#allocation16], %s5022_s6, %s5022_s6, %s5024_s0  }
  0x4f   : > { %s5090_s9 = sld [smem:[#allocation69_spill]] }
  0x55   : > { %s3348_s3 = scalar_lea.hbm %s5090_s9, 16 }
  0x56   : > { %p3349_p9 = scmp.ne.s32.totalorder %s5090_s9, %s3348_s3  ;;  %p3355_p12 = scmp.lt.u32.totalorder %s3348_s3, %s5090_s9 }
  0x58   : > { %p3351_p10 = pnand %p3349_p9, %p4100_p7 }
  0x5a   : > { %p3352_p11 = pneg %p3351_p10 }
  0x5c   : > { %p3357_p13 = pnand %p3355_p12, %p3352_p11 }
  0x5e   : > { %3360 = shalt.err (!%p3357_p13)
}
  0x5f   : > { %s3361_s16 = scalar_lea.vmem %s4088_s5, 16  ;;  %s3368_s14 = scalar_lea.vmem %s4088_s5, 32 }
  0x60   : > { %p3362_p0 = scmp.ne.s32.totalorder %s4088_s5, %s3361_s16  ;;  %p3369_p6 = scmp.lt.s32.totalorder %s4088_s5, %s4088_s5 }
  0x61   : > { %p3370_p8 = scmp.lt.s32.totalorder %s3368_s14, %s3361_s16 }
  0x62   : > { %p3364_p2 = pnand %p3362_p0, %p4100_p7 }
  0x63   : > { %p3371_p9 = por %p3370_p8, %p3369_p6 }
  0x64   : > { %p3365_p4 = pneg %p3364_p2 }
  0x66   : > { %p3372_p10 = pnand %p3371_p9, %p3365_p4 }
  0x68   : > { %3375 = shalt.err (!%p3372_p10)
}
  0x69   : > { %3060 = dma.hbm_to_vmem [thread:$0]  (!%p4084_p5), %s5090_s9, 16, %s4088_s5, [#allocation19]  }
  0x6a   : > { %s5091_s11 = sld [smem:[#allocation71_spill]] }
  0x70   : > { %s3376_s17 = scalar_lea.hbm %s5091_s11, 16 }
  0x71   : > { %p3377_p11 = scmp.ne.s32.totalorder %s5091_s11, %s3376_s17  ;;  %p3383_p0 = scmp.lt.u32.totalorder %s3376_s17, %s5091_s11 }
  0x73   : > { %p3379_p12 = pnand %p3377_p11, %p4100_p7 }
  0x75   : > { %p3380_p13 = pneg %p3379_p12 }
  0x77   : > { %p3385_p2 = pnand %p3383_p0, %p3380_p13 }
  0x79   : > { %3388 = shalt.err (!%p3385_p2)
}
  0x7a   : > { %s3389_s14 = scalar_lea.vmem %s554_s4, 16  ;;  %s3396_s5 = scalar_lea.vmem %s554_s4, 32 }
  0x7b   : > { %p3390_p4 = scmp.ne.s32.totalorder %s554_s4, %s3389_s14  ;;  %p3397_p9 = scmp.lt.s32.totalorder %s554_s4, %s554_s4 }
  0x7c   : > { %p3398_p10 = scmp.lt.s32.totalorder %s3396_s5, %s3389_s14 }
  0x7d   : > { %p3392_p6 = pnand %p3390_p4, %p4100_p7 }
  0x7e   : > { %p3399_p1 = por %p3398_p10, %p3397_p9 }
  0x7f   : > { %p3393_p8 = pneg %p3392_p6 }
  0x81   : > { %p3400_p3 = pnand %p3399_p1, %p3393_p8 }
  0x83   : > { %3403 = shalt.err (!%p3400_p3)
}
  0x84   : > { %3066 = dma.hbm_to_vmem [thread:$0]  (!%p4084_p5), %s5091_s11, 16, %s554_s4, [#allocation22]  }
  0x85   : > { %s3873_s15 = smov [#allocation24]   ;;  %s5092_s13 = sld [smem:[#allocation73_spill]] }
  0x86   : > { %s577_s23 = sshll.u32 %s3873_s15, 4  ;;  %s578_s23 = int_to_ptr.vmem [resolvable:$true] %s577_s23 }
  0x8b   : > { %s3404_s7 = scalar_lea.hbm %s5092_s13, 16 }
  0x8c   : > { %p3405_p11 = scmp.ne.s32.totalorder %s5092_s13, %s3404_s7  ;;  %p3411_p12 = scmp.lt.u32.totalorder %s3404_s7, %s5092_s13 }
  0x8e   : > { %p3407_p1 = pnand %p3405_p11, %p4100_p7 }
  0x90   : > { %p3408_p3 = pneg %p3407_p1 }
  0x92   : > { %p3413_p13 = pnand %p3411_p12, %p3408_p3 }
  0x94   : > { %3416 = shalt.err (!%p3413_p13)
}
  0x95   : > { %s3417_s4 = scalar_lea.vmem %s578_s23, 16  ;;  %s3424_s10 = scalar_lea.vmem %s578_s23, 32 }
  0x96   : > { %p3418_p0 = scmp.ne.s32.totalorder %s578_s23, %s3417_s4  ;;  %p3425_p6 = scmp.lt.s32.totalorder %s578_s23, %s578_s23 }
  0x97   : > { %p3426_p8 = scmp.lt.s32.totalorder %s3424_s10, %s3417_s4 }
  0x98   : > { %p3420_p2 = pnand %p3418_p0, %p4100_p7 }
  0x99   : > { %p3427_p9 = por %p3426_p8, %p3425_p6 }
  0x9a   : > { %p3421_p4 = pneg %p3420_p2 }
  0x9c   : > { %p3428_p10 = pnand %p3427_p9, %p3421_p4 }
  0x9e   : > { %3431 = shalt.err (!%p3428_p10)
}
  0x9f   : > { %3072 = dma.hbm_to_vmem [thread:$0]  (!%p4084_p5), %s5092_s13, 16, %s578_s23, [#allocation25]  }
  0xa0   : > { %s59_s18 = sadd.s32 1, %s3854_s19  ;;  %s62_s7 = sadd.s32 1, %s3858_s1 }
  0xa1   : > { %p60_p11 = scmp.ge.s32.totalorder %s59_s18, 2  ;;  %s66_s3 = sadd.s32 1, %s3862_s20 }
  0xa2   : > { %s75_s16 = sadd.s32 1, %s3838_s29  ;;  %p82_p1 = scmp.ne.s32.totalorder %s3838_s29, %s3834_s28 }
  0xa3   : > { %s5184_s18 = smov (%p60_p11, %s59_s18), 0  ;;  %s5186_s7 = smov (!%p60_p11, %s62_s7), %s3858_s1 }
  0xa4   : > { %5093 = sst [smem:[#allocation52_spill]] %s5184_s18  ;;  %p83_p3 = scmp.eq.s32.totalorder %s3866_s21, 0 }
  0xa5   : > { %p64_p12 = scmp.ge.s32.totalorder %s5186_s7, 2  ;;  %p5026_p13 = scmp.ne.s32.totalorder %s3834_s28, %s3830_s27 }
  0xa6   : > { %p4203_p0 = por %p83_p3, %p82_p1  ;;  %s127_s14 = ssub.s32 %s3854_s19, %s5184_s18 }
  0xa7   : > { %s5188_s7 = smov (%p64_p12, %s5186_s7), 0  ;;  %s5190_s3 = smov (!%p64_p12, %s66_s3), %s3862_s20 }
  0xa8   : > { %5095 = sst [smem:[#allocation53_spill]] %s5188_s7  ;;  %s71_s5 = ssub.s32 %s3858_s1, %s5188_s7 }
  0xa9   : > { %p5096_p2 = scmp.eq.s32.totalorder %s4069_s22, 0  ;;  %p68_p6 = scmp.ge.s32.totalorder %s5190_s3, 2 }
  0xaa   : > { %s131_s10 = sadd.s32 1, %s3826_s26  ;;  %p138_p8 = scmp.ne.s32.totalorder %s3826_s26, %s3822_s25 }
  0xab   : > { %p4219_p4 = por %p5096_p2, %p5026_p13  ;;  %p144_p9 = scmp.ne.s32.totalorder %s3822_s25, %s3818_s24 }
  0xac   : > { %s5192_s3 = smov (%p68_p6, %s5190_s3), 0  ;;  %p4232_p10 = por %p138_p8, %p83_p3 }
  0xad   : > { %s5097_s4 = scalar_select %p4219_p4, 1, 0 }
  0xae   : > { %5098 = sst [smem:[#allocation54_spill]] %s5192_s3  ;;  %p5100_p11 = pmov %p5096_p2 }
  0xaf   : > { %s70_s6 = ssub.s32 %s3862_s20, %s5192_s3  ;;  %p450_p2 = scmp.eq.s32.totalorder %s4069_s22, 7 }
  0xb0   : > { %p4238_p12 = por %p144_p9, %p5100_p11  ;;  %s72_s24 = sor.u32 %s71_s5, %s70_s6 }
  0xb1   : > { %s128_s0 = sor.u32 %s127_s14, %s70_s6  ;;  %p73_p6 = scmp.eq.s32.totalorder %s72_s24, 0 }
  0xb2   : > { %s5101_s15 = scalar_select %p4238_p12, 1, 0 }
  0xb3   : > { %p129_p13 = scmp.eq.s32.totalorder %s128_s0, 0  ;;  %p4248_p3 = por %p450_p2, %p82_p1 }
  0xb4   : > { %5102 = sst [smem:[#allocation55_spill]] %s5101_s15  ;;  %s5105_s8 = sadd.s32 4294967294, %s3866_s21  }
  0xb5   : > { %s5103_s17 = scalar_select %p4248_p3, 1, 0 }
  0xb6   : > { %p456_p8 = scmp.eq.s32.totalorder %s5105_s8, 7  ;;  %p5108_p9 = scmp.ne.s32.totalorder %s3834_s28, %s3830_s27 }
  0xb7   : > { %5104 = sst [smem:[#allocation56_spill]] %s5103_s17  ;;  %p5035_p12 = scmp.lt.s32.totalorder %s3866_s21, 8 }
  0xb8   : > { %s4255_s9 = scalar_select %p73_p6, %s3838_s29, %s75_s16  }
  0xb9   : > { %s4258_s11 = scalar_select %p129_p13, %s3826_s26, %s131_s10  }
  0xba   : > { %5106 = sst [smem:[#allocation57_spill]] %s4255_s9  ;;  %p4263_p11 = por %p456_p8, %p5108_p9 }
  0xbb   : > { %5107 = sst [smem:[#allocation58_spill]] %s4258_s11  ;;  %s5029_s6 = sand.u32 1, %s3838_s29  }
  0xbc   : > { %s5109_s5 = scalar_select %p4263_p11, 1, 0 }
  0xbd   : > { %s2729_s0 = sshll.u32 %s3862_s20, 1  ;;  %s4272_s14 = sshll.u32 %s5029_s6, 3 }
  0xbe   : > { %5110 = sst [smem:[#allocation59_spill]] %s5109_s5  ;;  %s4275_s24 = sadd.s32 %s3858_s1, %s2729_s0 }
  0xbf   : > { %s5034_s8 = sshll.u32 %s4275_s24, 7  ;;  %p4282_p1 = pnand %p5035_p12, %p4203_p0 }
  0xc0   : > { %s5042_s10 = sand.u32 1, %s3866_s21   ;;  %s5112_s6 = sld [smem:[#allocation61_spill]] }
  0xc1   : > { %s5111_s16 = scalar_select %p4282_p1, 1, 0 }
  0xc2   : > { %s636_s18 = scalar_lea.vmem [#allocation12], %s4272_s14  ;;  %s4298_s20 = sadd.s32 %s3854_s19, %s2729_s0 }
  0xc3   : > { %s645_s23 = sshll.u32 %s636_s18, 4  ;;  %s4302_s1 = scalar_lea.sflag [#allocation13], %s5042_s10  ;;  %s4295_s23 = int_to_ptr.vmem [resolvable:$true] %s645_s23 }
  0xc4   : > { %p5046_p0 = pneg %p4282_p1 }
  0xc6   : > { %s4292_s7 = scalar_lea.hbm %s5112_s6, %s5034_s8  ;;  %s3437_s8 = scalar_lea.hbm %s5112_s6, 512 }
  0xc7   : > { %s3432_s9 = scalar_lea.hbm %s4292_s7, 128  ;;  %p3438_p8 = scmp.lt.u32.totalorder %s4292_s7, %s5112_s6 }
  0xc8   : > { %p3433_p13 = scmp.ne.s32.totalorder %s4292_s7, %s3432_s9  ;;  %p3439_p9 = scmp.lt.u32.totalorder %s3437_s8, %s3432_s9 }
  0xc9   : > { %p3441_p11 = scmp.lt.u32.totalorder %s3432_s9, %s4292_s7 }
  0xca   : > { %p3435_p2 = pnand %p5046_p0, %p3433_p13  ;;  %p3440_p12 = por %p3439_p9, %p3438_p8 }
  0xcc   : > { %p3436_p6 = pneg %p3435_p2  ;;  %p3442_p3 = por %p3441_p11, %p3440_p12 }
  0xce   : > { %p3443_p4 = pnand %p3442_p3, %p3436_p6 }
  0xd0   : > { %3446 = shalt.err (!%p3443_p4)
}
  0xd1   : > { %s3447_s0 = scalar_lea.vmem %s4295_s23, 128  ;;  %s3874_s13 = smov [#allocation12]  }
  0xd2   : > { %p3448_p13 = scmp.ne.s32.totalorder %s4295_s23, %s3447_s0  ;;  %s3452_s3 = sshll.u32 %s3874_s13, 4  ;;  %s3453_s3 = int_to_ptr.vmem [resolvable:$false] %s3452_s3 }
  0xd3   : > { %s3454_s11 = scalar_lea.vmem %s3453_s3, 256  ;;  %p3455_p7 = scmp.lt.s32.totalorder %s4295_s23, %s3453_s3 }
  0xd4   : > { %p3450_p2 = pnand %p3448_p13, %p5046_p0  ;;  %p3456_p8 = scmp.lt.s32.totalorder %s3454_s11, %s3447_s0 }
  0xd6   : > { %p3451_p5 = pneg %p3450_p2  ;;  %p3457_p9 = por %p3456_p8, %p3455_p7 }
  0xd8   : > { %p3458_p12 = pnand %p3457_p9, %p3451_p5 }
  0xda   : > { %3461 = shalt.err (!%p3458_p12)
}
  0xdb   : > { %3085 = dma.hbm_to_vmem [thread:$0]  (!%p4282_p1), %s4292_s7, 128, %s4295_s23, %s4302_s1  }
  0xdc   : > { %p5113_p4 = scmp.lt.s32.totalorder %s3866_s21, 8  ;;  %s3875_s8 = smov [#allocation20]  }
  0xdd   : > { %s539_s18 = sshll.u32 %s3875_s8, 4  ;;  %s3876_s0 = smov [#allocation23]   ;;  %s540_s18 = int_to_ptr.vmem [resolvable:$true] %s539_s18 }
  0xde   : > { %p4334_p3 = pnand %p5113_p4, %p4232_p10  ;;  %s563_s13 = sshll.u32 %s3876_s0, 4  ;;  %s564_s13 = int_to_ptr.vmem [resolvable:$true] %s563_s13 }
  0xdf   : > { %s5115_s10 = sld [smem:[#allocation70_spill]]  ;;  %p5116_p7 = scmp.ne.s32.totalorder %s5089_s2, 0 }
  0xe0   : > { %s5114_s9 = scalar_select %p4334_p3, 1, 0 }
  0xe5   : > { %s3462_s6 = scalar_lea.hbm %s5115_s10, 256 }
  0xe6   : > { %p3463_p5 = scmp.ne.s32.totalorder %s5115_s10, %s3462_s6  ;;  %p3469_p10 = scmp.lt.u32.totalorder %s3462_s6, %s5115_s10 }
  0xe8   : > { %p3465_p11 = pnand %p3463_p5, %p5116_p7 }
  0xea   : > { %p3466_p6 = pneg %p3465_p11 }
  0xec   : > { %p3471_p13 = pnand %p3469_p10, %p3466_p6 }
  0xee   : > { %3474 = shalt.err (!%p3471_p13)
}
  0xef   : > { %s3475_s23 = scalar_lea.vmem %s540_s18, 256  ;;  %p3483_p12 = scmp.lt.s32.totalorder %s540_s18, %s540_s18 }
  0xf0   : > { %p3476_p2 = scmp.ne.s32.totalorder %s540_s18, %s3475_s23  ;;  %p3484_p4 = scmp.lt.s32.totalorder %s3475_s23, %s3475_s23 }
  0xf2   : > { %p3478_p8 = pnand %p3476_p2, %p5116_p7  ;;  %p3485_p0 = por %p3484_p4, %p3483_p12 }
  0xf4   : > { %p3479_p9 = pneg %p3478_p8 }
  0xf6   : > { %p3486_p3 = pnand %p3485_p0, %p3479_p9 }
  0xf8   : > { %3489 = shalt.err (!%p3486_p3)
}
  0xf9   : > { %p5117_p5 = scmp.ne.s32.totalorder %s5087_s30, 0  ;;  %s5118_s19 = smov 4  }
  0xfa   : > { %s5119_s5 = smov 64   ;;  %s5120_s11 = sld [smem:[#allocation72_spill]] }
  0xfb   : > { %3063 = dma.hbm_to_vmem [thread:$0]  (!%p5117_p5), %s5115_s10, 256, %s540_s18, [#allocation19], %s5119_s5, %s5119_s5, %s5118_s19  }
 0x100   : > { %s3490_s7 = scalar_lea.hbm %s5120_s11, 256 }
 0x101   : > { %p3491_p0 = scmp.ne.s32.totalorder %s5120_s11, %s3490_s7  ;;  %p3497_p6 = scmp.lt.u32.totalorder %s3490_s7, %s5120_s11 }
 0x103   : > { %p3493_p3 = pnand %p3491_p0, %p5116_p7 }
 0x105   : > { %p3494_p11 = pneg %p3493_p3 }
 0x107   : > { %p3499_p10 = pnand %p3497_p6, %p3494_p11 }
 0x109   : > { %3502 = shalt.err (!%p3499_p10)
}
 0x10a   : > { %s3503_s8 = scalar_lea.vmem %s564_s13, 256  ;;  %p3511_p9 = scmp.lt.s32.totalorder %s564_s13, %s564_s13 }
 0x10b   : > { %p3504_p13 = scmp.ne.s32.totalorder %s564_s13, %s3503_s8  ;;  %p3512_p12 = scmp.lt.s32.totalorder %s3503_s8, %s3503_s8 }
 0x10d   : > { %p3506_p2 = pnand %p3504_p13, %p5116_p7  ;;  %p3513_p4 = por %p3512_p12, %p3511_p9 }
 0x10f   : > { %p3507_p8 = pneg %p3506_p2 }
 0x111   : > { %p3514_p1 = pnand %p3513_p4, %p3507_p8 }
 0x113   : > { %3517 = shalt.err (!%p3514_p1)
}
 0x114   : > { %3069 = dma.hbm_to_vmem [thread:$0]  (!%p5117_p5), %s5120_s11, 256, %s564_s13, [#allocation22], %s5119_s5, %s5119_s5, %s5118_s19  }
 0x115   : > { %s3877_s18 = smov [#allocation26]   ;;  %s3878_s0 = smov [#allocation27]  }
 0x116   : > { %s587_s6 = sshll.u32 %s3877_s18, 4  ;;  %s601_s3 = sshll.u32 %s3878_s0, 4  ;;  %s588_s6 = int_to_ptr.vmem [resolvable:$true] %s587_s6  ;;  %s602_s3 = int_to_ptr.vmem [resolvable:$true] %s601_s3 }
 0x117   : > { %s5121_s23 = sld [smem:[#allocation74_spill]] }
 0x11d   : > { %s3518_s8 = scalar_lea.hbm %s5121_s23, 256 }
 0x11e   : > { %p3519_p1 = scmp.ne.s32.totalorder %s5121_s23, %s3518_s8  ;;  %p3525_p11 = scmp.lt.u32.totalorder %s3518_s8, %s5121_s23 }
 0x120   : > { %p3521_p0 = pnand %p3519_p1, %p5116_p7 }
 0x122   : > { %p3522_p3 = pneg %p3521_p0 }
 0x124   : > { %p3527_p6 = pnand %p3525_p11, %p3522_p3 }
 0x126   : > { %3530 = shalt.err (!%p3527_p6)
}
 0x127   : > { %s3531_s13 = scalar_lea.vmem %s588_s6, 256  ;;  %p3539_p8 = scmp.lt.s32.totalorder %s588_s6, %s588_s6 }
 0x128   : > { %p3532_p10 = scmp.ne.s32.totalorder %s588_s6, %s3531_s13  ;;  %p3540_p9 = scmp.lt.s32.totalorder %s3531_s13, %s3531_s13 }
 0x12a   : > { %p3534_p13 = pnand %p3532_p10, %p5116_p7  ;;  %p3541_p12 = por %p3540_p9, %p3539_p8 }
 0x12c   : > { %p3535_p2 = pneg %p3534_p13 }
 0x12e   : > { %p3542_p4 = pnand %p3541_p12, %p3535_p2 }
 0x130   : > { %3545 = shalt.err (!%p3542_p4)
}
 0x131   : > { %3075 = dma.hbm_to_vmem [thread:$0]  (!%p5117_p5), %s5121_s23, 256, %s588_s6, [#allocation25], %s5119_s5, %s5119_s5, %s5118_s19  }
 0x132   : > { %s5122_s18 = sld [smem:[#allocation75_spill]] }
 0x138   : > { %s5123_s7 = smov %s5122_s18  ;;  %s3546_s0 = scalar_lea.hbm %s5122_s18, 16 }
 0x139   : > { %p3547_p1 = scmp.ne.s32.totalorder %s5123_s7, %s3546_s0  ;;  %p3553_p11 = scmp.lt.u32.totalorder %s3546_s0, %s5123_s7 }
 0x13b   : > { %p3549_p0 = pnand %p3547_p1, %p5116_p7 }
 0x13d   : > { %p3550_p3 = pneg %p3549_p0 }
 0x13f   : > { %p3555_p6 = pnand %p3553_p11, %p3550_p3 }
 0x141   : > { %3558 = shalt.err (!%p3555_p6)
}
 0x142   : > { %s3559_s25 = scalar_lea.vmem %s602_s3, 16  ;;  %s3566_s19 = scalar_lea.vmem %s602_s3, 32 }
 0x143   : > { %p3560_p10 = scmp.ne.s32.totalorder %s602_s3, %s3559_s25  ;;  %p3567_p8 = scmp.lt.s32.totalorder %s602_s3, %s602_s3 }
 0x144   : > { %p3568_p9 = scmp.lt.s32.totalorder %s3566_s19, %s3559_s25 }
 0x145   : > { %p3562_p13 = pnand %p3560_p10, %p5116_p7 }
 0x146   : > { %p3569_p12 = por %p3568_p9, %p3567_p8 }
 0x147   : > { %p3563_p2 = pneg %p3562_p13 }
 0x149   : > { %p3570_p4 = pnand %p3569_p12, %p3563_p2 }
 0x14b   : > { %3573 = shalt.err (!%p3570_p4)
}
 0x14c   : > { %3078 = dma.hbm_to_vmem [thread:$0]  (!%p5117_p5), %s5123_s7, 16, %s602_s3, [#allocation28]  }
 0x14d   : > { %s5124_s2 = sshll.u32 %s4275_s24, 7  ;;  %s5125_s17 = sld [smem:[#allocation60_spill]] }
 0x14e   : > { %s616_s30 = scalar_lea.vmem [#allocation9], %s4272_s14  ;;  %s654_s12 = sand.u32 1, %s3826_s26  }
 0x14f   : > { %s625_s0 = sshll.u32 %s616_s30, 4  ;;  %s4430_s8 = sshll.u32 %s654_s12, 3  ;;  %s4428_s0 = int_to_ptr.vmem [resolvable:$true] %s625_s0 }
 0x150   : > { %s5126_s27 = sand.u32 1, %s3838_s29   ;;  %p5127_p5 = scmp.ne.s32.totalorder %s5111_s16, 0 }
 0x151   : > { %s613_s13 = scalar_lea.sflag [#allocation10], %s5126_s27 }
 0x152   : > { %p5128_p1 = pneg %p5127_p5 }
 0x153   : > { %s4424_s18 = scalar_lea.hbm %s5125_s17, %s5124_s2  ;;  %s3579_s19 = scalar_lea.hbm %s5125_s17, 512 }
 0x154   : > { %s3574_s3 = scalar_lea.hbm %s4424_s18, 128  ;;  %p3580_p11 = scmp.lt.u32.totalorder %s4424_s18, %s5125_s17 }
 0x155   : > { %p3575_p7 = scmp.ne.s32.totalorder %s4424_s18, %s3574_s3  ;;  %p3581_p6 = scmp.lt.u32.totalorder %s3579_s19, %s3574_s3 }
 0x156   : > { %p3583_p13 = scmp.lt.u32.totalorder %s3574_s3, %s4424_s18 }
 0x157   : > { %p3577_p0 = pnand %p3575_p7, %p5128_p1  ;;  %p3582_p10 = por %p3581_p6, %p3580_p11 }
 0x159   : > { %p3578_p3 = pneg %p3577_p0  ;;  %p3584_p2 = por %p3583_p13, %p3582_p10 }
 0x15b   : > { %p3585_p8 = pnand %p3584_p2, %p3578_p3 }
 0x15d   : > { %3588 = shalt.err (!%p3585_p8)
}
 0x15e   : > { %s3589_s6 = scalar_lea.vmem %s4428_s0, 128  ;;  %p5129_p12 = pmov %p5128_p1 }
 0x15f   : > { %p3590_p9 = scmp.ne.s32.totalorder %s4428_s0, %s3589_s6  ;;  %s3879_s2 = smov [#allocation9]  }
 0x160   : > { %s3594_s15 = sshll.u32 %s3879_s2, 4  ;;  %s3595_s15 = int_to_ptr.vmem [resolvable:$false] %s3594_s15 }
 0x161   : > { %p3592_p4 = pnand %p3590_p9, %p5129_p12  ;;  %s3596_s10 = scalar_lea.vmem %s3595_s15, 256 }
 0x162   : > { %p3597_p1 = scmp.lt.s32.totalorder %s4428_s0, %s3595_s15  ;;  %p3598_p0 = scmp.lt.s32.totalorder %s3596_s10, %s3589_s6 }
 0x163   : > { %p3593_p7 = pneg %p3592_p4 }
 0x164   : > { %p3599_p11 = por %p3598_p0, %p3597_p1 }
 0x166   : > { %p3600_p6 = pnand %p3599_p11, %p3593_p7 }
 0x168   : > { %3603 = shalt.err (!%p3600_p6)
}
 0x169   : > { %3082 = dma.hbm_to_vmem [thread:$0]  (!%p5127_p5), %s4424_s18, 128, %s4428_s0, %s613_s13  }
 0x16a   : > { %s2736_s30 = sshll.u32 %s4298_s20, 7  ;;  %s5130_s3 = sld [smem:[#allocation62_spill]] }
 0x16b   : > { %s656_s16 = scalar_lea.vmem [#allocation14], %s4430_s8  ;;  %p5131_p10 = scmp.ne.s32.totalorder %s5114_s9, 0 }
 0x16c   : > { %s665_s25 = sshll.u32 %s656_s16, 4  ;;  %s666_s25 = int_to_ptr.vmem [resolvable:$true] %s665_s25 }
 0x16d   : > { %p3606_p13 = pneg %p5131_p10 }
 0x170   : > { %s4463_s24 = scalar_lea.hbm %s5130_s3, %s2736_s30  ;;  %s3609_s13 = scalar_lea.hbm %s5130_s3, 512 }
 0x171   : > { %s3604_s19 = scalar_lea.hbm %s4463_s24, 128  ;;  %p3610_p8 = scmp.lt.u32.totalorder %s4463_s24, %s5130_s3 }
 0x172   : > { %p3605_p3 = scmp.ne.s32.totalorder %s4463_s24, %s3604_s19  ;;  %p3611_p9 = scmp.lt.u32.totalorder %s3609_s13, %s3604_s19 }
 0x173   : > { %p3613_p4 = scmp.lt.u32.totalorder %s3604_s19, %s4463_s24 }
 0x174   : > { %p3607_p5 = pnand %p3606_p13, %p3605_p3  ;;  %p3612_p12 = por %p3611_p9, %p3610_p8 }
 0x176   : > { %p3608_p2 = pneg %p3607_p5  ;;  %p3614_p7 = por %p3613_p4, %p3612_p12 }
 0x178   : > { %p3615_p1 = pnand %p3614_p7, %p3608_p2 }
 0x17a   : > { %3618 = shalt.err (!%p3615_p1)
}
 0x17b   : > { %s3619_s6 = scalar_lea.vmem %s666_s25, 128  ;;  %s3880_s2 = smov [#allocation14]  }
 0x17c   : > { %p3620_p0 = scmp.ne.s32.totalorder %s666_s25, %s3619_s6  ;;  %s3624_s15 = sshll.u32 %s3880_s2, 4  ;;  %s3625_s15 = int_to_ptr.vmem [resolvable:$false] %s3624_s15 }
 0x17d   : > { %s3626_s10 = scalar_lea.vmem %s3625_s15, 256  ;;  %p3627_p3 = scmp.lt.s32.totalorder %s666_s25, %s3625_s15 }
 0x17e   : > { %p3622_p11 = pnand %p3620_p0, %p3606_p13  ;;  %p3628_p5 = scmp.lt.s32.totalorder %s3626_s10, %s3619_s6 }
 0x180   : > { %p3623_p6 = pneg %p3622_p11  ;;  %p3629_p8 = por %p3628_p5, %p3627_p3 }
 0x182   : > { %p3630_p9 = pnand %p3629_p8, %p3623_p6 }
 0x184   : > { %3633 = shalt.err (!%p3630_p9)
}
 0x185   : > { %3088 = dma.hbm_to_vmem [thread:$0]  (!%p5131_p10), %s4463_s24, 128, %s666_s25, %s4302_s1  }
 0x186   : > { %s5132_s16 = sld [smem:[#allocation63_spill]]  ;;  %s676_s18 = scalar_lea.vmem [#allocation15], %s4430_s8 }
 0x187   : > { %s685_s0 = sshll.u32 %s676_s18, 4  ;;  %s5133_s13 = sand.u32 1, %s3866_s21   ;;  %s686_s0 = int_to_ptr.vmem [resolvable:$true] %s685_s0 }
 0x188   : > { %s673_s5 = scalar_lea.sflag [#allocation16], %s5133_s13 }
 0x18c   : > { %s4493_s19 = scalar_lea.hbm %s5132_s16, %s2736_s30  ;;  %s3639_s30 = scalar_lea.hbm %s5132_s16, 512 }
 0x18d   : > { %s3634_s14 = scalar_lea.hbm %s4493_s19, 128  ;;  %p3640_p7 = scmp.lt.u32.totalorder %s4493_s19, %s5132_s16 }
 0x18e   : > { %p3635_p2 = scmp.ne.s32.totalorder %s4493_s19, %s3634_s14  ;;  %p3641_p1 = scmp.lt.u32.totalorder %s3639_s30, %s3634_s14 }
 0x18f   : > { %p3643_p11 = scmp.lt.u32.totalorder %s3634_s14, %s4493_s19 }
 0x190   : > { %p3637_p12 = pnand %p3635_p2, %p3606_p13  ;;  %p3642_p0 = por %p3641_p1, %p3640_p7 }
 0x192   : > { %p3638_p4 = pneg %p3637_p12  ;;  %p3644_p6 = por %p3643_p11, %p3642_p0 }
 0x194   : > { %p3645_p3 = pnand %p3644_p6, %p3638_p4 }
 0x196   : > { %3648 = shalt.err (!%p3645_p3)
}
 0x197   : > { %s3649_s8 = scalar_lea.vmem %s686_s0, 128  ;;  %s3881_s6 = smov [#allocation15]  }
 0x198   : > { %p3650_p5 = scmp.ne.s32.totalorder %s686_s0, %s3649_s8  ;;  %s3654_s2 = sshll.u32 %s3881_s6, 4  ;;  %s3655_s2 = int_to_ptr.vmem [resolvable:$false] %s3654_s2 }
 0x199   : > { %s3656_s15 = scalar_lea.vmem %s3655_s2, 256  ;;  %p3657_p2 = scmp.lt.s32.totalorder %s686_s0, %s3655_s2 }
 0x19a   : > { %p3652_p8 = pnand %p3650_p5, %p3606_p13  ;;  %p3658_p12 = scmp.lt.s32.totalorder %s3656_s15, %s3649_s8 }
 0x19c   : > { %p3653_p9 = pneg %p3652_p8  ;;  %p3659_p1 = por %p3658_p12, %p3657_p2 }
 0x19e   : > { %p3660_p7 = pnand %p3659_p1, %p3653_p9 }
 0x1a0   : > { %3663 = shalt.err (!%p3660_p7)
}
 0x1a1   : > { %3091 = dma.hbm_to_vmem [thread:$0]  (!%p5131_p10), %s4493_s19, 128, %s686_s0, %s673_s5  }
 0x1a2   : > { %s5134_s10 = sld [smem:[#allocation51_spill]] }
 0x1a8   : > { %p5135_p4 = scmp.ne.s32.totalorder %s5134_s10, 0 }
 0x1a9   : > { %s4520_s12 = sand.u32 (!%p5135_p4), 1, %s3834_s28   ;;  %p5136_p13 = scmp.ne.s32.totalorder (!%p5135_p4), %s5097_s4, 0 }
 0x1aa   : > { %694 = sbr.rel (%p5135_p4) target bundleno = 3976 (0xf88), region = 84  ;;  %s4523_s27 = sshll.u32 (!%p5135_p4), %s4520_s12, 3 }
 0x1ab   : > { %s697_s18 = scalar_lea.sflag (!%p5135_p4), [#allocation10], %s4520_s12  ;;  %s700_s13 = scalar_lea.vmem (!%p5135_p4), [#allocation9], %s4523_s27 }
 0x1b1   : > { %3773 = dma.done.wait (%p5136_p13), %s697_s18, 128  }
 0x1b2   : > { %3775 = vsyncadd (%p5136_p13), %s697_s18, 4294967168  ;;  %s705_s9 = sand.u32 1, %s4069_s22   ;;  %s709_s0 = scalar_lea.vmem [#allocation12], %s4523_s27 }
 0x1b3   : > { %s706_s19 = scalar_lea.sflag [#allocation13], %s705_s9 }
 0x1b4   : > { %3777 = dma.done.wait (%p5136_p13), %s706_s19, 128  }
 0x1b5   : > { %3779 = vsyncadd (%p5136_p13), %s706_s19, 4294967168  ;;  %s5137_s5 = sld [smem:[#allocation43_spill]]  ;;  %s5138_s14 = sld [smem:[#allocation55_spill]] }
 0x1bb   : > { %s716_s1 = sand.u32 1, %s5137_s5   ;;  %p5139_p10 = scmp.ne.s32.totalorder %s5138_s14, 0 }
 0x1bc   : > { %s4538_s20 = sshll.u32 %s716_s1, 3 }
 0x1bd   : > { %s718_s30 = scalar_lea.vmem [#allocation14], %s4538_s20 }
 0x1be   : > { %3781 = dma.done.wait (%p5139_p10), %s706_s19, 128  }
 0x1bf   : > { %3783 = vsyncadd (%p5139_p10), %s706_s19, 4294967168  ;;  %s724_s24 = scalar_lea.sflag [#allocation16], %s705_s9  ;;  %s727_s25 = scalar_lea.vmem [#allocation15], %s4538_s20 }
 0x1c0   : > { %3785 = dma.done.wait (%p5139_p10), %s724_s24, 128  }
 0x1c1   : > { %3787 = vsyncadd (%p5139_p10), %s724_s24, 4294967168  ;;  %p5140_p0 = scmp.eq.s32.totalorder %s4069_s22, 0 }
 0x1c3   : > { %3789 = dma.done.wait (%p5140_p0), [#allocation16], 256   ;;  %p5141_p11 = pmov %p5140_p0 }
 0x1c4   : > { %p5142_p6 = pmov %p5140_p0 }
 0x1c5   : > { %3791 = vsyncadd (%p5141_p11), [#allocation16], 4294967040 }
 0x1c6   : > { %3793 = dma.done.wait (%p5142_p6), [#allocation19], 272   ;;  %p5143_p3 = pmov %p5140_p0 }
 0x1c7   : > { %p5144_p5 = pmov %p5140_p0 }
 0x1c8   : > { %3795 = vsyncadd (%p5143_p3), [#allocation19], 4294967024 }
 0x1c9   : > { %3797 = dma.done.wait (%p5144_p5), [#allocation22], 272   ;;  %p5145_p8 = pmov %p5140_p0 }
 0x1ca   : > { %p5146_p9 = pmov %p5140_p0 }
 0x1cb   : > { %3799 = vsyncadd (%p5145_p8), [#allocation22], 4294967024 }
 0x1cc   : > { %3801 = dma.done.wait (%p5146_p9), [#allocation25], 272   ;;  %p5147_p2 = pmov %p5140_p0 }
 0x1cd   : > { %p5148_p12 = pmov %p5140_p0 }
 0x1ce   : > { %3803 = vsyncadd (%p5147_p2), [#allocation25], 4294967024 }
 0x1cf   : > { %3805 = dma.done.wait (%p5148_p12), [#allocation28], 16   ;;  %p5149_p1 = pmov %p5140_p0 }
 0x1d0   : > { %s822_s4 = scalar_lea.vmem [#allocation29], %s4523_s27  ;;  %s5057_s8 = scalar_lea.vmem [#allocation30], %s4523_s27 }
 0x1d1   : > { %3807 = vsyncadd (%p5149_p1), [#allocation28], 4294967280  ;;  %s5150_s6 = sld [smem:[#allocation45_spill]] }
 0x1d7   : > { %p2755_p7 = scmp.ne.s32.totalorder %s5150_s6, 0 }
 0x1d8   : > { %vm1011_vm0 = vcmask (!%p2755_p7), 31744   ;;  %s5151_s10 = sld [smem:[#allocation66_spill]] (!%p2755_p7)  ;;  %v3882_v1 = vmov (!%p2755_p7), 0.0   ;;  %v3883_v2 = vmov (!%p2755_p7), -inf   ;;  %s5152_s9 = sld [smem:[#allocation64_spill]] (!%p2755_p7)  ;;  %vm3884_vm1 = vmmov (!%p2755_p7), 0  }
 0x1d9   : > { %834 = sbr.rel (%p2755_p7) target bundleno = 828 (0x33c), region = 136  ;;  %2874 = vmatprep.subr.bf16.mxu1 (!%p2755_p7), %v3882_v1  ;;  %1012 = vst.msk [vmem:[#allocation5] sm:$0xff] (!%p2755_p7), %vm1011_vm0, %v3883_v2  ;;  %1013 = vst.msk [vmem:[#allocation6] sm:$0xff] (!%p2755_p7), %vm1011_vm0, %v3882_v1  ;;  %2866 = vmatprep.subr.bf16.mxu0 (!%p2755_p7), %v3882_v1  ;;  %vm862_vm2 = vcmask (!%p2755_p7), 261120   ;;  %v837_v6 = vld [vmem:[%s709_s0] sm:$0xff] (!%p2755_p7)  ;;  %v835_v7 = vld [vmem:[%s700_s13] sm:$0xff] (!%p2755_p7) }
 0x1da   : > { %2878 = vmatprep.mubr.msk.bf16.mxu1 (!%p2755_p7), %vm3884_vm1, %v3882_v1  ;;  %2870 = vmatprep.mubr.msk.bf16.mxu0 (!%p2755_p7), %vm3884_vm1, %v3882_v1  ;;  %1014 = vst.msk [vmem:[#allocation7] sm:$0xff] (!%p2755_p7), %vm862_vm2, %v3882_v1  ;;  %1015 = vst.msk [vmem:[#allocation8] sm:$0xff] (!%p2755_p7), %vm862_vm2, %v3882_v1  ;;  %v838_v8 = vpack.c.bf16 (!%p2755_p7), %v837_v6, %v837_v6  ;;  %v836_v9 = vpack.c.bf16 (!%p2755_p7), %v835_v7, %v835_v7  ;;  %s5153_s2 = sld [smem:[#allocation67_spill]] (!%p2755_p7)  ;;  %s5154_s18 = sld [smem:[#allocation65_spill]] (!%p2755_p7)  ;;  %vm972_vm3 = vcmask (!%p2755_p7), 64512   ;;  %vm978_vm4 = vcmask (!%p2755_p7), 130112  }
 0x1db   : > { %s3885_s19 = smov (!%p2755_p7), 16   ;;  %s3886_s5 = smov (!%p2755_p7), 8   ;;  %vm984_vm5 = vcmask (!%p2755_p7), 195712   ;;  %vm989_vm6 = vcmask (!%p2755_p7), 261312   ;;  %vm994_vm7 = vcmask (!%p2755_p7), 326912   ;;  %vm999_vm8 = vcmask (!%p2755_p7), 392512  }
 0x1dc   : > { %s3887_s14 = smov (!%p2755_p7), 24   ;;  %s3888_s1 = smov (!%p2755_p7), 32   ;;  %vm1004_vm9 = vcmask (!%p2755_p7), 458112   ;;  %vm1009_vm10 = vcmask (!%p2755_p7), 523712  }
 0x1de   : > { %v3260_v0 = vld [vmem:[%s5151_s10] sm:$0xff] (!%p2755_p7)   ;;  %v3262_v4 = vld [vmem:[%s5151_s10 + $0x8] sm:$0xff] (!%p2755_p7)  }
 0x1df   : > { %2875 = vmatpush3.bf16.msra.mxu1 (!%p2755_p7), %v3260_v0  ;;  %v3261_v3 = vld [vmem:[%s5152_s9] sm:$0xff] (!%p2755_p7)   ;;  %v3263_v5 = vld [vmem:[%s5152_s9 + $0x8] sm:$0xff] (!%p2755_p7)  }
 0x1e0   : > { %2876 = vmatprep.subr.bf16.mxu1 %v3882_v1  ;;  %2867 = vmatpush3.bf16.msra.mxu0 %v3261_v3  ;;  %v2760_v10 = vld [vmem:[%s5153_s2] ss:$0 sm:$0xff] }
 0x1e1   : > { %2868 = vmatprep.subr.bf16.mxu0 %v3882_v1  ;;  %v2756_v12 = vld [vmem:[%s5154_s18] ss:$0 sm:$0xff] }
 0x1e3   : > { %2877 = vmatpush3.bf16.msra.mxu1 %v3262_v4 }
 0x1e4   : > { %2869 = vmatpush3.bf16.msra.mxu0 %v3263_v5 }
 0x1e6   : > { %2879 = vmatmul.mubr.msk.bf16.vlgmr.msra.gmra.mrb[0].mxu1 %vm862_vm2, %v838_v8 }
 0x1e7   : > { %2871 = vmatmul.mubr.msk.bf16.vlgmr.msra.gmra.mrb[0].mxu0 %vm862_vm2, %v836_v9 }
 0x2b9   : > { %v966_v11 = vpop.f32.mrb[0].mxu1 }
 0x2ba   : > { %v967_v13 = vadd.f32 %v2760_v10, %v966_v11  ;;  %v2880_v14 = vpop.f32.mrb[1].mxu1  ;;  %v900_v15 = vpop.f32.mrb[0].mxu0 }
 0x2bb   : > { %v969_v16 = vpop.f32.mrb[2].mxu1  ;;  %v901_v17 = vadd.f32 %v2756_v12, %v900_v15  ;;  %v2872_v18 = vpop.f32.mrb[1].mxu0 }
 0x2bc   : > { %986 = vrot.lane.b32.xlu1 %v967_v13, %s3885_s19  ;;  %975 = vrot.lane.b32.xlu0 %v967_v13, %s3886_s5  ;;  %v2881_v19 = vpop.f32.mrb[3].mxu1  ;;  %v903_v20 = vpop.f32.mrb[2].mxu0 }
 0x2bd   : > { %v2873_v21 = vpop.f32.mrb[3].mxu0  ;;  %973 = vst.msk [vmem:[#allocation2] sm:$0xff] %vm972_vm3, %v901_v17 }
 0x2c0   : > { %991 = vrot.lane.b32.xlu1 %v901_v17, %s3885_s19  ;;  %981 = vrot.lane.b32.xlu0 %v901_v17, %s3886_s5 }
 0x2c4   : > { %1001 = vrot.lane.b32.xlu1 %v901_v17, %s3887_s14  ;;  %996 = vrot.lane.b32.xlu0 %v967_v13, %s3887_s14 }
 0x2c8   : > { %1006 = vrot.lane.b32.xlu0 %v967_v13, %s3888_s1 }
 0x32e   : > { %v987_v22 = vpop.permute.xlu1 %986  ;;  %v976_v23 = vpop.permute.xlu0 %975 }
 0x32f   : > { %979 = vst.msk [vmem:[#allocation2] sm:$0xff] %vm978_vm4, %v976_v23 }
 0x332   : > { %v992_v24 = vpop.permute.xlu1 %991  ;;  %v982_v25 = vpop.permute.xlu0 %981 }
 0x333   : > { %985 = vst.msk [vmem:[#allocation2] sm:$0xff] %vm984_vm5, %v982_v25 }
 0x334   : > { %990 = vst.msk [vmem:[#allocation2] sm:$0xff] %vm989_vm6, %v987_v22 }
 0x335   : > { %995 = vst.msk [vmem:[#allocation2] sm:$0xff] %vm994_vm7, %v992_v24 }
 0x336   : > { %v1002_v26 = vpop.permute.xlu1 %1001  ;;  %v997_v27 = vpop.permute.xlu0 %996 }
 0x337   : > { %1000 = vst.msk [vmem:[#allocation2] sm:$0xff] %vm999_vm8, %v997_v27 }
 0x338   : > { %1005 = vst.msk [vmem:[#allocation2] sm:$0xff] %vm1004_vm9, %v1002_v26 }
 0x33a   : > { %v1007_v28 = vpop.permute.xlu0 %1006 }
 0x33b   : > { %1010 = vst.msk [vmem:[#allocation2] sm:$0xff] %vm1009_vm10, %v1007_v28 }
 0x33c PF: > { %v3273_v29 = vld [vmem:[#allocation20] sm:$0xff]   ;;  %v3889_v30 = vmov 0.0   ;;  %v3274_v31 = vld [vmem:[#allocation17] sm:$0xff]   ;;  %vm3890_vm11 = vmmov 0   ;;  %v3276_v33 = vld [vmem:[#allocation17 + $0x8] sm:$0xff]   ;;  %vm1043_vm12 = vcmask 261120  }
 0x33d   : > { %2890 = vmatprep.subr.bf16.mxu1 %v3889_v30  ;;  %2882 = vmatprep.subr.bf16.mxu0 %v3889_v30  ;;  %v3275_v32 = vld [vmem:[#allocation20 + $0x8] sm:$0xff]   ;;  %v2768_v38 = vld [vmem:[#allocation21] ss:$0 sm:$0xff]  ;;  %v2764_v39 = vld [vmem:[#allocation18] ss:$0 sm:$0xff]  ;;  %vm1088_vm13 = vcmask 519168  }
 0x33e   : > { %2891 = vmatpush3.bf16.msra.mxu1 %v3273_v29  ;;  %2894 = vmatprep.mubr.msk.bf16.mxu1 %vm3890_vm11, %v3889_v30  ;;  %v1018_v34 = vld [vmem:[%s727_s25] sm:$0xff]  ;;  %v1016_v35 = vld [vmem:[%s718_s30] sm:$0xff]  ;;  %s3891_s20 = smov 8   ;;  %s3892_s30 = smov 96   ;;  %vm1168_vm14 = vcmask 64512   ;;  %vm1172_vm15 = vcmask 130048  }
 0x33f   : > { %2883 = vmatpush3.bf16.msra.mxu0 %v3274_v31  ;;  %2892 = vmatprep.subr.bf16.mxu1 %v3889_v30  ;;  %v1019_v36 = vpack.c.bf16 %v1018_v34, %v1018_v34  ;;  %v1017_v37 = vpack.c.bf16 %v1016_v35, %v1016_v35  ;;  %s3893_s25 = smov 120   ;;  %vm1317_vm0 = vcmask 1043456   ;;  %v3894_v28 = vmov 0   ;;  %v4657_v29 = vld [vmem:[#allocation5] sm:$0xff]  ;;  %s3895_s24 = smov 112  }
 0x340   : > { %2884 = vmatprep.subr.bf16.mxu0 %v3889_v30  ;;  %2886 = vmatprep.mubr.msk.bf16.mxu0 %vm3890_vm11, %v3889_v30  ;;  %vm1301_vm3 = vcmask 7168   ;;  %vm1559_vm6 = vcmask 15368   ;;  %s3897_s6 = smov 88   ;;  %s3899_s2 = smov 80   ;;  %vm1829_vm9 = vcmask 23568  }
 0x341   : > { %3264 = vset.pattern.permute.xlu1 %v3894_v28  ;;  %s3900_s15 = smov 104   ;;  %s3902_s22 = smov 16  }
 0x342   : > { %2893 = vmatpush3.bf16.msra.mxu1 %v3275_v32  ;;  %v1158_v1 = vld [vmem:[#allocation2] sm:$0xff]  ;;  %s3903_s18 = smov 72   ;;  %s3904_s19 = smov 24  }
 0x343   : > { %2885 = vmatpush3.bf16.msra.mxu0 %v3276_v33  ;;  %2904 = vmatprep.subr.bf16.mxu1 %v3889_v30  ;;  %v4640_v5 = vpack.c.bf16 %v1158_v1, %v1158_v1  ;;  %s5155_s5 = sld [smem:[#allocation45_spill]] }
 0x344   : > { %2898 = vmatprep.subr.bf16.mxu0 %v3889_v30 }
 0x345   : > { %2895 = vmatmul.mubr.msk.bf16.vlgmr.msra.gmra.mrb[0].mxu1 %vm1043_vm12, %v1019_v36 }
 0x346   : > { %2887 = vmatmul.mubr.msk.bf16.vlgmr.msra.gmra.mrb[0].mxu0 %vm1043_vm12, %v1017_v37  ;;  %2906 = vmatprep.mubr.msk.bf16.mxu1 %vm3890_vm11, %v3889_v30 }
 0x347   : > { %2900 = vmatprep.mubr.msk.bf16.mxu0 %vm3890_vm11, %v3889_v30 }
 0x349   : > { %p2799_p4 = scmp.ne.s32.totalorder %s5155_s5, 1 }
 0x418   : > { %v1150_v40 = vpop.f32.mrb[0].mxu1 }
 0x419   : > { %v1151_v41 = vadd.f32 %v2768_v38, %v1150_v40  ;;  %v2896_v42 = vpop.f32.mrb[1].mxu1  ;;  %v1081_v43 = vpop.f32.mrb[0].mxu0 }
 0x41a   : > { %v1153_v44 = vpop.f32.mrb[2].mxu1  ;;  %v1082_v45 = vadd.f32 %v2764_v39, %v1081_v43  ;;  %v2888_v46 = vpop.f32.mrb[1].mxu0 }
 0x41b   : > { %v1156_v47 = vpack.c.bf16 %v1151_v41, %v1151_v41  ;;  %v2897_v48 = vpop.f32.mrb[3].mxu1  ;;  %v1084_v49 = vpop.f32.mrb[2].mxu0 }
 0x41c   : > { %v1087_v50 = vpack.c.bf16 %v1082_v45, %v1082_v45  ;;  %v2889_v51 = vpop.f32.mrb[3].mxu0 }
 0x41d   : > { %1157 = vst.msk [vmem:[#allocation4] sm:$0xf] %vm1088_vm13, %v1156_v47 }
 0x41e   : > { %1089 = vst.msk [vmem:[#allocation3] sm:$0xf] %vm1088_vm13, %v1087_v50  ;;  %vm2099_vm13 = vcmask 31768  }
 0x424   : > { %v1161_v52 = vld [vmem:[#allocation4] sm:$0xf] }
 0x425   : > { %v1162_v53 = vsub.bf16 0, %v1161_v52  ;;  %v1160_v54 = vld [vmem:[#allocation3] sm:$0xf]  ;;  %v2777_v57 = vcombine.low %v1161_v52, %v1161_v52  ;;  %v4625_v60 = vld [vmem:[#allocation4] sm:$0xf] }
 0x426   : > { %v2774_v56 = vcombine.low %v1160_v54, %v1160_v54  ;;  %v4618_v58 = vld [vmem:[#allocation3] sm:$0xf]  ;;  %v4631_v61 = vcombine.low %v4625_v60, %v4625_v60  ;;  %v1419_v39 = vsub.bf16 0, %v4625_v60 }
 0x427   : > { %v2772_v55 = vcombine.low %v1162_v53, %v1162_v53  ;;  %v4623_v59 = vcombine.low %v4618_v58, %v4618_v58 }
 0x429   : > { %1166 = vrot.lane.b32.xlu0 %v2772_v55, %s3891_s20 }
 0x42d   : > { %1221 = vrot.lane.b32.xlu0 %v2774_v56, %s3891_s20 }
 0x431   : > { %1312 = vrot.lane.b32.xlu0 %v2774_v56, %s3892_s30 }
 0x435   : > { %1368 = vrot.lane.b32.xlu0 %v2777_v57, %s3892_s30 }
 0x439   : > { %1423 = vrot.lane.b32.xlu0 %v4623_v59, %s3893_s25 }
 0x43d   : > { %1479 = vrot.lane.b32.xlu0 %v4631_v61, %s3893_s25 }
 0x49b   : > { %v1167_v62 = vpop.permute.xlu0 %1166 }
 0x49c   : > { %v1171_v63 = vsel %vm1168_vm14, %v1160_v54, %v1167_v62 }
 0x49d   : > { %v1176_v0 = vsel %vm1172_vm15, %v1171_v63, 0 }
 0x49e   : > { %2899 = vmatpush3.bf16.xpose.msra.mxu0 %v1176_v0 }
 0x49f   : > { %v1222_v2 = vpop.permute.xlu0 %1221  ;;  %2910 = vmatprep.subr.bf16.mxu0 %v3889_v30 }
 0x4a0   : > { %v1225_v3 = vsel %vm1168_vm14, %v1161_v52, %v1222_v2 }
 0x4a1   : > { %v1226_v4 = vsel %vm1172_vm15, %v1225_v3, 0 }
 0x4a2   : > { %2905 = vmatpush3.bf16.xpose.msra.mxu1 %v1226_v4 }
 0x4a3   : > { %v1313_v6 = vpop.permute.xlu0 %1312  ;;  %2916 = vmatprep.subr.bf16.mxu1 %v3889_v30 }
 0x4a4   : > { %v1319_v7 = vsel %vm1317_vm0, %v1313_v6, 0 }
 0x4a5   : > { %2901 = vmatmul.mubr.msk.bf16.vlgmr.msra.gmra.mrb[4].mxu0 %vm1172_vm15, %v4640_v5 }
 0x4a6   : > { %2911 = vmatpush3.bf16.msra.mxu0 %v1319_v7  ;;  %2912 = vmatprep.mubr.msk.bf16.mxu0 %vm3890_vm11, %v3889_v30 }
 0x4a7   : > { %v1369_v8 = vpop.permute.xlu0 %1368  ;;  %2922 = vmatprep.subr.bf16.mxu0 %v3889_v30 }
 0x4a8   : > { %v1371_v9 = vsel %vm1317_vm0, %v1369_v8, 0 }
 0x4a9   : > { %2907 = vmatmul.mubr.msk.bf16.vlgmr.msra.gmra.mrb[4].mxu1 %vm1172_vm15, %v4640_v5 }
 0x4aa   : > { %2917 = vmatpush3.bf16.msra.mxu1 %v1371_v9  ;;  %2918 = vmatprep.mubr.msk.bf16.mxu1 %vm3890_vm11, %v3889_v30 }
 0x4ab   : > { %2928 = vmatprep.subr.bf16.mxu1 %v3889_v30  ;;  %v1424_v37 = vpop.permute.xlu0 %1423 }
 0x4ac   : > { %v1427_v41 = vsel %vm1168_vm14, %v1424_v37, %v1419_v39 }
 0x4ad   : > { %v1434_v44 = vsel %vm1172_vm15, %v1427_v41, 0 }
 0x4af   : > { %v1480_v38 = vpop.permute.xlu0 %1479 }
 0x4b0   : > { %v1483_v42 = vsel %vm1168_vm14, %v1480_v38, %v4618_v58 }
 0x4b1   : > { %v1484_v45 = vsel %vm1172_vm15, %v1483_v42, 0 }
 0x578   : > { %v1212_v10 = vpop.f32.mrb[4].mxu0 }
 0x579   : > { %v2902_v11 = vpop.f32.mrb[5].mxu0  ;;  %v1268_v13 = vmul.f32 %v1212_v10, %v1212_v10 }
 0x57a   : > { %v1215_v12 = vpop.f32.mrb[6].mxu0 }
 0x57b   : > { %v2903_v14 = vpop.f32.mrb[7].mxu0  ;;  %v3896_v12 = vmov 1  }
 0x57c   : > { %v1262_v15 = vpop.f32.mrb[4].mxu1 }
 0x57d   : > { %v1269_v16 = vmul.f32 %v1262_v15, %v1262_v15  ;;  %v2908_v17 = vpop.f32.mrb[5].mxu1 }
 0x57e   : > { %v1265_v18 = vpop.f32.mrb[6].mxu1  ;;  %v1681_v17 = vld [vmem:[#allocation4] sm:$0xf] }
 0x57f   : > { %v1270_v19 = vadd.f32 %v1269_v16, %v1268_v13  ;;  %v2909_v20 = vpop.f32.mrb[7].mxu1  ;;  %v4711_v18 = vld [vmem:[#allocation3] ss:$0 sps:$4 sm:$0xff]  }
 0x581   : > { %3285 = vrsqrt.f32 %v1270_v19  ;;  %vm1273_vm1 = vcmp.eq.f32.partialorder %v1270_v19, inf  ;;  %v1276_v23 = vand.u32 2147483648, %v1270_v19  ;;  %vm1275_vm2 = vcmp.eq.f32.partialorder %v1270_v19, 0.0 }
 0x58b   : > { %v3286_v21 = vpop.eup %3285 }
 0x58c   : > { %v1272_v22 = vmul.f32 %v3286_v21, %v1270_v19  ;;  %v4716_v21 = vcombine.low %v1681_v17, %v1681_v17 }
 0x58e   : > { %v1274_v24 = vsel %vm1273_vm1, %v1270_v19, %v1272_v22  ;;  %v1682_v19 = vsub.bf16 0, %v1681_v17  ;;  %vm2163_vm1 = vcmask 261312  }
 0x58f   : > { %v1277_v25 = vsel %vm1275_vm2, %v1276_v23, %v1274_v24  ;;  %vm3910_vm2 = vmmov (!%p2799_p4), 0  }
 0x590   : > { %v1278_v26 = vmul.f32 0.35355338, %v1277_v25  ;;  %v2786_v20 = vcombine.low %v1682_v19, %v1682_v19 }
 0x592   : > { %v1280_v27 = vsel %vm1168_vm14, %v1278_v26, -inf }
 0x593   : > { %1281 = vmax.xlane.f32.xlu1 %v1280_v27 }
 0x620   : > { %v1282_v31 = vpop.xlane.xlu1 %1281 }
 0x621   : > { %v4660_v32 = vmax.f32 %v4657_v29, %v1282_v31 }
 0x623   : > { %v1284_v33 = vsub.f32 %v4657_v29, %v4660_v32  ;;  %1303 = vst.msk [vmem:[#allocation5] sm:$0xff] %vm1301_vm3, %v4660_v32  ;;  %1289 = vperm.xlu1 %3264, %v4660_v32  }
 0x627   : > { %1429 = vrot.lane.b32.xlu1 %v4640_v5, %s3895_s24 }
 0x628   : > { %3265 = vset.pattern.permute.xlu1 %v3896_v12 }
 0x62a   : > { %v4699_v13 = vld [vmem:[#allocation5] sm:$0xff] }
 0x6a2   : > { %v1290_v34 = vpop.permute.xlu1 %1289 }
 0x6a3   : > { %v1292_v35 = vsub.f32 %v1278_v26, %v1290_v34 }
 0x6a5   : > { %v1293_v36 = vmul.f32 1.442695, %v1292_v35 }
 0x6a6   : > { %v1430_v46 = vpop.permute.xlu1 %1429 }
 0x6a7   : > { %3287 = vpow2.f32 %v1293_v36 }
 0x6b1   : > { %v4670_v40 = vpop.eup %3287 }
 0x6b2   : > { %v1304_v43 = vpack.c.bf16 %v4670_v40, %v4670_v40 }
 0x6b4   : > { %2913 = vmatmul.mubr.msk.bf16.vlgmr.msra.gmra.mrb[8].mxu0 %vm1168_vm14, %v1304_v43  ;;  %2919 = vmatmul.mubr.msk.bf16.vlgmr.msra.gmra.mrb[8].mxu1 %vm1168_vm14, %v1304_v43 }
 0x6b5   : > { %2923 = vmatpush3.bf16.xpose.msra.mxu0 %v1434_v44  ;;  %2929 = vmatpush3.bf16.xpose.msra.mxu1 %v1484_v45 }
 0x6b6   : > { %2924 = vmatprep.mubr.msk.bf16.mxu0 %vm3890_vm11, %v3889_v30  ;;  %2930 = vmatprep.mubr.msk.bf16.mxu1 %vm3890_vm11, %v3889_v30 }
 0x6b7   : > { %2934 = vmatprep.subr.bf16.mxu0 %v3889_v30  ;;  %2940 = vmatprep.subr.bf16.mxu1 %v3889_v30 }
 0x6bc   : > { %2925 = vmatmul.mubr.msk.bf16.vlgmr.msra.gmra.mrb[12].mxu0 %vm1172_vm15, %v1430_v46  ;;  %2931 = vmatmul.mubr.msk.bf16.vlgmr.msra.gmra.mrb[12].mxu1 %vm1172_vm15, %v1430_v46 }
 0x6bd   : > { %2936 = vmatprep.mubr.msk.bf16.mxu0 %vm3890_vm11, %v3889_v30  ;;  %2942 = vmatprep.mubr.msk.bf16.mxu1 %vm3890_vm11, %v3889_v30 }
 0x787   : > { %v4693_v47 = vpop.f32.mrb[8].mxu0  ;;  %v4695_v48 = vpop.f32.mrb[8].mxu1 }
 0x788   : > { %v2914_v49 = vpop.f32.mrb[9].mxu0  ;;  %v2920_v50 = vpop.f32.mrb[9].mxu1 }
 0x789   : > { %v1358_v51 = vpop.f32.mrb[10].mxu0  ;;  %v1410_v52 = vpop.f32.mrb[10].mxu1 }
 0x78a   : > { %v2915_v53 = vpop.f32.mrb[11].mxu0  ;;  %v2921_v54 = vpop.f32.mrb[11].mxu1 }
 0x78f   : > { %v1470_v55 = vpop.f32.mrb[12].mxu0  ;;  %v1520_v56 = vpop.f32.mrb[12].mxu1 }
 0x790   : > { %v1526_v57 = vmul.f32 %v1470_v55, %v1470_v55  ;;  %v1527_v58 = vmul.f32 %v1520_v56, %v1520_v56  ;;  %v2926_v60 = vpop.f32.mrb[13].mxu0  ;;  %v2932_v62 = vpop.f32.mrb[13].mxu1 }
 0x791   : > { %v1473_v63 = vpop.f32.mrb[14].mxu0  ;;  %v1523_v0 = vpop.f32.mrb[14].mxu1 }
 0x792   : > { %v1528_v1 = vadd.f32 %v1527_v58, %v1526_v57  ;;  %v2927_v2 = vpop.f32.mrb[15].mxu0  ;;  %v2933_v3 = vpop.f32.mrb[15].mxu1 }
 0x794   : > { %3289 = vrsqrt.f32 %v1528_v1  ;;  %vm1531_vm4 = vcmp.eq.f32.partialorder %v1528_v1, inf  ;;  %v1534_v7 = vand.u32 2147483648, %v1528_v1  ;;  %vm1533_vm5 = vcmp.eq.f32.partialorder %v1528_v1, 0.0 }
 0x79e   : > { %v3290_v4 = vpop.eup %3289 }
 0x79f   : > { %v1530_v6 = vmul.f32 %v3290_v4, %v1528_v1 }
 0x7a1   : > { %v1532_v8 = vsel %vm1531_vm4, %v1528_v1, %v1530_v6 }
 0x7a2   : > { %v1535_v9 = vsel %vm1533_vm5, %v1534_v7, %v1532_v8 }
 0x7a3   : > { %v1536_v10 = vmul.f32 0.35355338, %v1535_v9 }
 0x7a5   : > { %v1538_v11 = vsel %vm1168_vm14, %v1536_v10, -inf }
 0x7a6   : > { %1539 = vmax.xlane.f32.xlu0 %v1538_v11  ;;  %v3898_v11 = vmov 2  }
 0x833   : > { %v1540_v14 = vpop.xlane.xlu0 %1539 }
 0x834   : > { %v4702_v15 = vmax.f32 %v4699_v13, %v1540_v14 }
 0x836   : > { %v1542_v16 = vsub.f32 %v4699_v13, %v4702_v15  ;;  %1561 = vst.msk [vmem:[#allocation5] sm:$0xff] %vm1559_vm6, %v4702_v15  ;;  %1547 = vperm.xlu1 %3265, %v4702_v15   ;;  %v1305_v15 = vld [vmem:[#allocation7] sm:$0xff] }
 0x83a   : > { %1570 = vrot.lane.b32.xlu1 %v4623_v59, %s3897_s6 }
 0x83b   : > { %3266 = vset.pattern.permute.xlu1 %v3898_v11 }
 0x83d   : > { %v4758_v14 = vld [vmem:[#allocation5] sm:$0xff] }
 0x83e   : > { %1627 = vrot.lane.b32.xlu1 %v4631_v61, %s3897_s6 }
 0x842   : > { %1686 = vrot.lane.b32.xlu1 %v4711_v18, %s3895_s24 }
 0x846   : > { %1691 = vrot.lane.b32.xlu1 %v2786_v20, %s3893_s25 }
 0x84a   : > { %1747 = vrot.lane.b32.xlu1 %v4716_v21, %s3895_s24 }
 0x84e   : > { %1749 = vrot.lane.b32.xlu1 %v4711_v18, %s3893_s25 }
 0x852   : > { %1697 = vrot.lane.b32.xlu1 %v4640_v5, %s3892_s30 }
 0x8b5   : > { %v1548_v59 = vpop.permute.xlu1 %1547 }
 0x8b6   : > { %v1550_v61 = vsub.f32 %v1536_v10, %v1548_v59 }
 0x8b8   : > { %v1551_v22 = vmul.f32 1.442695, %v1550_v61  ;;  %v4772_v61 = vld [vmem:[#allocation3] ss:$0 sps:$4 sm:$0xff]  }
 0x8b9   : > { %v1571_v23 = vpop.permute.xlu1 %1570 }
 0x8ba   : > { %3291 = vpow2.f32 %v1551_v22  ;;  %v1576_v24 = vsel %vm1317_vm0, %v1571_v23, 0 }
 0x8bb   : > { %2935 = vmatpush3.bf16.msra.mxu0 %v1576_v24 }
 0x8bc   : > { %2946 = vmatprep.subr.bf16.mxu0 %v3889_v30 }
 0x8bd   : > { %v1628_v25 = vpop.permute.xlu1 %1627 }
 0x8be   : > { %v1630_v26 = vsel %vm1317_vm0, %v1628_v25, 0 }
 0x8bf   : > { %2941 = vmatpush3.bf16.msra.mxu1 %v1630_v26 }
 0x8c0   : > { %2952 = vmatprep.subr.bf16.mxu1 %v3889_v30 }
 0x8c1   : > { %v1687_v27 = vpop.permute.xlu1 %1686 }
 0x8c4   : > { %v4728_v31 = vpop.eup %3291 }
 0x8c5   : > { %v1692_v34 = vpop.permute.xlu1 %1691  ;;  %v1562_v35 = vpack.c.bf16 %v4728_v31, %v4728_v31 }
 0x8c6   : > { %v1695_v36 = vsel %vm1168_vm14, %v1687_v27, %v1692_v34 }
 0x8c7   : > { %v1702_v37 = vsel %vm1172_vm15, %v1695_v36, 0  ;;  %2937 = vmatmul.mubr.msk.bf16.vlgmr.msra.gmra.mrb[16].mxu0 %vm1168_vm14, %v1562_v35  ;;  %2943 = vmatmul.mubr.msk.bf16.vlgmr.msra.gmra.mrb[16].mxu1 %vm1168_vm14, %v1562_v35 }
 0x8c8   : > { %2947 = vmatpush3.bf16.xpose.msra.mxu0 %v1702_v37  ;;  %2948 = vmatprep.mubr.msk.bf16.mxu0 %vm3890_vm11, %v3889_v30 }
 0x8c9   : > { %v1748_v38 = vpop.permute.xlu1 %1747  ;;  %2954 = vmatprep.mubr.msk.bf16.mxu1 %vm3890_vm11, %v3889_v30  ;;  %2958 = vmatprep.subr.bf16.mxu0 %v3889_v30 }
 0x8cd   : > { %v1750_v39 = vpop.permute.xlu1 %1749 }
 0x8ce   : > { %v1753_v41 = vsel %vm1168_vm14, %v1748_v38, %v1750_v39 }
 0x8cf   : > { %v1754_v42 = vsel %vm1172_vm15, %v1753_v41, 0 }
 0x8d0   : > { %2953 = vmatpush3.bf16.xpose.msra.mxu1 %v1754_v42 }
 0x8d1   : > { %v1698_v43 = vpop.permute.xlu1 %1697  ;;  %2964 = vmatprep.subr.bf16.mxu1 %v3889_v30 }
 0x8d2   : > { %2949 = vmatmul.mubr.msk.bf16.vlgmr.msra.gmra.mrb[20].mxu0 %vm1172_vm15, %v1698_v43 }
 0x8d3   : > { %2960 = vmatprep.mubr.msk.bf16.mxu0 %vm3890_vm11, %v3889_v30 }
 0x8d7   : > { %2955 = vmatmul.mubr.msk.bf16.vlgmr.msra.gmra.mrb[20].mxu1 %vm1172_vm15, %v1698_v43 }
 0x8d8   : > { %2966 = vmatprep.mubr.msk.bf16.mxu1 %vm3890_vm11, %v3889_v30 }
 0x99a   : > { %v4750_v44 = vpop.f32.mrb[16].mxu0  ;;  %v4752_v45 = vpop.f32.mrb[16].mxu1 }
 0x99b   : > { %v2938_v46 = vpop.f32.mrb[17].mxu0  ;;  %v2944_v49 = vpop.f32.mrb[17].mxu1 }
 0x99c   : > { %v1615_v50 = vpop.f32.mrb[18].mxu0  ;;  %v1669_v51 = vpop.f32.mrb[18].mxu1 }
 0x99d   : > { %v2939_v52 = vpop.f32.mrb[19].mxu0  ;;  %v2945_v53 = vpop.f32.mrb[19].mxu1 }
 0x9a5   : > { %v1738_v54 = vpop.f32.mrb[20].mxu0 }
 0x9a6   : > { %v2950_v55 = vpop.f32.mrb[21].mxu0  ;;  %v1796_v58 = vmul.f32 %v1738_v54, %v1738_v54 }
 0x9a7   : > { %v1741_v56 = vpop.f32.mrb[22].mxu0 }
 0x9a8   : > { %v2951_v57 = vpop.f32.mrb[23].mxu0 }
 0x9aa   : > { %v1790_v60 = vpop.f32.mrb[20].mxu1 }
 0x9ab   : > { %v1797_v62 = vmul.f32 %v1790_v60, %v1790_v60  ;;  %v2956_v63 = vpop.f32.mrb[21].mxu1 }
 0x9ac   : > { %v1793_v0 = vpop.f32.mrb[22].mxu1 }
 0x9ad   : > { %v1798_v1 = vadd.f32 %v1797_v62, %v1796_v58  ;;  %v2957_v2 = vpop.f32.mrb[23].mxu1 }
 0x9af   : > { %3293 = vrsqrt.f32 %v1798_v1  ;;  %vm1801_vm7 = vcmp.eq.f32.partialorder %v1798_v1, inf  ;;  %v1804_v6 = vand.u32 2147483648, %v1798_v1  ;;  %vm1803_vm8 = vcmp.eq.f32.partialorder %v1798_v1, 0.0 }
 0x9b9   : > { %v3294_v3 = vpop.eup %3293 }
 0x9ba   : > { %v1800_v4 = vmul.f32 %v3294_v3, %v1798_v1 }
 0x9bc   : > { %v1802_v7 = vsel %vm1801_vm7, %v1798_v1, %v1800_v4 }
 0x9bd   : > { %v1805_v8 = vsel %vm1803_vm8, %v1804_v6, %v1802_v7 }
 0x9be   : > { %v1806_v9 = vmul.f32 0.35355338, %v1805_v8 }
 0x9c0   : > { %v1808_v10 = vsel %vm1168_vm14, %v1806_v9, -inf }
 0x9c1   : > { %1809 = vmax.xlane.f32.xlu0 %v1808_v10 }
 0x9d7   : > { %1840 = vrot.lane.b32.xlu0 %v4711_v18, %s3899_s2 }
 0x9db   : > { %1967 = vrot.lane.b32.xlu0 %v4640_v5, %s3899_s2  ;;  %v1951_v5 = vld [vmem:[#allocation4] sm:$0xf] }
 0x9dc   : > { %v1952_v22 = vsub.bf16 0, %v1951_v5  ;;  %v4776_v24 = vcombine.low %v1951_v5, %v1951_v5  ;;  %v1285_v5 = vmul.f32 1.442695, %v1284_v33 }
 0x9de   : > { %v2793_v23 = vcombine.low %v1952_v22, %v1952_v22  ;;  %v1543_v22 = vmul.f32 1.442695, %v1542_v16  ;;  %v1363_v16 = vld [vmem:[#allocation8] sm:$0xff] }
 0xa4e   : > { %v1810_v17 = vpop.xlane.xlu0 %1809 }
 0xa4f   : > { %v4761_v19 = vmax.f32 %v4758_v14, %v1810_v17 }
 0xa51   : > { %v1812_v20 = vsub.f32 %v4758_v14, %v4761_v19  ;;  %1831 = vst.msk [vmem:[#allocation5] sm:$0xff] %vm1829_vm9, %v4761_v19  ;;  %1817 = vperm.xlu1 %3266, %v4761_v19  }
 0xa52   : > { %v1841_v59 = vpop.permute.xlu0 %1840 }
 0xa53   : > { %v1846_v18 = vsel %vm1317_vm0, %v1841_v59, 0 }
 0xa54   : > { %2959 = vmatpush3.bf16.msra.mxu0 %v1846_v18 }
 0xa55   : > { %1897 = vrot.lane.b32.xlu1 %v4716_v21, %s3899_s2  ;;  %2970 = vmatprep.subr.bf16.mxu0 %v3889_v30 }
 0xa56   : > { %3268 = vset.pattern.permute.xlu1 %v3894_v28  ;;  %v1968_v49 = vpop.permute.xlu0 %1967 }
 0xa58   : > { %v2077_v32 = vld [vmem:[#allocation5] sm:$0xff] }
 0xa59   : > { %1956 = vrot.lane.b32.xlu1 %v4772_v61, %s3900_s15 }
 0xa5d   : > { %1961 = vrot.lane.b32.xlu1 %v2793_v23, %s3895_s24 }
 0xa61   : > { %2017 = vrot.lane.b32.xlu1 %v4776_v24, %s3900_s15 }
 0xa65   : > { %2019 = vrot.lane.b32.xlu1 %v4772_v61, %s3895_s24 }
 0xad0   : > { %v1818_v21 = vpop.permute.xlu1 %1817 }
 0xad1   : > { %v1820_v25 = vsub.f32 %v1806_v9, %v1818_v21  ;;  %v3901_v21 = vmov 3  }
 0xad2   : > { %3267 = vset.pattern.permute.xlu0 %v3901_v21 }
 0xad3   : > { %v1821_v26 = vmul.f32 1.442695, %v1820_v25 }
 0xad4   : > { %v1898_v28 = vpop.permute.xlu1 %1897 }
 0xad5   : > { %3295 = vpow2.f32 %v1821_v26  ;;  %v1900_v27 = vsel %vm1317_vm0, %v1898_v28, 0 }
 0xad6   : > { %2965 = vmatpush3.bf16.msra.mxu1 %v1900_v27 }
 0xad7   : > { %2976 = vmatprep.subr.bf16.mxu1 %v3889_v30 }
 0xad8   : > { %v1957_v34 = vpop.permute.xlu1 %1956 }
 0xadc   : > { %v1962_v35 = vpop.permute.xlu1 %1961 }
 0xadd   : > { %v1965_v37 = vsel %vm1168_vm14, %v1957_v34, %v1962_v35 }
 0xade   : > { %v1972_v41 = vsel %vm1172_vm15, %v1965_v37, 0 }
 0xadf   : > { %v4783_v36 = vpop.eup %3295 }
 0xae0   : > { %v2018_v38 = vpop.permute.xlu1 %2017  ;;  %v1832_v39 = vpack.c.bf16 %v4783_v36, %v4783_v36  ;;  %v1825_v29 = vsel %vm1168_vm14, %v4783_v36, 0.0 }
 0xae2   : > { %2961 = vmatmul.mubr.msk.bf16.vlgmr.msra.gmra.mrb[24].mxu0 %vm1168_vm14, %v1832_v39  ;;  %2967 = vmatmul.mubr.msk.bf16.vlgmr.msra.gmra.mrb[24].mxu1 %vm1168_vm14, %v1832_v39 }
 0xae3   : > { %2971 = vmatpush3.bf16.xpose.msra.mxu0 %v1972_v41  ;;  %2972 = vmatprep.mubr.msk.bf16.mxu0 %vm3890_vm11, %v3889_v30 }
 0xae4   : > { %v2020_v42 = vpop.permute.xlu1 %2019  ;;  %2978 = vmatprep.mubr.msk.bf16.mxu1 %vm3890_vm11, %v3889_v30  ;;  %2982 = vmatprep.subr.bf16.mxu0 %v3889_v30 }
 0xae5   : > { %v2023_v43 = vsel %vm1168_vm14, %v2018_v38, %v2020_v42 }
 0xae6   : > { %v2024_v46 = vsel %vm1172_vm15, %v2023_v43, 0 }
 0xae7   : > { %2977 = vmatpush3.bf16.xpose.msra.mxu1 %v2024_v46 }
 0xae8   : > { %2988 = vmatprep.subr.bf16.mxu1 %v3889_v30 }
 0xaea   : > { %2973 = vmatmul.mubr.msk.bf16.vlgmr.msra.gmra.mrb[28].mxu0 %vm1172_vm15, %v1968_v49 }
 0xaeb   : > { %2984 = vmatprep.mubr.msk.bf16.mxu0 %vm3890_vm11, %v3889_v30 }
 0xaee   : > { %2979 = vmatmul.mubr.msk.bf16.vlgmr.msra.gmra.mrb[28].mxu1 %vm1172_vm15, %v1968_v49  ;;  %vm1623_vm15 = vcmask 130112  }
 0xaef   : > { %2990 = vmatprep.mubr.msk.bf16.mxu1 %vm3890_vm11, %v3889_v30 }
 0xbb5   : > { %v1882_v50 = vpop.f32.mrb[24].mxu0  ;;  %v1936_v51 = vpop.f32.mrb[24].mxu1 }
 0xbb6   : > { %v2962_v52 = vpop.f32.mrb[25].mxu0  ;;  %v2968_v53 = vpop.f32.mrb[25].mxu1 }
 0xbb7   : > { %v1885_v54 = vpop.f32.mrb[26].mxu0  ;;  %v1939_v55 = vpop.f32.mrb[26].mxu1 }
 0xbb8   : > { %v2963_v56 = vpop.f32.mrb[27].mxu0  ;;  %v2969_v57 = vpop.f32.mrb[27].mxu1 }
 0xbbd   : > { %v2008_v58 = vpop.f32.mrb[28].mxu0 }
 0xbbe   : > { %v2974_v60 = vpop.f32.mrb[29].mxu0  ;;  %v2066_v63 = vmul.f32 %v2008_v58, %v2008_v58 }
 0xbbf   : > { %v2011_v62 = vpop.f32.mrb[30].mxu0 }
 0xbc0   : > { %v2975_v0 = vpop.f32.mrb[31].mxu0 }
 0xbc1   : > { %v2060_v1 = vpop.f32.mrb[28].mxu1 }
 0xbc2   : > { %v2067_v2 = vmul.f32 %v2060_v1, %v2060_v1  ;;  %v2980_v3 = vpop.f32.mrb[29].mxu1 }
 0xbc3   : > { %v2063_v4 = vpop.f32.mrb[30].mxu1 }
 0xbc4   : > { %v2068_v6 = vadd.f32 %v2067_v2, %v2066_v63  ;;  %v2981_v7 = vpop.f32.mrb[31].mxu1 }
 0xbc6   : > { %3297 = vrsqrt.f32 %v2068_v6  ;;  %vm2071_vm10 = vcmp.eq.f32.partialorder %v2068_v6, inf  ;;  %v2074_v9 = vand.u32 2147483648, %v2068_v6  ;;  %vm2073_vm11 = vcmp.eq.f32.partialorder %v2068_v6, 0.0 }
 0xbc7   : > { %3299 = vpow2.f32 %v1285_v5 }
 0xbc8   : > { %3301 = vpow2.f32 %v1543_v22 }
 0xbd0   : > { %v3298_v30 = vpop.eup %3297 }
 0xbd1   : > { %v2070_v8 = vmul.f32 %v3298_v30, %v2068_v6  ;;  %v4812_v23 = vpop.eup %3299 }
 0xbd2   : > { %v4815_v25 = vpop.eup %3301 }
 0xbd3   : > { %v2072_v10 = vsel %vm2071_vm10, %v2068_v6, %v2070_v8 }
 0xbd4   : > { %v2075_v17 = vsel %vm2073_vm11, %v2074_v9, %v2072_v10 }
 0xbd5   : > { %v2076_v59 = vmul.f32 0.35355338, %v2075_v17 }
 0xbd7   : > { %v2078_v18 = vsel %vm1168_vm14, %v2076_v59, -inf }
 0xbd8   : > { %2079 = vmax.xlane.f32.xlu1 %v2078_v18 }
 0xbe9   : > { %1308 = vperm.xlu1 %3268, %v4812_v23  }
 0xbed   : > { %3269 = vset.pattern.permute.xlu1 %v3896_v12 }
 0xbee   : > { %1566 = vperm.xlu1 %3269, %v4815_v25  }
 0xbf2   : > { %3271 = vset.pattern.permute.xlu1 %v3901_v21 }
 0xc12   : > { %1826 = vadd.xlane.f32.xlu1 %v1825_v29 }
 0xc23   : > { %1889 = vrot.lane.b32.xlu1 %v1882_v50, %s3902_s22 }
 0xc27   : > { %1943 = vrot.lane.b32.xlu1 %v1936_v51, %s3902_s22 }
 0xc65   : > { %v2080_v33 = vpop.xlane.xlu1 %2079 }
 0xc66   : > { %v2081_v13 = vmax.f32 %v2077_v32, %v2080_v33 }
 0xc68   : > { %v2082_v26 = vsub.f32 %v2077_v32, %v2081_v13  ;;  %2101 = vst.msk [vmem:[#allocation5] sm:$0xff] %vm2099_vm13, %v2081_v13  ;;  %2087 = vperm.xlu0 %3267, %v2081_v13  }
 0xc69   : > { %v1309_v12 = vpop.permute.xlu1 %1308 }
 0xc6a   : > { %v2083_v28 = vmul.f32 1.442695, %v2082_v26  ;;  %v1311_v27 = vmul.f32 %v1309_v12, %v1305_v15  ;;  %v1364_v34 = vmul.f32 %v1363_v16, %v1309_v12 }
 0xc6c   : > { %3303 = vpow2.f32 %v2083_v28  ;;  %v1361_v35 = vadd.f32 %v4693_v47, %v1311_v27  ;;  %v1413_v36 = vadd.f32 %v4695_v48, %v1364_v34  ;;  %2110 = vrot.lane.b32.xlu0 %v4772_v61, %s3903_s18  ;;  %v1297_v47 = vsel %vm1168_vm14, %v4670_v40, 0.0 }
 0xc6d   : > { %3270 = vset.pattern.permute.xlu0 %v3898_v11  ;;  %v1555_v48 = vsel %vm1168_vm14, %v4728_v31, 0.0  ;;  %v1813_v11 = vmul.f32 1.442695, %v1812_v20  ;;  %v1567_v51 = vpop.permute.xlu1 %1566 }
 0xc6e   : > { %1362 = vst.msk [vmem:[#allocation7] sm:$0xff] %vm1168_vm14, %v1361_v35  ;;  %1414 = vst.msk [vmem:[#allocation8] sm:$0xff] %vm1168_vm14, %v1413_v36 }
 0xc6f   : > { %3305 = vpow2.f32 %v1813_v11  ;;  %v3905_v11 = vmov (!%p2799_p4), 0  }
 0xc70   : > { %2167 = vrot.lane.b32.xlu0 %v4776_v24, %s3903_s18 }
 0xc75   : > { %v1563_v49 = vld [vmem:[#allocation7] sm:$0xff]  ;;  %v1625_v53 = vld [vmem:[#allocation8] sm:$0xff] }
 0xc76   : > { %v4829_v37 = vpop.eup %3303  ;;  %v1569_v52 = vmul.f32 %v1567_v51, %v1563_v49  ;;  %v1626_v57 = vmul.f32 %v1625_v53, %v1567_v51 }
 0xc77   : > { %2106 = vperm.xlu1 %3271, %v4829_v37  }
 0xc79   : > { %v3306_v61 = vpop.eup %3305 }
 0xc8f   : > { %1298 = vadd.xlane.f32.xlu0 %v1297_v47 }
 0xc93   : > { %1556 = vadd.xlane.f32.xlu0 %v1555_v48 }
 0xc9f   : > { %v1827_v60 = vpop.xlane.xlu1 %1826 }
 0xca3   : > { %v1890_v1 = vpop.permute.xlu1 %1889 }
 0xca7   : > { %v1944_v10 = vpop.permute.xlu1 %1943 }
 0xca9   : > { %1619 = vrot.lane.b32.xlu0 %v4750_v44, %s3891_s20 }
 0xcad   : > { %1673 = vrot.lane.b32.xlu0 %v4752_v45, %s3891_s20  ;;  %v1295_v45 = vld [vmem:[#allocation6] sm:$0xff] }
 0xcae   : > { %v1296_v42 = vmul.f32 %v4812_v23, %v1295_v45 }
 0xcb1   : > { %1836 = vperm.xlu0 %3270, %v3306_v61  }
 0xcb5   : > { %3272 = vset.pattern.permute.xlu0 %v3901_v21 }
 0xcb6   : > { %3309 = vset.pattern.permute.xlu0 (!%p2799_p4), %v3905_v11 }
 0xce7   : > { %v2088_v40 = vpop.permute.xlu0 %2087 }
 0xce8   : > { %v2090_v24 = vsub.f32 %v2076_v59, %v2088_v40 }
 0xcea   : > { %v2091_v38 = vmul.f32 1.442695, %v2090_v24  ;;  %v3907_v24 = vmov (!%p2799_p4), 1  }
 0xceb   : > { %v2111_v39 = vpop.permute.xlu0 %2110 }
 0xcec   : > { %3307 = vpow2.f32 %v2091_v38  ;;  %v2116_v31 = vsel %vm1317_vm0, %v2111_v39, 0  ;;  %v3908_v38 = vmov (!%p2799_p4), 3   ;;  %v3314_v39 = vld [vmem:[#allocation23] sm:$0xff] (!%p2799_p4)  }
 0xced   : > { %2983 = vmatpush3.bf16.msra.mxu0 %v2116_v31  ;;  %v3315_v31 = vld [vmem:[#allocation26] sm:$0xff] (!%p2799_p4)  }
 0xcef   : > { %v2168_v14 = vpop.permute.xlu0 %2167 }
 0xcf0   : > { %v2170_v19 = vsel %vm1317_vm0, %v2168_v14, 0  ;;  %vm1893_vm0 = vcmask 195712   ;;  %v3909_v14 = vmov (!%p2799_p4), 0.0  }
 0xcf1   : > { %2989 = vmatpush3.bf16.msra.mxu1 %v2170_v19  ;;  %2994 = vmatprep.subr.bf16.mxu0 (!%p2799_p4), %v3909_v14  ;;  %v3316_v19 = vld [vmem:[#allocation23 + $0x8] sm:$0xff] (!%p2799_p4)  }
 0xcf2   : > { %3002 = vmatprep.subr.bf16.mxu1 (!%p2799_p4), %v3909_v14 }
 0xcf6   : > { %v3308_v20 = vpop.eup %3307  ;;  %v2107_v26 = vpop.permute.xlu1 %2106 }
 0xcf7   : > { %v2095_v44 = vsel %vm1168_vm14, %v3308_v20, 0.0  ;;  %v2102_v41 = vpack.c.bf16 %v3308_v20, %v3308_v20  ;;  %v3317_v20 = vld [vmem:[#allocation26 + $0x8] sm:$0xff] (!%p2799_p4)  }
 0xcf8   : > { %2096 = vadd.xlane.f32.xlu0 %v2095_v44 }
 0xcf9   : > { %2985 = vmatmul.mubr.msk.bf16.vlgmr.msra.gmra.mrb[32].mxu0 %vm1168_vm14, %v2102_v41  ;;  %2991 = vmatmul.mubr.msk.bf16.vlgmr.msra.gmra.mrb[32].mxu1 %vm1168_vm14, %v2102_v41 }
 0xcfa   : > { %2995 = vmatpush3.bf16.msra.mxu0 (!%p2799_p4), %v3314_v39  ;;  %3003 = vmatpush3.bf16.msra.mxu1 (!%p2799_p4), %v3315_v31 }
 0xcfb   : > { %2996 = vmatprep.subr.bf16.mxu0 (!%p2799_p4), %v3909_v14  ;;  %3004 = vmatprep.subr.bf16.mxu1 (!%p2799_p4), %v3909_v14 }
 0xcfc   : > { %2998 = vmatprep.mubr.msk.bf16.mxu0 (!%p2799_p4), %vm3910_vm2, %v3909_v14  ;;  %3006 = vmatprep.mubr.msk.bf16.mxu1 (!%p2799_p4), %vm3910_vm2, %v3909_v14 }
 0xcfe   : > { %2997 = vmatpush3.bf16.msra.mxu0 (!%p2799_p4), %v3316_v19  ;;  %3005 = vmatpush3.bf16.msra.mxu1 (!%p2799_p4), %v3317_v20 }
 0xd1c   : > { %v1299_v43 = vpop.xlane.xlu0 %1298 }
 0xd1d   : > { %v1300_v46 = vadd.f32 %v1299_v43, %v1296_v42 }
 0xd1f   : > { %1302 = vst.msk [vmem:[#allocation6] sm:$0xff] %vm1301_vm3, %v1300_v46 }
 0xd20   : > { %v1557_v50 = vpop.xlane.xlu0 %1556 }
 0xd24   : > { %v1620_v54 = vpop.permute.xlu0 %1619 }
 0xd25   : > { %v1622_v55 = vadd.f32 %v1620_v54, %v1569_v52 }
 0xd26   : > { %v1553_v56 = vld [vmem:[#allocation6] sm:$0xff] }
 0xd27   : > { %v1554_v58 = vmul.f32 %v4815_v25, %v1553_v56  ;;  %1624 = vst.msk [vmem:[#allocation7] sm:$0xff] %vm1623_vm15, %v1622_v55 }
 0xd28   : > { %v1674_v62 = vpop.permute.xlu0 %1673 }
 0xd29   : > { %v1558_v63 = vadd.f32 %v1557_v50, %v1554_v58  ;;  %v1676_v0 = vadd.f32 %v1674_v62, %v1626_v57 }
 0xd2b   : > { %1560 = vst.msk [vmem:[#allocation6] sm:$0xff] %vm1559_vm6, %v1558_v63 }
 0xd2c   : > { %1677 = vst.msk [vmem:[#allocation8] sm:$0xff] %vm1623_vm15, %v1676_v0 }
 0xd2e   : > { %v1833_v3 = vld [vmem:[#allocation7] sm:$0xff] }
 0xd30   : > { %v1837_v2 = vpop.permute.xlu0 %1836 }
 0xd31   : > { %v1839_v4 = vmul.f32 %v1837_v2, %v1833_v3 }
 0xd32   : > { %v1823_v7 = vld [vmem:[#allocation6] sm:$0xff] }
 0xd33   : > { %v1895_v6 = vld [vmem:[#allocation8] sm:$0xff]  ;;  %v1892_v30 = vadd.f32 %v1890_v1, %v1839_v4  ;;  %v1824_v9 = vmul.f32 %v3306_v61, %v1823_v7  ;;  %v3906_v61 = vmov (!%p2799_p4), 2   ;;  %v2804_v7 = vld [vmem:[#allocation27] ss:$0 sm:$0xff] (!%p2799_p4) }
 0xd34   : > { %v1896_v8 = vmul.f32 %v1895_v6, %v1837_v2  ;;  %3311 = vset.pattern.permute.xlu1 (!%p2799_p4), %v3906_v61  ;;  %v2800_v6 = vld [vmem:[#allocation24] ss:$0 sm:$0xff] (!%p2799_p4) }
 0xd35   : > { %1894 = vst.msk [vmem:[#allocation7] sm:$0xff] %vm1893_vm0, %v1892_v30  ;;  %v1828_v59 = vadd.f32 %v1827_v60, %v1824_v9 }
 0xd36   : > { %v1946_v17 = vadd.f32 %v1944_v10, %v1896_v8  ;;  %v2335_v8 = vld [vmem:[%s700_s13] sm:$0xff] (!%p2799_p4)  ;;  %v2404_v10 = vld [vmem:[%s709_s0] sm:$0xff] (!%p2799_p4) }
 0xd37   : > { %1830 = vst.msk [vmem:[#allocation6] sm:$0xff] %vm1829_vm9, %v1828_v59 }
 0xd38   : > { %1947 = vst.msk [vmem:[#allocation8] sm:$0xff] %vm1893_vm0, %v1946_v17 }
 0xd3c   : > { %v2103_v28 = vld [vmem:[#allocation7] sm:$0xff] }
 0xd3d   : > { %v2109_v34 = vmul.f32 %v2107_v26, %v2103_v28 }
 0xd3e   : > { %v2093_v18 = vld [vmem:[#allocation6] sm:$0xff] }
 0xd3f   : > { %v2094_v5 = vmul.f32 %v4829_v37, %v2093_v18  ;;  %v2165_v12 = vld [vmem:[#allocation8] sm:$0xff] }
 0xd40   : > { %v2166_v27 = vmul.f32 %v2165_v12, %v2107_v26 }
 0xd85   : > { %v2097_v22 = vpop.xlane.xlu0 %2096 }
 0xd86   : > { %v2098_v23 = vadd.f32 %v2097_v22, %v2094_v5 }
 0xd88   : > { %2100 = vst.msk [vmem:[#allocation6] sm:$0xff] %vm2099_vm13, %v2098_v23 }
 0xd8f   : > { %v2222_v48 = vld [vmem:[#allocation6] sm:$0xff] (!%p2799_p4) }
 0xd90   : > { %3318 = vrcp.f32 (!%p2799_p4), %v2222_v48 }
 0xd9a   : > { %v3319_v40 = vpop.eup (!%p2799_p4), %3318 }
 0xdcc   : > { %v2152_v21 = vpop.f32.mrb[32].mxu0  ;;  %v2206_v25 = vpop.f32.mrb[32].mxu1 }
 0xdcd   : > { %2213 = vrot.lane.b32.xlu0 %v2206_v25, %s3904_s19  ;;  %v2992_v29 = vpop.f32.mrb[33].mxu1  ;;  %2159 = vrot.lane.b32.xlu1 %v2152_v21, %s3904_s19  ;;  %v2986_v32 = vpop.f32.mrb[33].mxu0 }
 0xdce   : > { %v2155_v33 = vpop.f32.mrb[34].mxu0  ;;  %v2209_v13 = vpop.f32.mrb[34].mxu1 }
 0xdcf   : > { %v2987_v15 = vpop.f32.mrb[35].mxu0  ;;  %v2993_v16 = vpop.f32.mrb[35].mxu1 }
 0xdd1   : > { %2227 = vperm.xlu0 (!%p2799_p4), %3309, %v3319_v40   ;;  %2247 = vperm.xlu1 (!%p2799_p4), %3311, %v3319_v40  }
 0xdd5   : > { %3310 = vset.pattern.permute.xlu0 (!%p2799_p4), %v3907_v24  ;;  %3312 = vset.pattern.permute.xlu1 (!%p2799_p4), %v3908_v38 }
 0xdd6   : > { %2237 = vperm.xlu0 (!%p2799_p4), %3310, %v3319_v40   ;;  %2257 = vperm.xlu1 (!%p2799_p4), %3312, %v3319_v40  }
 0xdda   : > { %3313 = vset.pattern.permute.xlu0 (!%p2799_p4), %v3908_v38 }
 0xe3c   : > { %2221 = sbr.rel (%p2799_p4) target bundleno = 3924 (0xf54), region = 140 }
 0xe3f   : > { %v2214_v35 = vpop.permute.xlu0 %2213  ;;  %v2160_v36 = vpop.permute.xlu1 %2159 }
 0xe40   : > { %v2216_v37 = vadd.f32 %v2214_v35, %v2166_v27  ;;  %v2162_v47 = vadd.f32 %v2160_v36, %v2109_v34 }
 0xe42   : > { %2217 = vst.msk [vmem:[#allocation8] sm:$0xff] %vm2163_vm1, %v2216_v37  ;;  %2164 = vst.msk [vmem:[#allocation7] sm:$0xff] %vm2163_vm1, %v2162_v47 }
 0xe49   : > { %v2224_v44 = vld [vmem:[#allocation7] sm:$0xff]  ;;  %v2232_v41 = vld [vmem:[#allocation8] sm:$0xff] }
 0xe50   : > { %v2228_v45 = vpop.permute.xlu0 %2227  ;;  %v2248_v53 = vpop.permute.xlu1 %2247 }
 0xe51   : > { %v2230_v42 = vmul.f32 %v2228_v45, %v2224_v44  ;;  %v2233_v43 = vmul.f32 %v2232_v41, %v2228_v45 }
 0xe53   : > { %2231 = vst.msk [vmem:[#allocation7] sm:$0xff] %vm1168_vm14, %v2230_v42  ;;  %2234 = vst.msk [vmem:[#allocation8] sm:$0xff] %vm1168_vm14, %v2233_v43 }
 0xe55   : > { %v2238_v46 = vpop.permute.xlu0 %2237  ;;  %v2258_v58 = vpop.permute.xlu1 %2257 }
 0xe5a   : > { %v2235_v49 = vld [vmem:[#allocation7] sm:$0xff]  ;;  %v2242_v50 = vld [vmem:[#allocation8] sm:$0xff] }
 0xe5b   : > { %v2240_v51 = vmul.f32 %v2238_v46, %v2235_v49  ;;  %v2243_v52 = vmul.f32 %v2242_v50, %v2238_v46 }
 0xe5d   : > { %2241 = vst.msk [vmem:[#allocation7] sm:$0xff] %vm1623_vm15, %v2240_v51  ;;  %2244 = vst.msk [vmem:[#allocation8] sm:$0xff] %vm1623_vm15, %v2243_v52 }
 0xe64   : > { %v2245_v54 = vld [vmem:[#allocation7] sm:$0xff]  ;;  %v2252_v55 = vld [vmem:[#allocation8] sm:$0xff] }
 0xe65   : > { %v2250_v56 = vmul.f32 %v2248_v53, %v2245_v54  ;;  %v2253_v57 = vmul.f32 %v2252_v55, %v2248_v53 }
 0xe67   : > { %2251 = vst.msk [vmem:[#allocation7] sm:$0xff] %vm1893_vm0, %v2250_v56  ;;  %2254 = vst.msk [vmem:[#allocation8] sm:$0xff] %vm1893_vm0, %v2253_v57 }
 0xe6e   : > { %v2255_v60 = vld [vmem:[#allocation7] sm:$0xff]  ;;  %v2262_v62 = vld [vmem:[#allocation8] sm:$0xff] }
 0xe6f   : > { %v2260_v63 = vmul.f32 %v2258_v58, %v2255_v60  ;;  %v2263_v0 = vmul.f32 %v2262_v62, %v2258_v58 }
 0xe71   : > { %2261 = vst.msk [vmem:[#allocation7] sm:$0xff] %vm2163_vm1, %v2260_v63  ;;  %2264 = vst.msk [vmem:[#allocation8] sm:$0xff] %vm2163_vm1, %v2263_v0 }
 0xe78   : > { %v2265_v1 = vld [vmem:[#allocation7] sm:$0xff]  ;;  %v2267_v2 = vld [vmem:[#allocation8] sm:$0xff] }
 0xe79   : > { %v2266_v3 = vpack.c.bf16 %v2265_v1, %v2265_v1  ;;  %v2268_v4 = vpack.c.bf16 %v2267_v2, %v2267_v2 }
 0xe7b   : > { %2999 = vmatmul.mubr.msk.bf16.vlgmr.msra.gmra.mrb[0].mxu0 %vm1043_vm12, %v2266_v3  ;;  %3007 = vmatmul.mubr.msk.bf16.vlgmr.msra.gmra.mrb[0].mxu1 %vm1043_vm12, %v2268_v4 }
 0xf4e   : > { %v2329_v30 = vpop.f32.mrb[0].mxu0  ;;  %v2398_v9 = vpop.f32.mrb[0].mxu1 }
 0xf4f   : > { %v2330_v17 = vadd.f32 %v2800_v6, %v2329_v30  ;;  %v2399_v59 = vadd.f32 %v2804_v7, %v2398_v9  ;;  %v3000_v18 = vpop.f32.mrb[1].mxu0  ;;  %v3008_v5 = vpop.f32.mrb[1].mxu1 }
 0xf50   : > { %v2332_v22 = vpop.f32.mrb[2].mxu0  ;;  %v2401_v23 = vpop.f32.mrb[2].mxu1 }
 0xf51   : > { %v2336_v21 = vadd.f32 %v2335_v8, %v2330_v17  ;;  %v2405_v25 = vadd.f32 %v2404_v10, %v2399_v59  ;;  %v3001_v29 = vpop.f32.mrb[3].mxu0  ;;  %v3009_v32 = vpop.f32.mrb[3].mxu1 }
 0xf53   : > { %2337 = vst.msk [vmem:[%s822_s4] sm:$0xff] %vm1043_vm12, %v2336_v21  ;;  %2406 = vst.msk [vmem:[%s5057_s8] sm:$0xff] %vm1043_vm12, %v2405_v25 }
 0xf54 PF: > { %s5156_s13 = sld [smem:[#allocation47_spill]]  ;;  %s5157_s14 = sld [smem:[#allocation46_spill]] }
 0xf55   : > { %s5158_s0 = sld [smem:[#allocation56_spill]]  ;;  %s2428_s30 = sshll.u32 %s822_s4, 4  ;;  %s4889_s30 = int_to_ptr.vmem [resolvable:$true] %s2428_s30 }
 0xf56   : > { %s5159_s2 = sld [smem:[#allocation76_spill]]  ;;  %s2408_s22 = scalar_lea.sflag [#allocation11], %s4520_s12 }
 0xf57   : > { %s3664_s18 = scalar_lea.vmem %s4889_s30, 128  ;;  %s3911_s19 = smov [#allocation29]  }
 0xf58   : > { %p3665_p13 = scmp.ne.s32.totalorder %s4889_s30, %s3664_s18  ;;  %s3668_s5 = sshll.u32 %s3911_s19, 4  ;;  %s3669_s5 = int_to_ptr.vmem [resolvable:$false] %s3668_s5 }
 0xf59   : > { %s3670_s4 = scalar_lea.vmem %s3669_s5, 256  ;;  %p3671_p6 = scmp.lt.s32.totalorder %s4889_s30, %s3669_s5 }
 0xf5a   : > { %s2810_s1 = sshll.u32 %s5156_s13, 1  ;;  %p3672_p3 = scmp.lt.s32.totalorder %s3670_s4, %s3664_s18 }
 0xf5b   : > { %s4884_s20 = sadd.s32 %s5157_s14, %s2810_s1  ;;  %p5160_p10 = scmp.ne.s32.totalorder %s5158_s0, 0 }
 0xf5c   : > { %s2811_s25 = sshll.u32 %s4884_s20, 7  ;;  %p3673_p5 = por %p3672_p3, %p3671_p6 }
 0xf5d   : > { %s2426_s15 = scalar_lea.hbm %s5159_s2, %s2811_s25  ;;  %p3666_p0 = pnand %p3665_p13, %p5160_p10 }
 0xf5f   : > { %p3667_p11 = pneg %p3666_p0 }
 0xf61   : > { %p3674_p8 = pnand %p3673_p5, %p3667_p11 }
 0xf63   : > { %3677 = shalt.err (!%p3674_p8)
}
 0xf64   : > { %s3678_s13 = scalar_lea.hbm %s2426_s15, 128  ;;  %s3682_s24 = scalar_lea.hbm %s5159_s2, 512 }
 0xf65   : > { %p3679_p9 = scmp.ne.s32.totalorder %s2426_s15, %s3678_s13  ;;  %p3683_p1 = scmp.lt.u32.totalorder %s2426_s15, %s5159_s2 }
 0xf66   : > { %p3684_p7 = scmp.lt.u32.totalorder %s3682_s24, %s3678_s13  ;;  %p3686_p13 = scmp.lt.u32.totalorder %s3678_s13, %s2426_s15 }
 0xf67   : > { %p3680_p2 = pnand %p3679_p9, %p5160_p10 }
 0xf68   : > { %p3685_p4 = por %p3684_p7, %p3683_p1 }
 0xf69   : > { %p3681_p12 = pneg %p3680_p2 }
 0xf6a   : > { %p3687_p0 = por %p3686_p13, %p3685_p4 }
 0xf6c   : > { %p3688_p11 = pnand %p3687_p0, %p3681_p12 }
 0xf6e   : > { %3691 = shalt.err (!%p3688_p11)
}
 0xf6f   : > { %3050 = dma.vmem_to_hbm [thread:$0]  (%p5160_p10), %s4889_s30, 128, %s2426_s15, %s2408_s22  }
 0xf70   : > { %s5161_s5 = sld [smem:[#allocation77_spill]]  ;;  %s5162_s4 = scalar_lea.vmem [#allocation30], %s4523_s27 }
 0xf71   : > { %s2443_s14 = sshll.u32 %s5162_s4, 4  ;;  %s2413_s13 = scalar_lea.sflag [#allocation31], %s4520_s12  ;;  %s2444_s14 = int_to_ptr.vmem [resolvable:$true] %s2443_s14 }
 0xf72   : > { %s3692_s1 = scalar_lea.vmem %s2444_s14, 128  ;;  %s3912_s24 = smov [#allocation30]  }
 0xf73   : > { %p3693_p6 = scmp.ne.s32.totalorder %s2444_s14, %s3692_s1  ;;  %s3696_s6 = sshll.u32 %s3912_s24, 4  ;;  %s3697_s6 = int_to_ptr.vmem [resolvable:$false] %s3696_s6 }
 0xf74   : > { %s3698_s2 = scalar_lea.vmem %s3697_s6, 256  ;;  %p3699_p8 = scmp.lt.s32.totalorder %s2444_s14, %s3697_s6 }
 0xf75   : > { %p3694_p3 = pnand %p3693_p6, %p5160_p10  ;;  %p3700_p9 = scmp.lt.s32.totalorder %s3698_s2, %s3692_s1 }
 0xf76   : > { %s4918_s8 = scalar_lea.hbm %s5161_s5, %s2811_s25 }
 0xf77   : > { %p3695_p5 = pneg %p3694_p3  ;;  %p3701_p2 = por %p3700_p9, %p3699_p8 }
 0xf79   : > { %p3702_p12 = pnand %p3701_p2, %p3695_p5 }
 0xf7b   : > { %3705 = shalt.err (!%p3702_p12)
}
 0xf7c   : > { %s3706_s12 = scalar_lea.hbm %s4918_s8, 128  ;;  %s3710_s30 = scalar_lea.hbm %s5161_s5, 512 }
 0xf7d   : > { %p3707_p1 = scmp.ne.s32.totalorder %s4918_s8, %s3706_s12  ;;  %p3711_p13 = scmp.lt.u32.totalorder %s4918_s8, %s5161_s5 }
 0xf7e   : > { %p3712_p0 = scmp.lt.u32.totalorder %s3710_s30, %s3706_s12  ;;  %p3714_p6 = scmp.lt.u32.totalorder %s3706_s12, %s4918_s8 }
 0xf7f   : > { %p3708_p7 = pnand %p3707_p1, %p5160_p10 }
 0xf80   : > { %p3713_p11 = por %p3712_p0, %p3711_p13 }
 0xf81   : > { %p3709_p4 = pneg %p3708_p7 }
 0xf82   : > { %p3715_p3 = por %p3714_p6, %p3713_p11 }
 0xf84   : > { %p3716_p5 = pnand %p3715_p3, %p3709_p4 }
 0xf86   : > { %3719 = shalt.err (!%p3716_p5)
}
 0xf87   : > { %3051 = dma.vmem_to_hbm [thread:$0]  (%p5160_p10), %s2444_s14, 128, %s4918_s8, %s2413_s13  }
 0xf88 PF: > { %s5163_s2 = sld [smem:[#allocation44_spill]]  ;;  %s5164_s22 = sld [smem:[#allocation59_spill]] }
 0xf89   : > { %p3116_p8 = scmp.ge.s32.totalorder %s3866_s21, 2 }
 0xf8e   : > { %s2455_s18 = sand.u32 1, %s5163_s2   ;;  %p5165_p9 = scmp.ne.s32.totalorder %s5164_s22, 0 }
 0xf8f   : > { %s2456_s19 = scalar_lea.sflag [#allocation11], %s2455_s18 }
 0xf90   : > { %p3093_p2 = pnand %p3116_p8, %p5165_p9 }
 0xf92   : > { %3809 = dma.done.wait (!%p3093_p2), %s2456_s19, 128  }
 0xf93   : > { %3811 = vsyncadd (!%p3093_p2), %s2456_s19, 4294967168  ;;  %s2465_s4 = scalar_lea.sflag [#allocation31], %s2455_s18 }
 0xf94   : > { %3813 = dma.done.wait (!%p3093_p2), %s2465_s4, 128  }
 0xf95   : > { %3815 = vsyncadd (!%p3093_p2), %s2465_s4, 4294967168  ;;  %s47_s21 = sadd.s32 1, %s3866_s21   ;;  %s5167_s24 = sld [smem:[#allocation43_spill]] }
 0xf96   : > { %p4945_p12 = scmp.ge.s32.totalorder %s47_s21, 10   ;;  %s5168_s8 = sld [smem:[#allocation58_spill]] }
 0xf97   : > { %s5169_s14 = sld [smem:[#allocation57_spill]]  ;;  %s5170_s13 = sld [smem:[#allocation48_spill]] }
 0xf98   : > { %s5171_s30 = sld [smem:[#allocation49_spill]]  ;;  %s5172_s18 = sld [smem:[#allocation50_spill]] }
 0xf99   : > { %s5173_s19 = sld [smem:[#allocation52_spill]]  ;;  %s5174_s1 = sld [smem:[#allocation53_spill]] }
 0xf9a   : > { %s5175_s20 = sld [smem:[#allocation54_spill]]  ;;  %s5177_s25 = smov %s3826_s26 }
 0xf9b   : > { %s5179_s27 = smov %s3834_s28  ;;  %s5180_s28 = smov %s3838_s29 }
 0xf9c   : > { %s5178_s26 = smov %s5168_s8  ;;  %46 = sbr.rel (!%p4945_p12) target bundleno = 39 (0x27), region = 223 }
 0xf9d   : > { %s5181_s29 = smov %s5169_s14  ;;  %s5182_s0 = smov %s5170_s13 }
 0xfa3   :  { %2470 = vsyncpa [#allocation10], 1 }
 0xfa4   :  { %2472 = vsyncpa [#allocation10 + $0x1], 1 }
 0xfa5   :  { %2473 = vsyncpa [#allocation13], 1 }
 0xfa6   :  { %2475 = vsyncpa [#allocation13 + $0x1], 1 }
 0xfa7   :  { %2476 = vsyncpa [#allocation16], 1 }
 0xfa8   :  { %2478 = vsyncpa [#allocation16 + $0x1], 1 }
 0xfa9   :  { %2479 = vsyncpa [#allocation19], 1 }
 0xfaa   :  { %2480 = vsyncpa [#allocation22], 1 }
 0xfab   :  { %2481 = vsyncpa [#allocation25], 1 }
 0xfac   :  { %2482 = vsyncpa [#allocation28], 1 }
 0xfad   :  { %2483 = vsyncpa [#allocation11], 1 }
 0xfae   :  { %2485 = vsyncpa [#allocation11 + $0x1], 1 }
 0xfaf   :  { %2486 = vsyncpa [#allocation31], 1 }
 0xfb0   :  { %2488 = vsyncpa [#allocation31 + $0x1], 1 }

</bundles_post_ra>
